<compile_context>
chip_gen: v7x
topology: tpu7x:2x2x1
jax: 0.10.0
libtpu: 0.0.40
codegen_flags: <defaults>
</compile_context>

<pallas_src>
import jax
import jax.numpy as jnp
from jax import lax
from jax.experimental import pallas as pl
from jax.experimental.pallas import tpu as pltpu

EPS = 1e-5


# ------------------------------ fused kernel -------------------------------- #

def _make_fused_kernel(T, Bp, H):
    """Whole GRU-GRU forward in a single kernel. T, Bp, H are static ints."""

    def kernel(x_ref,
               wi0, bi0, wh0, bhn0,      # gru1 layer 0 (input_bn + b_hr/b_hz folded)
               wi1, bi1, wh1, bhn1,      # gru1 layer 1
               wi2, bi2, wh2, bhn2,      # gru2 layer 0 (mid_bn + b_hr/b_hz folded)
               wi3, bi3, wh3, bhn3,      # gru2 layer 1
               w1, b1, w2, b2,           # head: fc1 (bn_final folded in), fc2 (lane-padded)
               o_ref,
               seq_a, seq_b, xg_s):      # VMEM scratch

        def gru_layer(in_ref, wi_ref, bi_ref, wh_ref, bhn_ref, out_ref):
            # Hoisted input projection for the whole sequence: one
            # (T*Bp, D) x (D, 3H) MXU matmul.  bi already holds b_ir+b_hr,
            # b_iz+b_hz, b_in (and any folded BN affine).
            xg_s[...] = (jnp.dot(in_ref[...], wi_ref[...],
                                 preferred_element_type=jnp.float32)
                         + bi_ref[...])
            wh = wh_ref[...]
            # Hoist the (1,H)->(Bp,H) broadcast of b_hn out of the time loop.
            bhn = jnp.broadcast_to(bhn_ref[...], (Bp, H))

            def step(t, h):
                off = pl.multiple_of(t * Bp, Bp)          # sublane-aligned slice
                xg_t = xg_s[pl.ds(off, Bp), :]
                # Single fused (Bp,H)x(H,3H) hidden matmul, bias-free.
                hg = jnp.dot(h, wh, preferred_element_type=jnp.float32)
                # r and z fused into one full-vreg (Bp, 2H) add + sigmoid.
                rz = jax.nn.sigmoid(xg_t[:, :2 * H] + hg[:, :2 * H])
                r = rz[:, :H]
                z = rz[:, H:]
                n = jnp.tanh(xg_t[:, 2 * H:] + r * (hg[:, 2 * H:] + bhn))
                h_new = (1.0 - z) * n + z * h
                if out_ref is not None:                   # static Python branch
                    out_ref[pl.ds(off, Bp), :] = h_new
                return h_new

            h0 = jnp.zeros((Bp, H), jnp.float32)
            return lax.fori_loop(0, T, step, h0, unroll=True)

        gru_layer(x_ref, wi0, bi0, wh0, bhn0, seq_a)          # gru1 layer 0
        gru_layer(seq_a, wi1, bi1, wh1, bhn1, seq_b)          # gru1 layer 1
        gru_layer(seq_b, wi2, bi2, wh2, bhn2, seq_a)          # gru2 layer 0
        h_last = gru_layer(seq_a, wi3, bi3, wh3, bhn3, None)  # gru2 layer 1 (last h only)

        # Head: (bn_final folded into w1/b1) -> relu -> fc2 (lane-dense output).
        hfc = jnp.maximum(
            jnp.dot(h_last, w1[...], preferred_element_type=jnp.float32)
            + b1[...], 0.0)
        o_ref[...] = (jnp.dot(hfc, w2[...], preferred_element_type=jnp.float32)
                      + b2[...])

    return kernel


# ------------------------------ param folding ------------------------------- #

def _fold_bn(bn):
    """Eval-mode BatchNorm1d -> per-feature (scale, shift)."""
    gamma, beta, mean, var = bn
    scale = gamma / jnp.sqrt(var + EPS)
    shift = beta - mean * scale
    return scale, shift                     # both (F,)


def _fuse_gru_layer(p, in_scale=None, in_shift=None):
    """Concat r|z|n weights, fold b_hr/b_hz into the input bias (exact), and
    optionally fold a preceding per-feature affine into the input projection.
    Returns (wi (D,3H), bi (1,3H), wh (H,3H), bhn (1,H))."""
    wi = jnp.concatenate([p["wir"], p["wiz"], p["win"]], axis=1)
    bi = jnp.concatenate([p["bir"] + p["bhr"],
                          p["biz"] + p["bhz"],
                          p["bin"]], axis=1)
    wh = jnp.concatenate([p["whr"], p["whz"], p["whn"]], axis=1)
    bhn = p["bhn"]                                           # stays inside r * (...)
    if in_scale is not None:
        bi = bi + in_shift[None, :] @ wi
        wi = in_scale[:, None] * wi
    return wi, bi, wh, bhn


# --------------------------------- forward ---------------------------------- #

def gru_gru_forward(x, params):
    """x: (B, T, F) -> (B, output_size). Single fused Pallas kernel."""
    B, T, F = x.shape
    Bp = max(8, ((B + 7) // 8) * 8)            # pad batch to a sublane multiple
    H1 = params["gru1"][0]["whr"].shape[0]
    H2 = params["gru2"][0]["whr"].shape[0]
    assert H1 == H2, "ping/pong seq scratch assumes hidden_size_gru1 == hidden_size_gru2"
    H = H1
    O = params["fc2"][0].shape[1]
    Op = ((O + 127) // 128) * 128              # lane-dense head output width

    in_s, in_sh = _fold_bn(params["input_bn"])
    mid_s, mid_sh = _fold_bn(params["mid_bn"])
    fin_s, fin_sh = _fold_bn(params["bn_final"])

    g10 = _fuse_gru_layer(params["gru1"][0], in_s, in_sh)    # input_bn folded
    g11 = _fuse_gru_layer(params["gru1"][1])
    g20 = _fuse_gru_layer(params["gru2"][0], mid_s, mid_sh)  # mid_bn folded
    g21 = _fuse_gru_layer(params["gru2"][1])

    w1, b1 = params["fc1"]
    w2, b2 = params["fc2"]
    w1f = fin_s[:, None] * w1                                # bn_final folded
    b1f = b1 + fin_sh[None, :] @ w1
    w2p = jnp.pad(w2, ((0, 0), (0, Op - O)))                 # lane-dense fc2
    b2p = jnp.pad(b2, ((0, 0), (0, Op - O)))

    # Time-major, batch-padded 2D layout: (T*Bp, F). One tiny XLA prep op
    # before the single kernel.
    xt = jnp.transpose(x, (1, 0, 2))                         # (T, B, F)
    xt = jnp.pad(xt, ((0, 0), (0, Bp - B), (0, 0)))
    x2 = xt.reshape(T * Bp, F).astype(jnp.float32)

    kernel = _make_fused_kernel(T, Bp, H)
    vmem_spec = pl.BlockSpec(memory_space=pltpu.MemorySpace.VMEM)
    out = pl.pallas_call(
        kernel,
        out_shape=jax.ShapeDtypeStruct((Bp, Op), jnp.float32),
        in_specs=[vmem_spec] * 21,
        out_specs=vmem_spec,
        scratch_shapes=[
            pltpu.VMEM((T * Bp, H), jnp.float32),      # seq ping
            pltpu.VMEM((T * Bp, H), jnp.float32),      # seq pong
            pltpu.VMEM((T * Bp, 3 * H), jnp.float32),  # per-layer gate slab xg
        ],
        compiler_params=pltpu.CompilerParams(
            vmem_limit_bytes=32 * 1024 * 1024),        # fits all generations (v7x: 64 MiB phys)
    )(x2, *g10, *g11, *g20, *g21, w1f, b1f, w2p, b2p)
    return out[:B, :O]


# ------------------------------ parameter init ------------------------------ #

def make_gru_layer_params(key, d_in, h):
    ks = jax.random.split(key, 12)
    bound = 1.0 / jnp.sqrt(jnp.float32(h))
    u = lambda kk, shape: jax.random.uniform(kk, shape, jnp.float32, -bound, bound)
    return dict(
        wir=u(ks[0], (d_in, h)), wiz=u(ks[1], (d_in, h)), win=u(ks[2], (d_in, h)),
        whr=u(ks[3], (h, h)),    whz=u(ks[4], (h, h)),    whn=u(ks[5], (h, h)),
        bir=u(ks[6], (1, h)),    biz=u(ks[7], (1, h)),    bin=u(ks[8], (1, h)),
        bhr=u(ks[9], (1, h)),    bhz=u(ks[10], (1, h)),   bhn=u(ks[11], (1, h)),
    )


def make_bn_params(key, f):
    k1, k2, k3, k4 = jax.random.split(key, 4)
    gamma = 1.0 + 0.1 * jax.random.normal(k1, (f,), jnp.float32)
    beta = 0.1 * jax.random.normal(k2, (f,), jnp.float32)
    mean = 0.1 * jax.random.normal(k3, (f,), jnp.float32)
    var = 0.5 + 0.5 * jnp.abs(jax.random.normal(k4, (f,), jnp.float32))
    return (gamma, beta, mean, var)


def make_linear_params(key, f_in, f_out):
    k1, k2 = jax.random.split(key)
    bound = 1.0 / jnp.sqrt(jnp.float32(f_in))
    w = jax.random.uniform(k1, (f_in, f_out), jnp.float32, -bound, bound)
    b = jax.random.uniform(k2, (1, f_out), jnp.float32, -bound, bound)
    return (w, b)


def make_params(key, input_size, h1=64, h2=64, num_layers=2, output_size=1):
    keys = jax.random.split(key, 8)
    g1_keys = jax.random.split(keys[0], num_layers)
    g2_keys = jax.random.split(keys[1], num_layers)
    return dict(
        input_bn=make_bn_params(keys[2], input_size),
        gru1=[make_gru_layer_params(g1_keys[i], input_size if i == 0 else h1, h1)
              for i in range(num_layers)],
        mid_bn=make_bn_params(keys[3], h1),
        gru2=[make_gru_layer_params(g2_keys[i], h1 if i == 0 else h2, h2)
              for i in range(num_layers)],
        bn_final=make_bn_params(keys[4], h2),
        fc1=make_linear_params(keys[5], h2, h2 // 2),
        fc2=make_linear_params(keys[6], h2 // 2, output_size),
    )


# ----------------------------- pure-JAX reference --------------------------- #

def _bn_ref(x, bn):
    gamma, beta, mean, var = bn
    return (x - mean) / jnp.sqrt(var + EPS) * gamma + beta


def _gru_layer_ref(x_tbd, p):
    H = p["whr"].shape[0]

    def step(h, x_t):
        r = jax.nn.sigmoid(x_t @ p["wir"] + p["bir"][0] + (h @ p["whr"]) + p["bhr"][0])
        z = jax.nn.sigmoid(x_t @ p["wiz"] + p["biz"][0] + (h @ p["whz"]) + p["bhz"][0])
        n = jnp.tanh(x_t @ p["win"] + p["bin"][0] + r * (h @ p["whn"] + p["bhn"][0]))
        h_new = (1.0 - z) * n + z * h
        return h_new, h_new

    h0 = jnp.zeros((x_tbd.shape[1], H), jnp.float32)
    _, hs = jax.lax.scan(step, h0, x_tbd)
    return hs


def forward_ref(x, params):
    B, T, F = x.shape
    xf = _bn_ref(x.reshape(B * T, F), params["input_bn"])
    h = xf.reshape(B, T, F).transpose(1, 0, 2)
    for layer in params["gru1"]:
        h = _gru_layer_ref(h, layer)
    h1 = _bn_ref(h.transpose(1, 0, 2).reshape(B * T, -1), params["mid_bn"])
    h = h1.reshape(B, T, -1).transpose(1, 0, 2)
    for layer in params["gru2"]:
        h = _gru_layer_ref(h, layer)
    last = _bn_ref(h[-1], params["bn_final"])
    w1, b1 = params["fc1"]
    w2, b2 = params["fc2"]
    return jnp.maximum(last @ w1 + b1, 0.0) @ w2 + b2


# ----------------------------------- main ------------------------------------ #

if __name__ == "__main__":
    B, T, F = 2, 8, 16
    key = jax.random.PRNGKey(0)
    kx, kp = jax.random.split(key)
    x = jax.random.normal(kx, (B, T, F), jnp.float32)
    params = make_params(kp, input_size=F, h1=64, h2=64, num_layers=2, output_size=1)

    fwd = jax.jit(gru_gru_forward)
    out = jax.block_until_ready(fwd(x, params))
    ref = jax.block_until_ready(forward_ref(x, params))

    assert out.shape == (B, 1), out.shape
    assert jnp.allclose(out, ref, atol=1e-2, rtol=1e-2), (out, ref)
    print("KERNEL_OK")
</pallas_src>

<mosaic_0001>
module attributes {stable_mosaic.version = 11 : i64} {
  func.func @kernel(%arg0: memref<64x16xf32, #tpu.memory_space<vmem>>, %arg1: memref<16x192xf32, #tpu.memory_space<vmem>>, %arg2: memref<1x192xf32, #tpu.memory_space<vmem>>, %arg3: memref<64x192xf32, #tpu.memory_space<vmem>>, %arg4: memref<1x64xf32, #tpu.memory_space<vmem>>, %arg5: memref<64x192xf32, #tpu.memory_space<vmem>>, %arg6: memref<1x192xf32, #tpu.memory_space<vmem>>, %arg7: memref<64x192xf32, #tpu.memory_space<vmem>>, %arg8: memref<1x64xf32, #tpu.memory_space<vmem>>, %arg9: memref<64x192xf32, #tpu.memory_space<vmem>>, %arg10: memref<1x192xf32, #tpu.memory_space<vmem>>, %arg11: memref<64x192xf32, #tpu.memory_space<vmem>>, %arg12: memref<1x64xf32, #tpu.memory_space<vmem>>, %arg13: memref<64x192xf32, #tpu.memory_space<vmem>>, %arg14: memref<1x192xf32, #tpu.memory_space<vmem>>, %arg15: memref<64x192xf32, #tpu.memory_space<vmem>>, %arg16: memref<1x64xf32, #tpu.memory_space<vmem>>, %arg17: memref<64x32xf32, #tpu.memory_space<vmem>>, %arg18: memref<1x32xf32, #tpu.memory_space<vmem>>, %arg19: memref<32x128xf32, #tpu.memory_space<vmem>>, %arg20: memref<1x128xf32, #tpu.memory_space<vmem>>, %arg21: memref<8x128xf32, #tpu.memory_space<vmem>>, %arg22: memref<64x64xf32, #tpu.memory_space<vmem>>, %arg23: memref<64x64xf32, #tpu.memory_space<vmem>>, %arg24: memref<64x192xf32, #tpu.memory_space<vmem>>) attributes {dimension_semantics = [], scalar_prefetch = 0 : i64, scratch_operands = 3 : i64, tpu.core_type = #tpu.core_type<tc>} {
    %c0 = arith.constant 0 : index
    %c0_0 = arith.constant 0 : index
    %0 = vector.load %arg0[%c0, %c0_0] : memref<64x16xf32, #tpu.memory_space<vmem>>, vector<64x16xf32>
    %c0_1 = arith.constant 0 : index
    %c0_2 = arith.constant 0 : index
    %1 = vector.load %arg1[%c0_1, %c0_2] : memref<16x192xf32, #tpu.memory_space<vmem>>, vector<16x192xf32>
    %cst = arith.constant dense<0.000000e+00> : vector<64x192xf32>
    %2 = tpu.matmul %0, %1, %cst {dimension_numbers = #tpu.dot_dimension_numbers<[1], [0], [0], [1], [0, 0, 1, 1], [], []>} : vector<64x16xf32>, vector<16x192xf32>, vector<64x192xf32> -> vector<64x192xf32>
    %c0_3 = arith.constant 0 : index
    %c0_4 = arith.constant 0 : index
    %3 = vector.load %arg2[%c0_3, %c0_4] : memref<1x192xf32, #tpu.memory_space<vmem>>, vector<1x192xf32>
    %4 = vector.broadcast %3 : vector<1x192xf32> to vector<64x192xf32>
    %5 = arith.addf %2, %4 : vector<64x192xf32>
    %c0_5 = arith.constant 0 : index
    %c0_6 = arith.constant 0 : index
    %6 = vector.load %arg24[%c0_5, %c0_6] : memref<64x192xf32, #tpu.memory_space<vmem>>, vector<64x192xf32>
    tpu.vector_store %arg24[%c0_5, %c0_6], %5 {strides = array<i32>} : memref<64x192xf32, #tpu.memory_space<vmem>>, vector<64x192xf32>,
    %c0_7 = arith.constant 0 : index
    %c0_8 = arith.constant 0 : index
    %7 = vector.load %arg3[%c0_7, %c0_8] : memref<64x192xf32, #tpu.memory_space<vmem>>, vector<64x192xf32>
    %c0_9 = arith.constant 0 : index
    %c0_10 = arith.constant 0 : index
    %8 = vector.load %arg4[%c0_9, %c0_10] : memref<1x64xf32, #tpu.memory_space<vmem>>, vector<1x64xf32>
    %9 = vector.shape_cast %8 : vector<1x64xf32> to vector<1x64xf32>
    %10 = vector.broadcast %9 : vector<1x64xf32> to vector<8x64xf32>
    %cst_11 = arith.constant 0.000000e+00 : f32
    %11 = vector.broadcast %cst_11 : f32 to vector<8x64xf32>
    %c0_i32 = arith.constant 0 : i32
    %c8_i32 = arith.constant 8 : i32
    %12 = arith.muli %c0_i32, %c8_i32 : i32
    %13 = tpu.assume_multiple %12, 8 : i32
    %14 = arith.index_cast %13 : i32 to index
    %c0_12 = arith.constant 0 : index
    %15 = vector.load %arg24[%14, %c0_12] : memref<64x192xf32, #tpu.memory_space<vmem>>, vector<8x192xf32>
    %cst_13 = arith.constant dense<0.000000e+00> : vector<8x192xf32>
    %16 = tpu.matmul %11, %7, %cst_13 {dimension_numbers = #tpu.dot_dimension_numbers<[1], [0], [0], [1], [0, 0, 1, 1], [], []>} : vector<8x64xf32>, vector<64x192xf32>, vector<8x192xf32> -> vector<8x192xf32>
    %17 = vector.extract_strided_slice %15 {offsets = [0, 0], sizes = [8, 128], strides = [1, 1]} : vector<8x192xf32> to vector<8x128xf32>
    %18 = vector.extract_strided_slice %16 {offsets = [0, 0], sizes = [8, 128], strides = [1, 1]} : vector<8x192xf32> to vector<8x128xf32>
    %19 = arith.addf %17, %18 : vector<8x128xf32>
    %20 = arith.negf %19 : vector<8x128xf32>
    %21 = math.exp %20 : vector<8x128xf32>
    %cst_14 = arith.constant 1.000000e+00 : f32
    %22 = vector.broadcast %cst_14 : f32 to vector<8x128xf32>
    %23 = arith.addf %22, %21 : vector<8x128xf32>
    %24 = arith.divf %22, %23 : vector<8x128xf32>
    %25 = vector.extract_strided_slice %24 {offsets = [0, 0], sizes = [8, 64], strides = [1, 1]} : vector<8x128xf32> to vector<8x64xf32>
    %26 = vector.extract_strided_slice %24 {offsets = [0, 64], sizes = [8, 64], strides = [1, 1]} : vector<8x128xf32> to vector<8x64xf32>
    %27 = vector.extract_strided_slice %15 {offsets = [0, 128], sizes = [8, 64], strides = [1, 1]} : vector<8x192xf32> to vector<8x64xf32>
    %28 = vector.extract_strided_slice %16 {offsets = [0, 128], sizes = [8, 64], strides = [1, 1]} : vector<8x192xf32> to vector<8x64xf32>
    %29 = arith.addf %28, %10 : vector<8x64xf32>
    %30 = arith.mulf %25, %29 : vector<8x64xf32>
    %31 = arith.addf %27, %30 : vector<8x64xf32>
    %32 = math.tanh %31 : vector<8x64xf32>
    %cst_15 = arith.constant 1.000000e+00 : f32
    %33 = vector.broadcast %cst_15 : f32 to vector<8x64xf32>
    %34 = arith.subf %33, %26 : vector<8x64xf32>
    %35 = arith.mulf %34, %32 : vector<8x64xf32>
    %36 = arith.mulf %26, %11 : vector<8x64xf32>
    %37 = arith.addf %35, %36 : vector<8x64xf32>
    %38 = arith.index_cast %13 : i32 to index
    %c0_16 = arith.constant 0 : index
    %39 = vector.load %arg22[%38, %c0_16] : memref<64x64xf32, #tpu.memory_space<vmem>>, vector<8x64xf32>
    tpu.vector_store %arg22[%38, %c0_16], %37 {strides = array<i32>} : memref<64x64xf32, #tpu.memory_space<vmem>>, vector<8x64xf32>,
    %c1_i32 = arith.constant 1 : i32
    %c8_i32_17 = arith.constant 8 : i32
    %40 = arith.muli %c1_i32, %c8_i32_17 : i32
    %41 = tpu.assume_multiple %40, 8 : i32
    %42 = arith.index_cast %41 : i32 to index
    %c0_18 = arith.constant 0 : index
    %43 = vector.load %arg24[%42, %c0_18] : memref<64x192xf32, #tpu.memory_space<vmem>>, vector<8x192xf32>
    %cst_19 = arith.constant dense<0.000000e+00> : vector<8x192xf32>
    %44 = tpu.matmul %37, %7, %cst_19 {dimension_numbers = #tpu.dot_dimension_numbers<[1], [0], [0], [1], [0, 0, 1, 1], [], []>} : vector<8x64xf32>, vector<64x192xf32>, vector<8x192xf32> -> vector<8x192xf32>
    %45 = vector.extract_strided_slice %43 {offsets = [0, 0], sizes = [8, 128], strides = [1, 1]} : vector<8x192xf32> to vector<8x128xf32>
    %46 = vector.extract_strided_slice %44 {offsets = [0, 0], sizes = [8, 128], strides = [1, 1]} : vector<8x192xf32> to vector<8x128xf32>
    %47 = arith.addf %45, %46 : vector<8x128xf32>
    %48 = arith.negf %47 : vector<8x128xf32>
    %49 = math.exp %48 : vector<8x128xf32>
    %cst_20 = arith.constant 1.000000e+00 : f32
    %50 = vector.broadcast %cst_20 : f32 to vector<8x128xf32>
    %51 = arith.addf %50, %49 : vector<8x128xf32>
    %52 = arith.divf %50, %51 : vector<8x128xf32>
    %53 = vector.extract_strided_slice %52 {offsets = [0, 0], sizes = [8, 64], strides = [1, 1]} : vector<8x128xf32> to vector<8x64xf32>
    %54 = vector.extract_strided_slice %52 {offsets = [0, 64], sizes = [8, 64], strides = [1, 1]} : vector<8x128xf32> to vector<8x64xf32>
    %55 = vector.extract_strided_slice %43 {offsets = [0, 128], sizes = [8, 64], strides = [1, 1]} : vector<8x192xf32> to vector<8x64xf32>
    %56 = vector.extract_strided_slice %44 {offsets = [0, 128], sizes = [8, 64], strides = [1, 1]} : vector<8x192xf32> to vector<8x64xf32>
    %57 = arith.addf %56, %10 : vector<8x64xf32>
    %58 = arith.mulf %53, %57 : vector<8x64xf32>
    %59 = arith.addf %55, %58 : vector<8x64xf32>
    %60 = math.tanh %59 : vector<8x64xf32>
    %cst_21 = arith.constant 1.000000e+00 : f32
    %61 = vector.broadcast %cst_21 : f32 to vector<8x64xf32>
    %62 = arith.subf %61, %54 : vector<8x64xf32>
    %63 = arith.mulf %62, %60 : vector<8x64xf32>
    %64 = arith.mulf %54, %37 : vector<8x64xf32>
    %65 = arith.addf %63, %64 : vector<8x64xf32>
    %66 = arith.index_cast %41 : i32 to index
    %c0_22 = arith.constant 0 : index
    %67 = vector.load %arg22[%66, %c0_22] : memref<64x64xf32, #tpu.memory_space<vmem>>, vector<8x64xf32>
    tpu.vector_store %arg22[%66, %c0_22], %65 {strides = array<i32>} : memref<64x64xf32, #tpu.memory_space<vmem>>, vector<8x64xf32>,
    %c2_i32 = arith.constant 2 : i32
    %c8_i32_23 = arith.constant 8 : i32
    %68 = arith.muli %c2_i32, %c8_i32_23 : i32
    %69 = tpu.assume_multiple %68, 8 : i32
    %70 = arith.index_cast %69 : i32 to index
    %c0_24 = arith.constant 0 : index
    %71 = vector.load %arg24[%70, %c0_24] : memref<64x192xf32, #tpu.memory_space<vmem>>, vector<8x192xf32>
    %cst_25 = arith.constant dense<0.000000e+00> : vector<8x192xf32>
    %72 = tpu.matmul %65, %7, %cst_25 {dimension_numbers = #tpu.dot_dimension_numbers<[1], [0], [0], [1], [0, 0, 1, 1], [], []>} : vector<8x64xf32>, vector<64x192xf32>, vector<8x192xf32> -> vector<8x192xf32>
    %73 = vector.extract_strided_slice %71 {offsets = [0, 0], sizes = [8, 128], strides = [1, 1]} : vector<8x192xf32> to vector<8x128xf32>
    %74 = vector.extract_strided_slice %72 {offsets = [0, 0], sizes = [8, 128], strides = [1, 1]} : vector<8x192xf32> to vector<8x128xf32>
    %75 = arith.addf %73, %74 : vector<8x128xf32>
    %76 = arith.negf %75 : vector<8x128xf32>
    %77 = math.exp %76 : vector<8x128xf32>
    %cst_26 = arith.constant 1.000000e+00 : f32
    %78 = vector.broadcast %cst_26 : f32 to vector<8x128xf32>
    %79 = arith.addf %78, %77 : vector<8x128xf32>
    %80 = arith.divf %78, %79 : vector<8x128xf32>
    %81 = vector.extract_strided_slice %80 {offsets = [0, 0], sizes = [8, 64], strides = [1, 1]} : vector<8x128xf32> to vector<8x64xf32>
    %82 = vector.extract_strided_slice %80 {offsets = [0, 64], sizes = [8, 64], strides = [1, 1]} : vector<8x128xf32> to vector<8x64xf32>
    %83 = vector.extract_strided_slice %71 {offsets = [0, 128], sizes = [8, 64], strides = [1, 1]} : vector<8x192xf32> to vector<8x64xf32>
    %84 = vector.extract_strided_slice %72 {offsets = [0, 128], sizes = [8, 64], strides = [1, 1]} : vector<8x192xf32> to vector<8x64xf32>
    %85 = arith.addf %84, %10 : vector<8x64xf32>
    %86 = arith.mulf %81, %85 : vector<8x64xf32>
    %87 = arith.addf %83, %86 : vector<8x64xf32>
    %88 = math.tanh %87 : vector<8x64xf32>
    %cst_27 = arith.constant 1.000000e+00 : f32
    %89 = vector.broadcast %cst_27 : f32 to vector<8x64xf32>
    %90 = arith.subf %89, %82 : vector<8x64xf32>
    %91 = arith.mulf %90, %88 : vector<8x64xf32>
    %92 = arith.mulf %82, %65 : vector<8x64xf32>
    %93 = arith.addf %91, %92 : vector<8x64xf32>
    %94 = arith.index_cast %69 : i32 to index
    %c0_28 = arith.constant 0 : index
    %95 = vector.load %arg22[%94, %c0_28] : memref<64x64xf32, #tpu.memory_space<vmem>>, vector<8x64xf32>
    tpu.vector_store %arg22[%94, %c0_28], %93 {strides = array<i32>} : memref<64x64xf32, #tpu.memory_space<vmem>>, vector<8x64xf32>,
    %c3_i32 = arith.constant 3 : i32
    %c8_i32_29 = arith.constant 8 : i32
    %96 = arith.muli %c3_i32, %c8_i32_29 : i32
    %97 = tpu.assume_multiple %96, 8 : i32
    %98 = arith.index_cast %97 : i32 to index
    %c0_30 = arith.constant 0 : index
    %99 = vector.load %arg24[%98, %c0_30] : memref<64x192xf32, #tpu.memory_space<vmem>>, vector<8x192xf32>
    %cst_31 = arith.constant dense<0.000000e+00> : vector<8x192xf32>
    %100 = tpu.matmul %93, %7, %cst_31 {dimension_numbers = #tpu.dot_dimension_numbers<[1], [0], [0], [1], [0, 0, 1, 1], [], []>} : vector<8x64xf32>, vector<64x192xf32>, vector<8x192xf32> -> vector<8x192xf32>
    %101 = vector.extract_strided_slice %99 {offsets = [0, 0], sizes = [8, 128], strides = [1, 1]} : vector<8x192xf32> to vector<8x128xf32>
    %102 = vector.extract_strided_slice %100 {offsets = [0, 0], sizes = [8, 128], strides = [1, 1]} : vector<8x192xf32> to vector<8x128xf32>
    %103 = arith.addf %101, %102 : vector<8x128xf32>
    %104 = arith.negf %103 : vector<8x128xf32>
    %105 = math.exp %104 : vector<8x128xf32>
    %cst_32 = arith.constant 1.000000e+00 : f32
    %106 = vector.broadcast %cst_32 : f32 to vector<8x128xf32>
    %107 = arith.addf %106, %105 : vector<8x128xf32>
    %108 = arith.divf %106, %107 : vector<8x128xf32>
    %109 = vector.extract_strided_slice %108 {offsets = [0, 0], sizes = [8, 64], strides = [1, 1]} : vector<8x128xf32> to vector<8x64xf32>
    %110 = vector.extract_strided_slice %108 {offsets = [0, 64], sizes = [8, 64], strides = [1, 1]} : vector<8x128xf32> to vector<8x64xf32>
    %111 = vector.extract_strided_slice %99 {offsets = [0, 128], sizes = [8, 64], strides = [1, 1]} : vector<8x192xf32> to vector<8x64xf32>
    %112 = vector.extract_strided_slice %100 {offsets = [0, 128], sizes = [8, 64], strides = [1, 1]} : vector<8x192xf32> to vector<8x64xf32>
    %113 = arith.addf %112, %10 : vector<8x64xf32>
    %114 = arith.mulf %109, %113 : vector<8x64xf32>
    %115 = arith.addf %111, %114 : vector<8x64xf32>
    %116 = math.tanh %115 : vector<8x64xf32>
    %cst_33 = arith.constant 1.000000e+00 : f32
    %117 = vector.broadcast %cst_33 : f32 to vector<8x64xf32>
    %118 = arith.subf %117, %110 : vector<8x64xf32>
    %119 = arith.mulf %118, %116 : vector<8x64xf32>
    %120 = arith.mulf %110, %93 : vector<8x64xf32>
    %121 = arith.addf %119, %120 : vector<8x64xf32>
    %122 = arith.index_cast %97 : i32 to index
    %c0_34 = arith.constant 0 : index
    %123 = vector.load %arg22[%122, %c0_34] : memref<64x64xf32, #tpu.memory_space<vmem>>, vector<8x64xf32>
    tpu.vector_store %arg22[%122, %c0_34], %121 {strides = array<i32>} : memref<64x64xf32, #tpu.memory_space<vmem>>, vector<8x64xf32>,
    %c4_i32 = arith.constant 4 : i32
    %c8_i32_35 = arith.constant 8 : i32
    %124 = arith.muli %c4_i32, %c8_i32_35 : i32
    %125 = tpu.assume_multiple %124, 8 : i32
    %126 = arith.index_cast %125 : i32 to index
    %c0_36 = arith.constant 0 : index
    %127 = vector.load %arg24[%126, %c0_36] : memref<64x192xf32, #tpu.memory_space<vmem>>, vector<8x192xf32>
    %cst_37 = arith.constant dense<0.000000e+00> : vector<8x192xf32>
    %128 = tpu.matmul %121, %7, %cst_37 {dimension_numbers = #tpu.dot_dimension_numbers<[1], [0], [0], [1], [0, 0, 1, 1], [], []>} : vector<8x64xf32>, vector<64x192xf32>, vector<8x192xf32> -> vector<8x192xf32>
    %129 = vector.extract_strided_slice %127 {offsets = [0, 0], sizes = [8, 128], strides = [1, 1]} : vector<8x192xf32> to vector<8x128xf32>
    %130 = vector.extract_strided_slice %128 {offsets = [0, 0], sizes = [8, 128], strides = [1, 1]} : vector<8x192xf32> to vector<8x128xf32>
    %131 = arith.addf %129, %130 : vector<8x128xf32>
    %132 = arith.negf %131 : vector<8x128xf32>
    %133 = math.exp %132 : vector<8x128xf32>
    %cst_38 = arith.constant 1.000000e+00 : f32
    %134 = vector.broadcast %cst_38 : f32 to vector<8x128xf32>
    %135 = arith.addf %134, %133 : vector<8x128xf32>
    %136 = arith.divf %134, %135 : vector<8x128xf32>
    %137 = vector.extract_strided_slice %136 {offsets = [0, 0], sizes = [8, 64], strides = [1, 1]} : vector<8x128xf32> to vector<8x64xf32>
    %138 = vector.extract_strided_slice %136 {offsets = [0, 64], sizes = [8, 64], strides = [1, 1]} : vector<8x128xf32> to vector<8x64xf32>
    %139 = vector.extract_strided_slice %127 {offsets = [0, 128], sizes = [8, 64], strides = [1, 1]} : vector<8x192xf32> to vector<8x64xf32>
    %140 = vector.extract_strided_slice %128 {offsets = [0, 128], sizes = [8, 64], strides = [1, 1]} : vector<8x192xf32> to vector<8x64xf32>
    %141 = arith.addf %140, %10 : vector<8x64xf32>
    %142 = arith.mulf %137, %141 : vector<8x64xf32>
    %143 = arith.addf %139, %142 : vector<8x64xf32>
    %144 = math.tanh %143 : vector<8x64xf32>
    %cst_39 = arith.constant 1.000000e+00 : f32
    %145 = vector.broadcast %cst_39 : f32 to vector<8x64xf32>
    %146 = arith.subf %145, %138 : vector<8x64xf32>
    %147 = arith.mulf %146, %144 : vector<8x64xf32>
    %148 = arith.mulf %138, %121 : vector<8x64xf32>
    %149 = arith.addf %147, %148 : vector<8x64xf32>
    %150 = arith.index_cast %125 : i32 to index
    %c0_40 = arith.constant 0 : index
    %151 = vector.load %arg22[%150, %c0_40] : memref<64x64xf32, #tpu.memory_space<vmem>>, vector<8x64xf32>
    tpu.vector_store %arg22[%150, %c0_40], %149 {strides = array<i32>} : memref<64x64xf32, #tpu.memory_space<vmem>>, vector<8x64xf32>,
    %c5_i32 = arith.constant 5 : i32
    %c8_i32_41 = arith.constant 8 : i32
    %152 = arith.muli %c5_i32, %c8_i32_41 : i32
    %153 = tpu.assume_multiple %152, 8 : i32
    %154 = arith.index_cast %153 : i32 to index
    %c0_42 = arith.constant 0 : index
    %155 = vector.load %arg24[%154, %c0_42] : memref<64x192xf32, #tpu.memory_space<vmem>>, vector<8x192xf32>
    %cst_43 = arith.constant dense<0.000000e+00> : vector<8x192xf32>
    %156 = tpu.matmul %149, %7, %cst_43 {dimension_numbers = #tpu.dot_dimension_numbers<[1], [0], [0], [1], [0, 0, 1, 1], [], []>} : vector<8x64xf32>, vector<64x192xf32>, vector<8x192xf32> -> vector<8x192xf32>
    %157 = vector.extract_strided_slice %155 {offsets = [0, 0], sizes = [8, 128], strides = [1, 1]} : vector<8x192xf32> to vector<8x128xf32>
    %158 = vector.extract_strided_slice %156 {offsets = [0, 0], sizes = [8, 128], strides = [1, 1]} : vector<8x192xf32> to vector<8x128xf32>
    %159 = arith.addf %157, %158 : vector<8x128xf32>
    %160 = arith.negf %159 : vector<8x128xf32>
    %161 = math.exp %160 : vector<8x128xf32>
    %cst_44 = arith.constant 1.000000e+00 : f32
    %162 = vector.broadcast %cst_44 : f32 to vector<8x128xf32>
    %163 = arith.addf %162, %161 : vector<8x128xf32>
    %164 = arith.divf %162, %163 : vector<8x128xf32>
    %165 = vector.extract_strided_slice %164 {offsets = [0, 0], sizes = [8, 64], strides = [1, 1]} : vector<8x128xf32> to vector<8x64xf32>
    %166 = vector.extract_strided_slice %164 {offsets = [0, 64], sizes = [8, 64], strides = [1, 1]} : vector<8x128xf32> to vector<8x64xf32>
    %167 = vector.extract_strided_slice %155 {offsets = [0, 128], sizes = [8, 64], strides = [1, 1]} : vector<8x192xf32> to vector<8x64xf32>
    %168 = vector.extract_strided_slice %156 {offsets = [0, 128], sizes = [8, 64], strides = [1, 1]} : vector<8x192xf32> to vector<8x64xf32>
    %169 = arith.addf %168, %10 : vector<8x64xf32>
    %170 = arith.mulf %165, %169 : vector<8x64xf32>
    %171 = arith.addf %167, %170 : vector<8x64xf32>
    %172 = math.tanh %171 : vector<8x64xf32>
    %cst_45 = arith.constant 1.000000e+00 : f32
    %173 = vector.broadcast %cst_45 : f32 to vector<8x64xf32>
    %174 = arith.subf %173, %166 : vector<8x64xf32>
    %175 = arith.mulf %174, %172 : vector<8x64xf32>
    %176 = arith.mulf %166, %149 : vector<8x64xf32>
    %177 = arith.addf %175, %176 : vector<8x64xf32>
    %178 = arith.index_cast %153 : i32 to index
    %c0_46 = arith.constant 0 : index
    %179 = vector.load %arg22[%178, %c0_46] : memref<64x64xf32, #tpu.memory_space<vmem>>, vector<8x64xf32>
    tpu.vector_store %arg22[%178, %c0_46], %177 {strides = array<i32>} : memref<64x64xf32, #tpu.memory_space<vmem>>, vector<8x64xf32>,
    %c6_i32 = arith.constant 6 : i32
    %c8_i32_47 = arith.constant 8 : i32
    %180 = arith.muli %c6_i32, %c8_i32_47 : i32
    %181 = tpu.assume_multiple %180, 8 : i32
    %182 = arith.index_cast %181 : i32 to index
    %c0_48 = arith.constant 0 : index
    %183 = vector.load %arg24[%182, %c0_48] : memref<64x192xf32, #tpu.memory_space<vmem>>, vector<8x192xf32>
    %cst_49 = arith.constant dense<0.000000e+00> : vector<8x192xf32>
    %184 = tpu.matmul %177, %7, %cst_49 {dimension_numbers = #tpu.dot_dimension_numbers<[1], [0], [0], [1], [0, 0, 1, 1], [], []>} : vector<8x64xf32>, vector<64x192xf32>, vector<8x192xf32> -> vector<8x192xf32>
    %185 = vector.extract_strided_slice %183 {offsets = [0, 0], sizes = [8, 128], strides = [1, 1]} : vector<8x192xf32> to vector<8x128xf32>
    %186 = vector.extract_strided_slice %184 {offsets = [0, 0], sizes = [8, 128], strides = [1, 1]} : vector<8x192xf32> to vector<8x128xf32>
    %187 = arith.addf %185, %186 : vector<8x128xf32>
    %188 = arith.negf %187 : vector<8x128xf32>
    %189 = math.exp %188 : vector<8x128xf32>
    %cst_50 = arith.constant 1.000000e+00 : f32
    %190 = vector.broadcast %cst_50 : f32 to vector<8x128xf32>
    %191 = arith.addf %190, %189 : vector<8x128xf32>
    %192 = arith.divf %190, %191 : vector<8x128xf32>
    %193 = vector.extract_strided_slice %192 {offsets = [0, 0], sizes = [8, 64], strides = [1, 1]} : vector<8x128xf32> to vector<8x64xf32>
    %194 = vector.extract_strided_slice %192 {offsets = [0, 64], sizes = [8, 64], strides = [1, 1]} : vector<8x128xf32> to vector<8x64xf32>
    %195 = vector.extract_strided_slice %183 {offsets = [0, 128], sizes = [8, 64], strides = [1, 1]} : vector<8x192xf32> to vector<8x64xf32>
    %196 = vector.extract_strided_slice %184 {offsets = [0, 128], sizes = [8, 64], strides = [1, 1]} : vector<8x192xf32> to vector<8x64xf32>
    %197 = arith.addf %196, %10 : vector<8x64xf32>
    %198 = arith.mulf %193, %197 : vector<8x64xf32>
    %199 = arith.addf %195, %198 : vector<8x64xf32>
    %200 = math.tanh %199 : vector<8x64xf32>
    %cst_51 = arith.constant 1.000000e+00 : f32
    %201 = vector.broadcast %cst_51 : f32 to vector<8x64xf32>
    %202 = arith.subf %201, %194 : vector<8x64xf32>
    %203 = arith.mulf %202, %200 : vector<8x64xf32>
    %204 = arith.mulf %194, %177 : vector<8x64xf32>
    %205 = arith.addf %203, %204 : vector<8x64xf32>
    %206 = arith.index_cast %181 : i32 to index
    %c0_52 = arith.constant 0 : index
    %207 = vector.load %arg22[%206, %c0_52] : memref<64x64xf32, #tpu.memory_space<vmem>>, vector<8x64xf32>
    tpu.vector_store %arg22[%206, %c0_52], %205 {strides = array<i32>} : memref<64x64xf32, #tpu.memory_space<vmem>>, vector<8x64xf32>,
    %c7_i32 = arith.constant 7 : i32
    %c8_i32_53 = arith.constant 8 : i32
    %208 = arith.muli %c7_i32, %c8_i32_53 : i32
    %209 = tpu.assume_multiple %208, 8 : i32
    %210 = arith.index_cast %209 : i32 to index
    %c0_54 = arith.constant 0 : index
    %211 = vector.load %arg24[%210, %c0_54] : memref<64x192xf32, #tpu.memory_space<vmem>>, vector<8x192xf32>
    %cst_55 = arith.constant dense<0.000000e+00> : vector<8x192xf32>
    %212 = tpu.matmul %205, %7, %cst_55 {dimension_numbers = #tpu.dot_dimension_numbers<[1], [0], [0], [1], [0, 0, 1, 1], [], []>} : vector<8x64xf32>, vector<64x192xf32>, vector<8x192xf32> -> vector<8x192xf32>
    %213 = vector.extract_strided_slice %211 {offsets = [0, 0], sizes = [8, 128], strides = [1, 1]} : vector<8x192xf32> to vector<8x128xf32>
    %214 = vector.extract_strided_slice %212 {offsets = [0, 0], sizes = [8, 128], strides = [1, 1]} : vector<8x192xf32> to vector<8x128xf32>
    %215 = arith.addf %213, %214 : vector<8x128xf32>
    %216 = arith.negf %215 : vector<8x128xf32>
    %217 = math.exp %216 : vector<8x128xf32>
    %cst_56 = arith.constant 1.000000e+00 : f32
    %218 = vector.broadcast %cst_56 : f32 to vector<8x128xf32>
    %219 = arith.addf %218, %217 : vector<8x128xf32>
    %220 = arith.divf %218, %219 : vector<8x128xf32>
    %221 = vector.extract_strided_slice %220 {offsets = [0, 0], sizes = [8, 64], strides = [1, 1]} : vector<8x128xf32> to vector<8x64xf32>
    %222 = vector.extract_strided_slice %220 {offsets = [0, 64], sizes = [8, 64], strides = [1, 1]} : vector<8x128xf32> to vector<8x64xf32>
    %223 = vector.extract_strided_slice %211 {offsets = [0, 128], sizes = [8, 64], strides = [1, 1]} : vector<8x192xf32> to vector<8x64xf32>
    %224 = vector.extract_strided_slice %212 {offsets = [0, 128], sizes = [8, 64], strides = [1, 1]} : vector<8x192xf32> to vector<8x64xf32>
    %225 = arith.addf %224, %10 : vector<8x64xf32>
    %226 = arith.mulf %221, %225 : vector<8x64xf32>
    %227 = arith.addf %223, %226 : vector<8x64xf32>
    %228 = math.tanh %227 : vector<8x64xf32>
    %cst_57 = arith.constant 1.000000e+00 : f32
    %229 = vector.broadcast %cst_57 : f32 to vector<8x64xf32>
    %230 = arith.subf %229, %222 : vector<8x64xf32>
    %231 = arith.mulf %230, %228 : vector<8x64xf32>
    %232 = arith.mulf %222, %205 : vector<8x64xf32>
    %233 = arith.addf %231, %232 : vector<8x64xf32>
    %234 = arith.index_cast %209 : i32 to index
    %c0_58 = arith.constant 0 : index
    %235 = vector.load %arg22[%234, %c0_58] : memref<64x64xf32, #tpu.memory_space<vmem>>, vector<8x64xf32>
    tpu.vector_store %arg22[%234, %c0_58], %233 {strides = array<i32>} : memref<64x64xf32, #tpu.memory_space<vmem>>, vector<8x64xf32>,
    %c8_i32_59 = arith.constant 8 : i32
    %c0_60 = arith.constant 0 : index
    %c0_61 = arith.constant 0 : index
    %236 = vector.load %arg22[%c0_60, %c0_61] : memref<64x64xf32, #tpu.memory_space<vmem>>, vector<64x64xf32>
    %c0_62 = arith.constant 0 : index
    %c0_63 = arith.constant 0 : index
    %237 = vector.load %arg5[%c0_62, %c0_63] : memref<64x192xf32, #tpu.memory_space<vmem>>, vector<64x192xf32>
    %cst_64 = arith.constant dense<0.000000e+00> : vector<64x192xf32>
    %238 = tpu.matmul %236, %237, %cst_64 {dimension_numbers = #tpu.dot_dimension_numbers<[1], [0], [0], [1], [0, 0, 1, 1], [], []>} : vector<64x64xf32>, vector<64x192xf32>, vector<64x192xf32> -> vector<64x192xf32>
    %c0_65 = arith.constant 0 : index
    %c0_66 = arith.constant 0 : index
    %239 = vector.load %arg6[%c0_65, %c0_66] : memref<1x192xf32, #tpu.memory_space<vmem>>, vector<1x192xf32>
    %240 = vector.broadcast %239 : vector<1x192xf32> to vector<64x192xf32>
    %241 = arith.addf %238, %240 : vector<64x192xf32>
    %c0_67 = arith.constant 0 : index
    %c0_68 = arith.constant 0 : index
    %242 = vector.load %arg24[%c0_67, %c0_68] : memref<64x192xf32, #tpu.memory_space<vmem>>, vector<64x192xf32>
    tpu.vector_store %arg24[%c0_67, %c0_68], %241 {strides = array<i32>} : memref<64x192xf32, #tpu.memory_space<vmem>>, vector<64x192xf32>,
    %c0_69 = arith.constant 0 : index
    %c0_70 = arith.constant 0 : index
    %243 = vector.load %arg7[%c0_69, %c0_70] : memref<64x192xf32, #tpu.memory_space<vmem>>, vector<64x192xf32>
    %c0_71 = arith.constant 0 : index
    %c0_72 = arith.constant 0 : index
    %244 = vector.load %arg8[%c0_71, %c0_72] : memref<1x64xf32, #tpu.memory_space<vmem>>, vector<1x64xf32>
    %245 = vector.shape_cast %244 : vector<1x64xf32> to vector<1x64xf32>
    %246 = vector.broadcast %245 : vector<1x64xf32> to vector<8x64xf32>
    %cst_73 = arith.constant 0.000000e+00 : f32
    %247 = vector.broadcast %cst_73 : f32 to vector<8x64xf32>
    %c0_i32_74 = arith.constant 0 : i32
    %c8_i32_75 = arith.constant 8 : i32
    %248 = arith.muli %c0_i32_74, %c8_i32_75 : i32
    %249 = tpu.assume_multiple %248, 8 : i32
    %250 = arith.index_cast %249 : i32 to index
    %c0_76 = arith.constant 0 : index
    %251 = vector.load %arg24[%250, %c0_76] : memref<64x192xf32, #tpu.memory_space<vmem>>, vector<8x192xf32>
    %cst_77 = arith.constant dense<0.000000e+00> : vector<8x192xf32>
    %252 = tpu.matmul %247, %243, %cst_77 {dimension_numbers = #tpu.dot_dimension_numbers<[1], [0], [0], [1], [0, 0, 1, 1], [], []>} : vector<8x64xf32>, vector<64x192xf32>, vector<8x192xf32> -> vector<8x192xf32>
    %253 = vector.extract_strided_slice %251 {offsets = [0, 0], sizes = [8, 128], strides = [1, 1]} : vector<8x192xf32> to vector<8x128xf32>
    %254 = vector.extract_strided_slice %252 {offsets = [0, 0], sizes = [8, 128], strides = [1, 1]} : vector<8x192xf32> to vector<8x128xf32>
    %255 = arith.addf %253, %254 : vector<8x128xf32>
    %256 = arith.negf %255 : vector<8x128xf32>
    %257 = math.exp %256 : vector<8x128xf32>
    %cst_78 = arith.constant 1.000000e+00 : f32
    %258 = vector.broadcast %cst_78 : f32 to vector<8x128xf32>
    %259 = arith.addf %258, %257 : vector<8x128xf32>
    %260 = arith.divf %258, %259 : vector<8x128xf32>
    %261 = vector.extract_strided_slice %260 {offsets = [0, 0], sizes = [8, 64], strides = [1, 1]} : vector<8x128xf32> to vector<8x64xf32>
    %262 = vector.extract_strided_slice %260 {offsets = [0, 64], sizes = [8, 64], strides = [1, 1]} : vector<8x128xf32> to vector<8x64xf32>
    %263 = vector.extract_strided_slice %251 {offsets = [0, 128], sizes = [8, 64], strides = [1, 1]} : vector<8x192xf32> to vector<8x64xf32>
    %264 = vector.extract_strided_slice %252 {offsets = [0, 128], sizes = [8, 64], strides = [1, 1]} : vector<8x192xf32> to vector<8x64xf32>
    %265 = arith.addf %264, %246 : vector<8x64xf32>
    %266 = arith.mulf %261, %265 : vector<8x64xf32>
    %267 = arith.addf %263, %266 : vector<8x64xf32>
    %268 = math.tanh %267 : vector<8x64xf32>
    %cst_79 = arith.constant 1.000000e+00 : f32
    %269 = vector.broadcast %cst_79 : f32 to vector<8x64xf32>
    %270 = arith.subf %269, %262 : vector<8x64xf32>
    %271 = arith.mulf %270, %268 : vector<8x64xf32>
    %272 = arith.mulf %262, %247 : vector<8x64xf32>
    %273 = arith.addf %271, %272 : vector<8x64xf32>
    %274 = arith.index_cast %249 : i32 to index
    %c0_80 = arith.constant 0 : index
    %275 = vector.load %arg23[%274, %c0_80] : memref<64x64xf32, #tpu.memory_space<vmem>>, vector<8x64xf32>
    tpu.vector_store %arg23[%274, %c0_80], %273 {strides = array<i32>} : memref<64x64xf32, #tpu.memory_space<vmem>>, vector<8x64xf32>,
    %c1_i32_81 = arith.constant 1 : i32
    %c8_i32_82 = arith.constant 8 : i32
    %276 = arith.muli %c1_i32_81, %c8_i32_82 : i32
    %277 = tpu.assume_multiple %276, 8 : i32
    %278 = arith.index_cast %277 : i32 to index
    %c0_83 = arith.constant 0 : index
    %279 = vector.load %arg24[%278, %c0_83] : memref<64x192xf32, #tpu.memory_space<vmem>>, vector<8x192xf32>
    %cst_84 = arith.constant dense<0.000000e+00> : vector<8x192xf32>
    %280 = tpu.matmul %273, %243, %cst_84 {dimension_numbers = #tpu.dot_dimension_numbers<[1], [0], [0], [1], [0, 0, 1, 1], [], []>} : vector<8x64xf32>, vector<64x192xf32>, vector<8x192xf32> -> vector<8x192xf32>
    %281 = vector.extract_strided_slice %279 {offsets = [0, 0], sizes = [8, 128], strides = [1, 1]} : vector<8x192xf32> to vector<8x128xf32>
    %282 = vector.extract_strided_slice %280 {offsets = [0, 0], sizes = [8, 128], strides = [1, 1]} : vector<8x192xf32> to vector<8x128xf32>
    %283 = arith.addf %281, %282 : vector<8x128xf32>
    %284 = arith.negf %283 : vector<8x128xf32>
    %285 = math.exp %284 : vector<8x128xf32>
    %cst_85 = arith.constant 1.000000e+00 : f32
    %286 = vector.broadcast %cst_85 : f32 to vector<8x128xf32>
    %287 = arith.addf %286, %285 : vector<8x128xf32>
    %288 = arith.divf %286, %287 : vector<8x128xf32>
    %289 = vector.extract_strided_slice %288 {offsets = [0, 0], sizes = [8, 64], strides = [1, 1]} : vector<8x128xf32> to vector<8x64xf32>
    %290 = vector.extract_strided_slice %288 {offsets = [0, 64], sizes = [8, 64], strides = [1, 1]} : vector<8x128xf32> to vector<8x64xf32>
    %291 = vector.extract_strided_slice %279 {offsets = [0, 128], sizes = [8, 64], strides = [1, 1]} : vector<8x192xf32> to vector<8x64xf32>
    %292 = vector.extract_strided_slice %280 {offsets = [0, 128], sizes = [8, 64], strides = [1, 1]} : vector<8x192xf32> to vector<8x64xf32>
    %293 = arith.addf %292, %246 : vector<8x64xf32>
    %294 = arith.mulf %289, %293 : vector<8x64xf32>
    %295 = arith.addf %291, %294 : vector<8x64xf32>
    %296 = math.tanh %295 : vector<8x64xf32>
    %cst_86 = arith.constant 1.000000e+00 : f32
    %297 = vector.broadcast %cst_86 : f32 to vector<8x64xf32>
    %298 = arith.subf %297, %290 : vector<8x64xf32>
    %299 = arith.mulf %298, %296 : vector<8x64xf32>
    %300 = arith.mulf %290, %273 : vector<8x64xf32>
    %301 = arith.addf %299, %300 : vector<8x64xf32>
    %302 = arith.index_cast %277 : i32 to index
    %c0_87 = arith.constant 0 : index
    %303 = vector.load %arg23[%302, %c0_87] : memref<64x64xf32, #tpu.memory_space<vmem>>, vector<8x64xf32>
    tpu.vector_store %arg23[%302, %c0_87], %301 {strides = array<i32>} : memref<64x64xf32, #tpu.memory_space<vmem>>, vector<8x64xf32>,
    %c2_i32_88 = arith.constant 2 : i32
    %c8_i32_89 = arith.constant 8 : i32
    %304 = arith.muli %c2_i32_88, %c8_i32_89 : i32
    %305 = tpu.assume_multiple %304, 8 : i32
    %306 = arith.index_cast %305 : i32 to index
    %c0_90 = arith.constant 0 : index
    %307 = vector.load %arg24[%306, %c0_90] : memref<64x192xf32, #tpu.memory_space<vmem>>, vector<8x192xf32>
    %cst_91 = arith.constant dense<0.000000e+00> : vector<8x192xf32>
    %308 = tpu.matmul %301, %243, %cst_91 {dimension_numbers = #tpu.dot_dimension_numbers<[1], [0], [0], [1], [0, 0, 1, 1], [], []>} : vector<8x64xf32>, vector<64x192xf32>, vector<8x192xf32> -> vector<8x192xf32>
    %309 = vector.extract_strided_slice %307 {offsets = [0, 0], sizes = [8, 128], strides = [1, 1]} : vector<8x192xf32> to vector<8x128xf32>
    %310 = vector.extract_strided_slice %308 {offsets = [0, 0], sizes = [8, 128], strides = [1, 1]} : vector<8x192xf32> to vector<8x128xf32>
    %311 = arith.addf %309, %310 : vector<8x128xf32>
    %312 = arith.negf %311 : vector<8x128xf32>
    %313 = math.exp %312 : vector<8x128xf32>
    %cst_92 = arith.constant 1.000000e+00 : f32
    %314 = vector.broadcast %cst_92 : f32 to vector<8x128xf32>
    %315 = arith.addf %314, %313 : vector<8x128xf32>
    %316 = arith.divf %314, %315 : vector<8x128xf32>
    %317 = vector.extract_strided_slice %316 {offsets = [0, 0], sizes = [8, 64], strides = [1, 1]} : vector<8x128xf32> to vector<8x64xf32>
    %318 = vector.extract_strided_slice %316 {offsets = [0, 64], sizes = [8, 64], strides = [1, 1]} : vector<8x128xf32> to vector<8x64xf32>
    %319 = vector.extract_strided_slice %307 {offsets = [0, 128], sizes = [8, 64], strides = [1, 1]} : vector<8x192xf32> to vector<8x64xf32>
    %320 = vector.extract_strided_slice %308 {offsets = [0, 128], sizes = [8, 64], strides = [1, 1]} : vector<8x192xf32> to vector<8x64xf32>
    %321 = arith.addf %320, %246 : vector<8x64xf32>
    %322 = arith.mulf %317, %321 : vector<8x64xf32>
    %323 = arith.addf %319, %322 : vector<8x64xf32>
    %324 = math.tanh %323 : vector<8x64xf32>
    %cst_93 = arith.constant 1.000000e+00 : f32
    %325 = vector.broadcast %cst_93 : f32 to vector<8x64xf32>
    %326 = arith.subf %325, %318 : vector<8x64xf32>
    %327 = arith.mulf %326, %324 : vector<8x64xf32>
    %328 = arith.mulf %318, %301 : vector<8x64xf32>
    %329 = arith.addf %327, %328 : vector<8x64xf32>
    %330 = arith.index_cast %305 : i32 to index
    %c0_94 = arith.constant 0 : index
    %331 = vector.load %arg23[%330, %c0_94] : memref<64x64xf32, #tpu.memory_space<vmem>>, vector<8x64xf32>
    tpu.vector_store %arg23[%330, %c0_94], %329 {strides = array<i32>} : memref<64x64xf32, #tpu.memory_space<vmem>>, vector<8x64xf32>,
    %c3_i32_95 = arith.constant 3 : i32
    %c8_i32_96 = arith.constant 8 : i32
    %332 = arith.muli %c3_i32_95, %c8_i32_96 : i32
    %333 = tpu.assume_multiple %332, 8 : i32
    %334 = arith.index_cast %333 : i32 to index
    %c0_97 = arith.constant 0 : index
    %335 = vector.load %arg24[%334, %c0_97] : memref<64x192xf32, #tpu.memory_space<vmem>>, vector<8x192xf32>
    %cst_98 = arith.constant dense<0.000000e+00> : vector<8x192xf32>
    %336 = tpu.matmul %329, %243, %cst_98 {dimension_numbers = #tpu.dot_dimension_numbers<[1], [0], [0], [1], [0, 0, 1, 1], [], []>} : vector<8x64xf32>, vector<64x192xf32>, vector<8x192xf32> -> vector<8x192xf32>
    %337 = vector.extract_strided_slice %335 {offsets = [0, 0], sizes = [8, 128], strides = [1, 1]} : vector<8x192xf32> to vector<8x128xf32>
    %338 = vector.extract_strided_slice %336 {offsets = [0, 0], sizes = [8, 128], strides = [1, 1]} : vector<8x192xf32> to vector<8x128xf32>
    %339 = arith.addf %337, %338 : vector<8x128xf32>
    %340 = arith.negf %339 : vector<8x128xf32>
    %341 = math.exp %340 : vector<8x128xf32>
    %cst_99 = arith.constant 1.000000e+00 : f32
    %342 = vector.broadcast %cst_99 : f32 to vector<8x128xf32>
    %343 = arith.addf %342, %341 : vector<8x128xf32>
    %344 = arith.divf %342, %343 : vector<8x128xf32>
    %345 = vector.extract_strided_slice %344 {offsets = [0, 0], sizes = [8, 64], strides = [1, 1]} : vector<8x128xf32> to vector<8x64xf32>
    %346 = vector.extract_strided_slice %344 {offsets = [0, 64], sizes = [8, 64], strides = [1, 1]} : vector<8x128xf32> to vector<8x64xf32>
    %347 = vector.extract_strided_slice %335 {offsets = [0, 128], sizes = [8, 64], strides = [1, 1]} : vector<8x192xf32> to vector<8x64xf32>
    %348 = vector.extract_strided_slice %336 {offsets = [0, 128], sizes = [8, 64], strides = [1, 1]} : vector<8x192xf32> to vector<8x64xf32>
    %349 = arith.addf %348, %246 : vector<8x64xf32>
    %350 = arith.mulf %345, %349 : vector<8x64xf32>
    %351 = arith.addf %347, %350 : vector<8x64xf32>
    %352 = math.tanh %351 : vector<8x64xf32>
    %cst_100 = arith.constant 1.000000e+00 : f32
    %353 = vector.broadcast %cst_100 : f32 to vector<8x64xf32>
    %354 = arith.subf %353, %346 : vector<8x64xf32>
    %355 = arith.mulf %354, %352 : vector<8x64xf32>
    %356 = arith.mulf %346, %329 : vector<8x64xf32>
    %357 = arith.addf %355, %356 : vector<8x64xf32>
    %358 = arith.index_cast %333 : i32 to index
    %c0_101 = arith.constant 0 : index
    %359 = vector.load %arg23[%358, %c0_101] : memref<64x64xf32, #tpu.memory_space<vmem>>, vector<8x64xf32>
    tpu.vector_store %arg23[%358, %c0_101], %357 {strides = array<i32>} : memref<64x64xf32, #tpu.memory_space<vmem>>, vector<8x64xf32>,
    %c4_i32_102 = arith.constant 4 : i32
    %c8_i32_103 = arith.constant 8 : i32
    %360 = arith.muli %c4_i32_102, %c8_i32_103 : i32
    %361 = tpu.assume_multiple %360, 8 : i32
    %362 = arith.index_cast %361 : i32 to index
    %c0_104 = arith.constant 0 : index
    %363 = vector.load %arg24[%362, %c0_104] : memref<64x192xf32, #tpu.memory_space<vmem>>, vector<8x192xf32>
    %cst_105 = arith.constant dense<0.000000e+00> : vector<8x192xf32>
    %364 = tpu.matmul %357, %243, %cst_105 {dimension_numbers = #tpu.dot_dimension_numbers<[1], [0], [0], [1], [0, 0, 1, 1], [], []>} : vector<8x64xf32>, vector<64x192xf32>, vector<8x192xf32> -> vector<8x192xf32>
    %365 = vector.extract_strided_slice %363 {offsets = [0, 0], sizes = [8, 128], strides = [1, 1]} : vector<8x192xf32> to vector<8x128xf32>
    %366 = vector.extract_strided_slice %364 {offsets = [0, 0], sizes = [8, 128], strides = [1, 1]} : vector<8x192xf32> to vector<8x128xf32>
    %367 = arith.addf %365, %366 : vector<8x128xf32>
    %368 = arith.negf %367 : vector<8x128xf32>
    %369 = math.exp %368 : vector<8x128xf32>
    %cst_106 = arith.constant 1.000000e+00 : f32
    %370 = vector.broadcast %cst_106 : f32 to vector<8x128xf32>
    %371 = arith.addf %370, %369 : vector<8x128xf32>
    %372 = arith.divf %370, %371 : vector<8x128xf32>
    %373 = vector.extract_strided_slice %372 {offsets = [0, 0], sizes = [8, 64], strides = [1, 1]} : vector<8x128xf32> to vector<8x64xf32>
    %374 = vector.extract_strided_slice %372 {offsets = [0, 64], sizes = [8, 64], strides = [1, 1]} : vector<8x128xf32> to vector<8x64xf32>
    %375 = vector.extract_strided_slice %363 {offsets = [0, 128], sizes = [8, 64], strides = [1, 1]} : vector<8x192xf32> to vector<8x64xf32>
    %376 = vector.extract_strided_slice %364 {offsets = [0, 128], sizes = [8, 64], strides = [1, 1]} : vector<8x192xf32> to vector<8x64xf32>
    %377 = arith.addf %376, %246 : vector<8x64xf32>
    %378 = arith.mulf %373, %377 : vector<8x64xf32>
    %379 = arith.addf %375, %378 : vector<8x64xf32>
    %380 = math.tanh %379 : vector<8x64xf32>
    %cst_107 = arith.constant 1.000000e+00 : f32
    %381 = vector.broadcast %cst_107 : f32 to vector<8x64xf32>
    %382 = arith.subf %381, %374 : vector<8x64xf32>
    %383 = arith.mulf %382, %380 : vector<8x64xf32>
    %384 = arith.mulf %374, %357 : vector<8x64xf32>
    %385 = arith.addf %383, %384 : vector<8x64xf32>
    %386 = arith.index_cast %361 : i32 to index
    %c0_108 = arith.constant 0 : index
    %387 = vector.load %arg23[%386, %c0_108] : memref<64x64xf32, #tpu.memory_space<vmem>>, vector<8x64xf32>
    tpu.vector_store %arg23[%386, %c0_108], %385 {strides = array<i32>} : memref<64x64xf32, #tpu.memory_space<vmem>>, vector<8x64xf32>,
    %c5_i32_109 = arith.constant 5 : i32
    %c8_i32_110 = arith.constant 8 : i32
    %388 = arith.muli %c5_i32_109, %c8_i32_110 : i32
    %389 = tpu.assume_multiple %388, 8 : i32
    %390 = arith.index_cast %389 : i32 to index
    %c0_111 = arith.constant 0 : index
    %391 = vector.load %arg24[%390, %c0_111] : memref<64x192xf32, #tpu.memory_space<vmem>>, vector<8x192xf32>
    %cst_112 = arith.constant dense<0.000000e+00> : vector<8x192xf32>
    %392 = tpu.matmul %385, %243, %cst_112 {dimension_numbers = #tpu.dot_dimension_numbers<[1], [0], [0], [1], [0, 0, 1, 1], [], []>} : vector<8x64xf32>, vector<64x192xf32>, vector<8x192xf32> -> vector<8x192xf32>
    %393 = vector.extract_strided_slice %391 {offsets = [0, 0], sizes = [8, 128], strides = [1, 1]} : vector<8x192xf32> to vector<8x128xf32>
    %394 = vector.extract_strided_slice %392 {offsets = [0, 0], sizes = [8, 128], strides = [1, 1]} : vector<8x192xf32> to vector<8x128xf32>
    %395 = arith.addf %393, %394 : vector<8x128xf32>
    %396 = arith.negf %395 : vector<8x128xf32>
    %397 = math.exp %396 : vector<8x128xf32>
    %cst_113 = arith.constant 1.000000e+00 : f32
    %398 = vector.broadcast %cst_113 : f32 to vector<8x128xf32>
    %399 = arith.addf %398, %397 : vector<8x128xf32>
    %400 = arith.divf %398, %399 : vector<8x128xf32>
    %401 = vector.extract_strided_slice %400 {offsets = [0, 0], sizes = [8, 64], strides = [1, 1]} : vector<8x128xf32> to vector<8x64xf32>
    %402 = vector.extract_strided_slice %400 {offsets = [0, 64], sizes = [8, 64], strides = [1, 1]} : vector<8x128xf32> to vector<8x64xf32>
    %403 = vector.extract_strided_slice %391 {offsets = [0, 128], sizes = [8, 64], strides = [1, 1]} : vector<8x192xf32> to vector<8x64xf32>
    %404 = vector.extract_strided_slice %392 {offsets = [0, 128], sizes = [8, 64], strides = [1, 1]} : vector<8x192xf32> to vector<8x64xf32>
    %405 = arith.addf %404, %246 : vector<8x64xf32>
    %406 = arith.mulf %401, %405 : vector<8x64xf32>
    %407 = arith.addf %403, %406 : vector<8x64xf32>
    %408 = math.tanh %407 : vector<8x64xf32>
    %cst_114 = arith.constant 1.000000e+00 : f32
    %409 = vector.broadcast %cst_114 : f32 to vector<8x64xf32>
    %410 = arith.subf %409, %402 : vector<8x64xf32>
    %411 = arith.mulf %410, %408 : vector<8x64xf32>
    %412 = arith.mulf %402, %385 : vector<8x64xf32>
    %413 = arith.addf %411, %412 : vector<8x64xf32>
    %414 = arith.index_cast %389 : i32 to index
    %c0_115 = arith.constant 0 : index
    %415 = vector.load %arg23[%414, %c0_115] : memref<64x64xf32, #tpu.memory_space<vmem>>, vector<8x64xf32>
    tpu.vector_store %arg23[%414, %c0_115], %413 {strides = array<i32>} : memref<64x64xf32, #tpu.memory_space<vmem>>, vector<8x64xf32>,
    %c6_i32_116 = arith.constant 6 : i32
    %c8_i32_117 = arith.constant 8 : i32
    %416 = arith.muli %c6_i32_116, %c8_i32_117 : i32
    %417 = tpu.assume_multiple %416, 8 : i32
    %418 = arith.index_cast %417 : i32 to index
    %c0_118 = arith.constant 0 : index
    %419 = vector.load %arg24[%418, %c0_118] : memref<64x192xf32, #tpu.memory_space<vmem>>, vector<8x192xf32>
    %cst_119 = arith.constant dense<0.000000e+00> : vector<8x192xf32>
    %420 = tpu.matmul %413, %243, %cst_119 {dimension_numbers = #tpu.dot_dimension_numbers<[1], [0], [0], [1], [0, 0, 1, 1], [], []>} : vector<8x64xf32>, vector<64x192xf32>, vector<8x192xf32> -> vector<8x192xf32>
    %421 = vector.extract_strided_slice %419 {offsets = [0, 0], sizes = [8, 128], strides = [1, 1]} : vector<8x192xf32> to vector<8x128xf32>
    %422 = vector.extract_strided_slice %420 {offsets = [0, 0], sizes = [8, 128], strides = [1, 1]} : vector<8x192xf32> to vector<8x128xf32>
    %423 = arith.addf %421, %422 : vector<8x128xf32>
    %424 = arith.negf %423 : vector<8x128xf32>
    %425 = math.exp %424 : vector<8x128xf32>
    %cst_120 = arith.constant 1.000000e+00 : f32
    %426 = vector.broadcast %cst_120 : f32 to vector<8x128xf32>
    %427 = arith.addf %426, %425 : vector<8x128xf32>
    %428 = arith.divf %426, %427 : vector<8x128xf32>
    %429 = vector.extract_strided_slice %428 {offsets = [0, 0], sizes = [8, 64], strides = [1, 1]} : vector<8x128xf32> to vector<8x64xf32>
    %430 = vector.extract_strided_slice %428 {offsets = [0, 64], sizes = [8, 64], strides = [1, 1]} : vector<8x128xf32> to vector<8x64xf32>
    %431 = vector.extract_strided_slice %419 {offsets = [0, 128], sizes = [8, 64], strides = [1, 1]} : vector<8x192xf32> to vector<8x64xf32>
    %432 = vector.extract_strided_slice %420 {offsets = [0, 128], sizes = [8, 64], strides = [1, 1]} : vector<8x192xf32> to vector<8x64xf32>
    %433 = arith.addf %432, %246 : vector<8x64xf32>
    %434 = arith.mulf %429, %433 : vector<8x64xf32>
    %435 = arith.addf %431, %434 : vector<8x64xf32>
    %436 = math.tanh %435 : vector<8x64xf32>
    %cst_121 = arith.constant 1.000000e+00 : f32
    %437 = vector.broadcast %cst_121 : f32 to vector<8x64xf32>
    %438 = arith.subf %437, %430 : vector<8x64xf32>
    %439 = arith.mulf %438, %436 : vector<8x64xf32>
    %440 = arith.mulf %430, %413 : vector<8x64xf32>
    %441 = arith.addf %439, %440 : vector<8x64xf32>
    %442 = arith.index_cast %417 : i32 to index
    %c0_122 = arith.constant 0 : index
    %443 = vector.load %arg23[%442, %c0_122] : memref<64x64xf32, #tpu.memory_space<vmem>>, vector<8x64xf32>
    tpu.vector_store %arg23[%442, %c0_122], %441 {strides = array<i32>} : memref<64x64xf32, #tpu.memory_space<vmem>>, vector<8x64xf32>,
    %c7_i32_123 = arith.constant 7 : i32
    %c8_i32_124 = arith.constant 8 : i32
    %444 = arith.muli %c7_i32_123, %c8_i32_124 : i32
    %445 = tpu.assume_multiple %444, 8 : i32
    %446 = arith.index_cast %445 : i32 to index
    %c0_125 = arith.constant 0 : index
    %447 = vector.load %arg24[%446, %c0_125] : memref<64x192xf32, #tpu.memory_space<vmem>>, vector<8x192xf32>
    %cst_126 = arith.constant dense<0.000000e+00> : vector<8x192xf32>
    %448 = tpu.matmul %441, %243, %cst_126 {dimension_numbers = #tpu.dot_dimension_numbers<[1], [0], [0], [1], [0, 0, 1, 1], [], []>} : vector<8x64xf32>, vector<64x192xf32>, vector<8x192xf32> -> vector<8x192xf32>
    %449 = vector.extract_strided_slice %447 {offsets = [0, 0], sizes = [8, 128], strides = [1, 1]} : vector<8x192xf32> to vector<8x128xf32>
    %450 = vector.extract_strided_slice %448 {offsets = [0, 0], sizes = [8, 128], strides = [1, 1]} : vector<8x192xf32> to vector<8x128xf32>
    %451 = arith.addf %449, %450 : vector<8x128xf32>
    %452 = arith.negf %451 : vector<8x128xf32>
    %453 = math.exp %452 : vector<8x128xf32>
    %cst_127 = arith.constant 1.000000e+00 : f32
    %454 = vector.broadcast %cst_127 : f32 to vector<8x128xf32>
    %455 = arith.addf %454, %453 : vector<8x128xf32>
    %456 = arith.divf %454, %455 : vector<8x128xf32>
    %457 = vector.extract_strided_slice %456 {offsets = [0, 0], sizes = [8, 64], strides = [1, 1]} : vector<8x128xf32> to vector<8x64xf32>
    %458 = vector.extract_strided_slice %456 {offsets = [0, 64], sizes = [8, 64], strides = [1, 1]} : vector<8x128xf32> to vector<8x64xf32>
    %459 = vector.extract_strided_slice %447 {offsets = [0, 128], sizes = [8, 64], strides = [1, 1]} : vector<8x192xf32> to vector<8x64xf32>
    %460 = vector.extract_strided_slice %448 {offsets = [0, 128], sizes = [8, 64], strides = [1, 1]} : vector<8x192xf32> to vector<8x64xf32>
    %461 = arith.addf %460, %246 : vector<8x64xf32>
    %462 = arith.mulf %457, %461 : vector<8x64xf32>
    %463 = arith.addf %459, %462 : vector<8x64xf32>
    %464 = math.tanh %463 : vector<8x64xf32>
    %cst_128 = arith.constant 1.000000e+00 : f32
    %465 = vector.broadcast %cst_128 : f32 to vector<8x64xf32>
    %466 = arith.subf %465, %458 : vector<8x64xf32>
    %467 = arith.mulf %466, %464 : vector<8x64xf32>
    %468 = arith.mulf %458, %441 : vector<8x64xf32>
    %469 = arith.addf %467, %468 : vector<8x64xf32>
    %470 = arith.index_cast %445 : i32 to index
    %c0_129 = arith.constant 0 : index
    %471 = vector.load %arg23[%470, %c0_129] : memref<64x64xf32, #tpu.memory_space<vmem>>, vector<8x64xf32>
    tpu.vector_store %arg23[%470, %c0_129], %469 {strides = array<i32>} : memref<64x64xf32, #tpu.memory_space<vmem>>, vector<8x64xf32>,
    %c8_i32_130 = arith.constant 8 : i32
    %c0_131 = arith.constant 0 : index
    %c0_132 = arith.constant 0 : index
    %472 = vector.load %arg23[%c0_131, %c0_132] : memref<64x64xf32, #tpu.memory_space<vmem>>, vector<64x64xf32>
    %c0_133 = arith.constant 0 : index
    %c0_134 = arith.constant 0 : index
    %473 = vector.load %arg9[%c0_133, %c0_134] : memref<64x192xf32, #tpu.memory_space<vmem>>, vector<64x192xf32>
    %cst_135 = arith.constant dense<0.000000e+00> : vector<64x192xf32>
    %474 = tpu.matmul %472, %473, %cst_135 {dimension_numbers = #tpu.dot_dimension_numbers<[1], [0], [0], [1], [0, 0, 1, 1], [], []>} : vector<64x64xf32>, vector<64x192xf32>, vector<64x192xf32> -> vector<64x192xf32>
    %c0_136 = arith.constant 0 : index
    %c0_137 = arith.constant 0 : index
    %475 = vector.load %arg10[%c0_136, %c0_137] : memref<1x192xf32, #tpu.memory_space<vmem>>, vector<1x192xf32>
    %476 = vector.broadcast %475 : vector<1x192xf32> to vector<64x192xf32>
    %477 = arith.addf %474, %476 : vector<64x192xf32>
    %c0_138 = arith.constant 0 : index
    %c0_139 = arith.constant 0 : index
    %478 = vector.load %arg24[%c0_138, %c0_139] : memref<64x192xf32, #tpu.memory_space<vmem>>, vector<64x192xf32>
    tpu.vector_store %arg24[%c0_138, %c0_139], %477 {strides = array<i32>} : memref<64x192xf32, #tpu.memory_space<vmem>>, vector<64x192xf32>,
    %c0_140 = arith.constant 0 : index
    %c0_141 = arith.constant 0 : index
    %479 = vector.load %arg11[%c0_140, %c0_141] : memref<64x192xf32, #tpu.memory_space<vmem>>, vector<64x192xf32>
    %c0_142 = arith.constant 0 : index
    %c0_143 = arith.constant 0 : index
    %480 = vector.load %arg12[%c0_142, %c0_143] : memref<1x64xf32, #tpu.memory_space<vmem>>, vector<1x64xf32>
    %481 = vector.shape_cast %480 : vector<1x64xf32> to vector<1x64xf32>
    %482 = vector.broadcast %481 : vector<1x64xf32> to vector<8x64xf32>
    %cst_144 = arith.constant 0.000000e+00 : f32
    %483 = vector.broadcast %cst_144 : f32 to vector<8x64xf32>
    %c0_i32_145 = arith.constant 0 : i32
    %c8_i32_146 = arith.constant 8 : i32
    %484 = arith.muli %c0_i32_145, %c8_i32_146 : i32
    %485 = tpu.assume_multiple %484, 8 : i32
    %486 = arith.index_cast %485 : i32 to index
    %c0_147 = arith.constant 0 : index
    %487 = vector.load %arg24[%486, %c0_147] : memref<64x192xf32, #tpu.memory_space<vmem>>, vector<8x192xf32>
    %cst_148 = arith.constant dense<0.000000e+00> : vector<8x192xf32>
    %488 = tpu.matmul %483, %479, %cst_148 {dimension_numbers = #tpu.dot_dimension_numbers<[1], [0], [0], [1], [0, 0, 1, 1], [], []>} : vector<8x64xf32>, vector<64x192xf32>, vector<8x192xf32> -> vector<8x192xf32>
    %489 = vector.extract_strided_slice %487 {offsets = [0, 0], sizes = [8, 128], strides = [1, 1]} : vector<8x192xf32> to vector<8x128xf32>
    %490 = vector.extract_strided_slice %488 {offsets = [0, 0], sizes = [8, 128], strides = [1, 1]} : vector<8x192xf32> to vector<8x128xf32>
    %491 = arith.addf %489, %490 : vector<8x128xf32>
    %492 = arith.negf %491 : vector<8x128xf32>
    %493 = math.exp %492 : vector<8x128xf32>
    %cst_149 = arith.constant 1.000000e+00 : f32
    %494 = vector.broadcast %cst_149 : f32 to vector<8x128xf32>
    %495 = arith.addf %494, %493 : vector<8x128xf32>
    %496 = arith.divf %494, %495 : vector<8x128xf32>
    %497 = vector.extract_strided_slice %496 {offsets = [0, 0], sizes = [8, 64], strides = [1, 1]} : vector<8x128xf32> to vector<8x64xf32>
    %498 = vector.extract_strided_slice %496 {offsets = [0, 64], sizes = [8, 64], strides = [1, 1]} : vector<8x128xf32> to vector<8x64xf32>
    %499 = vector.extract_strided_slice %487 {offsets = [0, 128], sizes = [8, 64], strides = [1, 1]} : vector<8x192xf32> to vector<8x64xf32>
    %500 = vector.extract_strided_slice %488 {offsets = [0, 128], sizes = [8, 64], strides = [1, 1]} : vector<8x192xf32> to vector<8x64xf32>
    %501 = arith.addf %500, %482 : vector<8x64xf32>
    %502 = arith.mulf %497, %501 : vector<8x64xf32>
    %503 = arith.addf %499, %502 : vector<8x64xf32>
    %504 = math.tanh %503 : vector<8x64xf32>
    %cst_150 = arith.constant 1.000000e+00 : f32
    %505 = vector.broadcast %cst_150 : f32 to vector<8x64xf32>
    %506 = arith.subf %505, %498 : vector<8x64xf32>
    %507 = arith.mulf %506, %504 : vector<8x64xf32>
    %508 = arith.mulf %498, %483 : vector<8x64xf32>
    %509 = arith.addf %507, %508 : vector<8x64xf32>
    %510 = arith.index_cast %485 : i32 to index
    %c0_151 = arith.constant 0 : index
    %511 = vector.load %arg22[%510, %c0_151] : memref<64x64xf32, #tpu.memory_space<vmem>>, vector<8x64xf32>
    tpu.vector_store %arg22[%510, %c0_151], %509 {strides = array<i32>} : memref<64x64xf32, #tpu.memory_space<vmem>>, vector<8x64xf32>,
    %c1_i32_152 = arith.constant 1 : i32
    %c8_i32_153 = arith.constant 8 : i32
    %512 = arith.muli %c1_i32_152, %c8_i32_153 : i32
    %513 = tpu.assume_multiple %512, 8 : i32
    %514 = arith.index_cast %513 : i32 to index
    %c0_154 = arith.constant 0 : index
    %515 = vector.load %arg24[%514, %c0_154] : memref<64x192xf32, #tpu.memory_space<vmem>>, vector<8x192xf32>
    %cst_155 = arith.constant dense<0.000000e+00> : vector<8x192xf32>
    %516 = tpu.matmul %509, %479, %cst_155 {dimension_numbers = #tpu.dot_dimension_numbers<[1], [0], [0], [1], [0, 0, 1, 1], [], []>} : vector<8x64xf32>, vector<64x192xf32>, vector<8x192xf32> -> vector<8x192xf32>
    %517 = vector.extract_strided_slice %515 {offsets = [0, 0], sizes = [8, 128], strides = [1, 1]} : vector<8x192xf32> to vector<8x128xf32>
    %518 = vector.extract_strided_slice %516 {offsets = [0, 0], sizes = [8, 128], strides = [1, 1]} : vector<8x192xf32> to vector<8x128xf32>
    %519 = arith.addf %517, %518 : vector<8x128xf32>
    %520 = arith.negf %519 : vector<8x128xf32>
    %521 = math.exp %520 : vector<8x128xf32>
    %cst_156 = arith.constant 1.000000e+00 : f32
    %522 = vector.broadcast %cst_156 : f32 to vector<8x128xf32>
    %523 = arith.addf %522, %521 : vector<8x128xf32>
    %524 = arith.divf %522, %523 : vector<8x128xf32>
    %525 = vector.extract_strided_slice %524 {offsets = [0, 0], sizes = [8, 64], strides = [1, 1]} : vector<8x128xf32> to vector<8x64xf32>
    %526 = vector.extract_strided_slice %524 {offsets = [0, 64], sizes = [8, 64], strides = [1, 1]} : vector<8x128xf32> to vector<8x64xf32>
    %527 = vector.extract_strided_slice %515 {offsets = [0, 128], sizes = [8, 64], strides = [1, 1]} : vector<8x192xf32> to vector<8x64xf32>
    %528 = vector.extract_strided_slice %516 {offsets = [0, 128], sizes = [8, 64], strides = [1, 1]} : vector<8x192xf32> to vector<8x64xf32>
    %529 = arith.addf %528, %482 : vector<8x64xf32>
    %530 = arith.mulf %525, %529 : vector<8x64xf32>
    %531 = arith.addf %527, %530 : vector<8x64xf32>
    %532 = math.tanh %531 : vector<8x64xf32>
    %cst_157 = arith.constant 1.000000e+00 : f32
    %533 = vector.broadcast %cst_157 : f32 to vector<8x64xf32>
    %534 = arith.subf %533, %526 : vector<8x64xf32>
    %535 = arith.mulf %534, %532 : vector<8x64xf32>
    %536 = arith.mulf %526, %509 : vector<8x64xf32>
    %537 = arith.addf %535, %536 : vector<8x64xf32>
    %538 = arith.index_cast %513 : i32 to index
    %c0_158 = arith.constant 0 : index
    %539 = vector.load %arg22[%538, %c0_158] : memref<64x64xf32, #tpu.memory_space<vmem>>, vector<8x64xf32>
    tpu.vector_store %arg22[%538, %c0_158], %537 {strides = array<i32>} : memref<64x64xf32, #tpu.memory_space<vmem>>, vector<8x64xf32>,
    %c2_i32_159 = arith.constant 2 : i32
    %c8_i32_160 = arith.constant 8 : i32
    %540 = arith.muli %c2_i32_159, %c8_i32_160 : i32
    %541 = tpu.assume_multiple %540, 8 : i32
    %542 = arith.index_cast %541 : i32 to index
    %c0_161 = arith.constant 0 : index
    %543 = vector.load %arg24[%542, %c0_161] : memref<64x192xf32, #tpu.memory_space<vmem>>, vector<8x192xf32>
    %cst_162 = arith.constant dense<0.000000e+00> : vector<8x192xf32>
    %544 = tpu.matmul %537, %479, %cst_162 {dimension_numbers = #tpu.dot_dimension_numbers<[1], [0], [0], [1], [0, 0, 1, 1], [], []>} : vector<8x64xf32>, vector<64x192xf32>, vector<8x192xf32> -> vector<8x192xf32>
    %545 = vector.extract_strided_slice %543 {offsets = [0, 0], sizes = [8, 128], strides = [1, 1]} : vector<8x192xf32> to vector<8x128xf32>
    %546 = vector.extract_strided_slice %544 {offsets = [0, 0], sizes = [8, 128], strides = [1, 1]} : vector<8x192xf32> to vector<8x128xf32>
    %547 = arith.addf %545, %546 : vector<8x128xf32>
    %548 = arith.negf %547 : vector<8x128xf32>
    %549 = math.exp %548 : vector<8x128xf32>
    %cst_163 = arith.constant 1.000000e+00 : f32
    %550 = vector.broadcast %cst_163 : f32 to vector<8x128xf32>
    %551 = arith.addf %550, %549 : vector<8x128xf32>
    %552 = arith.divf %550, %551 : vector<8x128xf32>
    %553 = vector.extract_strided_slice %552 {offsets = [0, 0], sizes = [8, 64], strides = [1, 1]} : vector<8x128xf32> to vector<8x64xf32>
    %554 = vector.extract_strided_slice %552 {offsets = [0, 64], sizes = [8, 64], strides = [1, 1]} : vector<8x128xf32> to vector<8x64xf32>
    %555 = vector.extract_strided_slice %543 {offsets = [0, 128], sizes = [8, 64], strides = [1, 1]} : vector<8x192xf32> to vector<8x64xf32>
    %556 = vector.extract_strided_slice %544 {offsets = [0, 128], sizes = [8, 64], strides = [1, 1]} : vector<8x192xf32> to vector<8x64xf32>
    %557 = arith.addf %556, %482 : vector<8x64xf32>
    %558 = arith.mulf %553, %557 : vector<8x64xf32>
    %559 = arith.addf %555, %558 : vector<8x64xf32>
    %560 = math.tanh %559 : vector<8x64xf32>
    %cst_164 = arith.constant 1.000000e+00 : f32
    %561 = vector.broadcast %cst_164 : f32 to vector<8x64xf32>
    %562 = arith.subf %561, %554 : vector<8x64xf32>
    %563 = arith.mulf %562, %560 : vector<8x64xf32>
    %564 = arith.mulf %554, %537 : vector<8x64xf32>
    %565 = arith.addf %563, %564 : vector<8x64xf32>
    %566 = arith.index_cast %541 : i32 to index
    %c0_165 = arith.constant 0 : index
    %567 = vector.load %arg22[%566, %c0_165] : memref<64x64xf32, #tpu.memory_space<vmem>>, vector<8x64xf32>
    tpu.vector_store %arg22[%566, %c0_165], %565 {strides = array<i32>} : memref<64x64xf32, #tpu.memory_space<vmem>>, vector<8x64xf32>,
    %c3_i32_166 = arith.constant 3 : i32
    %c8_i32_167 = arith.constant 8 : i32
    %568 = arith.muli %c3_i32_166, %c8_i32_167 : i32
    %569 = tpu.assume_multiple %568, 8 : i32
    %570 = arith.index_cast %569 : i32 to index
    %c0_168 = arith.constant 0 : index
    %571 = vector.load %arg24[%570, %c0_168] : memref<64x192xf32, #tpu.memory_space<vmem>>, vector<8x192xf32>
    %cst_169 = arith.constant dense<0.000000e+00> : vector<8x192xf32>
    %572 = tpu.matmul %565, %479, %cst_169 {dimension_numbers = #tpu.dot_dimension_numbers<[1], [0], [0], [1], [0, 0, 1, 1], [], []>} : vector<8x64xf32>, vector<64x192xf32>, vector<8x192xf32> -> vector<8x192xf32>
    %573 = vector.extract_strided_slice %571 {offsets = [0, 0], sizes = [8, 128], strides = [1, 1]} : vector<8x192xf32> to vector<8x128xf32>
    %574 = vector.extract_strided_slice %572 {offsets = [0, 0], sizes = [8, 128], strides = [1, 1]} : vector<8x192xf32> to vector<8x128xf32>
    %575 = arith.addf %573, %574 : vector<8x128xf32>
    %576 = arith.negf %575 : vector<8x128xf32>
    %577 = math.exp %576 : vector<8x128xf32>
    %cst_170 = arith.constant 1.000000e+00 : f32
    %578 = vector.broadcast %cst_170 : f32 to vector<8x128xf32>
    %579 = arith.addf %578, %577 : vector<8x128xf32>
    %580 = arith.divf %578, %579 : vector<8x128xf32>
    %581 = vector.extract_strided_slice %580 {offsets = [0, 0], sizes = [8, 64], strides = [1, 1]} : vector<8x128xf32> to vector<8x64xf32>
    %582 = vector.extract_strided_slice %580 {offsets = [0, 64], sizes = [8, 64], strides = [1, 1]} : vector<8x128xf32> to vector<8x64xf32>
    %583 = vector.extract_strided_slice %571 {offsets = [0, 128], sizes = [8, 64], strides = [1, 1]} : vector<8x192xf32> to vector<8x64xf32>
    %584 = vector.extract_strided_slice %572 {offsets = [0, 128], sizes = [8, 64], strides = [1, 1]} : vector<8x192xf32> to vector<8x64xf32>
    %585 = arith.addf %584, %482 : vector<8x64xf32>
    %586 = arith.mulf %581, %585 : vector<8x64xf32>
    %587 = arith.addf %583, %586 : vector<8x64xf32>
    %588 = math.tanh %587 : vector<8x64xf32>
    %cst_171 = arith.constant 1.000000e+00 : f32
    %589 = vector.broadcast %cst_171 : f32 to vector<8x64xf32>
    %590 = arith.subf %589, %582 : vector<8x64xf32>
    %591 = arith.mulf %590, %588 : vector<8x64xf32>
    %592 = arith.mulf %582, %565 : vector<8x64xf32>
    %593 = arith.addf %591, %592 : vector<8x64xf32>
    %594 = arith.index_cast %569 : i32 to index
    %c0_172 = arith.constant 0 : index
    %595 = vector.load %arg22[%594, %c0_172] : memref<64x64xf32, #tpu.memory_space<vmem>>, vector<8x64xf32>
    tpu.vector_store %arg22[%594, %c0_172], %593 {strides = array<i32>} : memref<64x64xf32, #tpu.memory_space<vmem>>, vector<8x64xf32>,
    %c4_i32_173 = arith.constant 4 : i32
    %c8_i32_174 = arith.constant 8 : i32
    %596 = arith.muli %c4_i32_173, %c8_i32_174 : i32
    %597 = tpu.assume_multiple %596, 8 : i32
    %598 = arith.index_cast %597 : i32 to index
    %c0_175 = arith.constant 0 : index
    %599 = vector.load %arg24[%598, %c0_175] : memref<64x192xf32, #tpu.memory_space<vmem>>, vector<8x192xf32>
    %cst_176 = arith.constant dense<0.000000e+00> : vector<8x192xf32>
    %600 = tpu.matmul %593, %479, %cst_176 {dimension_numbers = #tpu.dot_dimension_numbers<[1], [0], [0], [1], [0, 0, 1, 1], [], []>} : vector<8x64xf32>, vector<64x192xf32>, vector<8x192xf32> -> vector<8x192xf32>
    %601 = vector.extract_strided_slice %599 {offsets = [0, 0], sizes = [8, 128], strides = [1, 1]} : vector<8x192xf32> to vector<8x128xf32>
    %602 = vector.extract_strided_slice %600 {offsets = [0, 0], sizes = [8, 128], strides = [1, 1]} : vector<8x192xf32> to vector<8x128xf32>
    %603 = arith.addf %601, %602 : vector<8x128xf32>
    %604 = arith.negf %603 : vector<8x128xf32>
    %605 = math.exp %604 : vector<8x128xf32>
    %cst_177 = arith.constant 1.000000e+00 : f32
    %606 = vector.broadcast %cst_177 : f32 to vector<8x128xf32>
    %607 = arith.addf %606, %605 : vector<8x128xf32>
    %608 = arith.divf %606, %607 : vector<8x128xf32>
    %609 = vector.extract_strided_slice %608 {offsets = [0, 0], sizes = [8, 64], strides = [1, 1]} : vector<8x128xf32> to vector<8x64xf32>
    %610 = vector.extract_strided_slice %608 {offsets = [0, 64], sizes = [8, 64], strides = [1, 1]} : vector<8x128xf32> to vector<8x64xf32>
    %611 = vector.extract_strided_slice %599 {offsets = [0, 128], sizes = [8, 64], strides = [1, 1]} : vector<8x192xf32> to vector<8x64xf32>
    %612 = vector.extract_strided_slice %600 {offsets = [0, 128], sizes = [8, 64], strides = [1, 1]} : vector<8x192xf32> to vector<8x64xf32>
    %613 = arith.addf %612, %482 : vector<8x64xf32>
    %614 = arith.mulf %609, %613 : vector<8x64xf32>
    %615 = arith.addf %611, %614 : vector<8x64xf32>
    %616 = math.tanh %615 : vector<8x64xf32>
    %cst_178 = arith.constant 1.000000e+00 : f32
    %617 = vector.broadcast %cst_178 : f32 to vector<8x64xf32>
    %618 = arith.subf %617, %610 : vector<8x64xf32>
    %619 = arith.mulf %618, %616 : vector<8x64xf32>
    %620 = arith.mulf %610, %593 : vector<8x64xf32>
    %621 = arith.addf %619, %620 : vector<8x64xf32>
    %622 = arith.index_cast %597 : i32 to index
    %c0_179 = arith.constant 0 : index
    %623 = vector.load %arg22[%622, %c0_179] : memref<64x64xf32, #tpu.memory_space<vmem>>, vector<8x64xf32>
    tpu.vector_store %arg22[%622, %c0_179], %621 {strides = array<i32>} : memref<64x64xf32, #tpu.memory_space<vmem>>, vector<8x64xf32>,
    %c5_i32_180 = arith.constant 5 : i32
    %c8_i32_181 = arith.constant 8 : i32
    %624 = arith.muli %c5_i32_180, %c8_i32_181 : i32
    %625 = tpu.assume_multiple %624, 8 : i32
    %626 = arith.index_cast %625 : i32 to index
    %c0_182 = arith.constant 0 : index
    %627 = vector.load %arg24[%626, %c0_182] : memref<64x192xf32, #tpu.memory_space<vmem>>, vector<8x192xf32>
    %cst_183 = arith.constant dense<0.000000e+00> : vector<8x192xf32>
    %628 = tpu.matmul %621, %479, %cst_183 {dimension_numbers = #tpu.dot_dimension_numbers<[1], [0], [0], [1], [0, 0, 1, 1], [], []>} : vector<8x64xf32>, vector<64x192xf32>, vector<8x192xf32> -> vector<8x192xf32>
    %629 = vector.extract_strided_slice %627 {offsets = [0, 0], sizes = [8, 128], strides = [1, 1]} : vector<8x192xf32> to vector<8x128xf32>
    %630 = vector.extract_strided_slice %628 {offsets = [0, 0], sizes = [8, 128], strides = [1, 1]} : vector<8x192xf32> to vector<8x128xf32>
    %631 = arith.addf %629, %630 : vector<8x128xf32>
    %632 = arith.negf %631 : vector<8x128xf32>
    %633 = math.exp %632 : vector<8x128xf32>
    %cst_184 = arith.constant 1.000000e+00 : f32
    %634 = vector.broadcast %cst_184 : f32 to vector<8x128xf32>
    %635 = arith.addf %634, %633 : vector<8x128xf32>
    %636 = arith.divf %634, %635 : vector<8x128xf32>
    %637 = vector.extract_strided_slice %636 {offsets = [0, 0], sizes = [8, 64], strides = [1, 1]} : vector<8x128xf32> to vector<8x64xf32>
    %638 = vector.extract_strided_slice %636 {offsets = [0, 64], sizes = [8, 64], strides = [1, 1]} : vector<8x128xf32> to vector<8x64xf32>
    %639 = vector.extract_strided_slice %627 {offsets = [0, 128], sizes = [8, 64], strides = [1, 1]} : vector<8x192xf32> to vector<8x64xf32>
    %640 = vector.extract_strided_slice %628 {offsets = [0, 128], sizes = [8, 64], strides = [1, 1]} : vector<8x192xf32> to vector<8x64xf32>
    %641 = arith.addf %640, %482 : vector<8x64xf32>
    %642 = arith.mulf %637, %641 : vector<8x64xf32>
    %643 = arith.addf %639, %642 : vector<8x64xf32>
    %644 = math.tanh %643 : vector<8x64xf32>
    %cst_185 = arith.constant 1.000000e+00 : f32
    %645 = vector.broadcast %cst_185 : f32 to vector<8x64xf32>
    %646 = arith.subf %645, %638 : vector<8x64xf32>
    %647 = arith.mulf %646, %644 : vector<8x64xf32>
    %648 = arith.mulf %638, %621 : vector<8x64xf32>
    %649 = arith.addf %647, %648 : vector<8x64xf32>
    %650 = arith.index_cast %625 : i32 to index
    %c0_186 = arith.constant 0 : index
    %651 = vector.load %arg22[%650, %c0_186] : memref<64x64xf32, #tpu.memory_space<vmem>>, vector<8x64xf32>
    tpu.vector_store %arg22[%650, %c0_186], %649 {strides = array<i32>} : memref<64x64xf32, #tpu.memory_space<vmem>>, vector<8x64xf32>,
    %c6_i32_187 = arith.constant 6 : i32
    %c8_i32_188 = arith.constant 8 : i32
    %652 = arith.muli %c6_i32_187, %c8_i32_188 : i32
    %653 = tpu.assume_multiple %652, 8 : i32
    %654 = arith.index_cast %653 : i32 to index
    %c0_189 = arith.constant 0 : index
    %655 = vector.load %arg24[%654, %c0_189] : memref<64x192xf32, #tpu.memory_space<vmem>>, vector<8x192xf32>
    %cst_190 = arith.constant dense<0.000000e+00> : vector<8x192xf32>
    %656 = tpu.matmul %649, %479, %cst_190 {dimension_numbers = #tpu.dot_dimension_numbers<[1], [0], [0], [1], [0, 0, 1, 1], [], []>} : vector<8x64xf32>, vector<64x192xf32>, vector<8x192xf32> -> vector<8x192xf32>
    %657 = vector.extract_strided_slice %655 {offsets = [0, 0], sizes = [8, 128], strides = [1, 1]} : vector<8x192xf32> to vector<8x128xf32>
    %658 = vector.extract_strided_slice %656 {offsets = [0, 0], sizes = [8, 128], strides = [1, 1]} : vector<8x192xf32> to vector<8x128xf32>
    %659 = arith.addf %657, %658 : vector<8x128xf32>
    %660 = arith.negf %659 : vector<8x128xf32>
    %661 = math.exp %660 : vector<8x128xf32>
    %cst_191 = arith.constant 1.000000e+00 : f32
    %662 = vector.broadcast %cst_191 : f32 to vector<8x128xf32>
    %663 = arith.addf %662, %661 : vector<8x128xf32>
    %664 = arith.divf %662, %663 : vector<8x128xf32>
    %665 = vector.extract_strided_slice %664 {offsets = [0, 0], sizes = [8, 64], strides = [1, 1]} : vector<8x128xf32> to vector<8x64xf32>
    %666 = vector.extract_strided_slice %664 {offsets = [0, 64], sizes = [8, 64], strides = [1, 1]} : vector<8x128xf32> to vector<8x64xf32>
    %667 = vector.extract_strided_slice %655 {offsets = [0, 128], sizes = [8, 64], strides = [1, 1]} : vector<8x192xf32> to vector<8x64xf32>
    %668 = vector.extract_strided_slice %656 {offsets = [0, 128], sizes = [8, 64], strides = [1, 1]} : vector<8x192xf32> to vector<8x64xf32>
    %669 = arith.addf %668, %482 : vector<8x64xf32>
    %670 = arith.mulf %665, %669 : vector<8x64xf32>
    %671 = arith.addf %667, %670 : vector<8x64xf32>
    %672 = math.tanh %671 : vector<8x64xf32>
    %cst_192 = arith.constant 1.000000e+00 : f32
    %673 = vector.broadcast %cst_192 : f32 to vector<8x64xf32>
    %674 = arith.subf %673, %666 : vector<8x64xf32>
    %675 = arith.mulf %674, %672 : vector<8x64xf32>
    %676 = arith.mulf %666, %649 : vector<8x64xf32>
    %677 = arith.addf %675, %676 : vector<8x64xf32>
    %678 = arith.index_cast %653 : i32 to index
    %c0_193 = arith.constant 0 : index
    %679 = vector.load %arg22[%678, %c0_193] : memref<64x64xf32, #tpu.memory_space<vmem>>, vector<8x64xf32>
    tpu.vector_store %arg22[%678, %c0_193], %677 {strides = array<i32>} : memref<64x64xf32, #tpu.memory_space<vmem>>, vector<8x64xf32>,
    %c7_i32_194 = arith.constant 7 : i32
    %c8_i32_195 = arith.constant 8 : i32
    %680 = arith.muli %c7_i32_194, %c8_i32_195 : i32
    %681 = tpu.assume_multiple %680, 8 : i32
    %682 = arith.index_cast %681 : i32 to index
    %c0_196 = arith.constant 0 : index
    %683 = vector.load %arg24[%682, %c0_196] : memref<64x192xf32, #tpu.memory_space<vmem>>, vector<8x192xf32>
    %cst_197 = arith.constant dense<0.000000e+00> : vector<8x192xf32>
    %684 = tpu.matmul %677, %479, %cst_197 {dimension_numbers = #tpu.dot_dimension_numbers<[1], [0], [0], [1], [0, 0, 1, 1], [], []>} : vector<8x64xf32>, vector<64x192xf32>, vector<8x192xf32> -> vector<8x192xf32>
    %685 = vector.extract_strided_slice %683 {offsets = [0, 0], sizes = [8, 128], strides = [1, 1]} : vector<8x192xf32> to vector<8x128xf32>
    %686 = vector.extract_strided_slice %684 {offsets = [0, 0], sizes = [8, 128], strides = [1, 1]} : vector<8x192xf32> to vector<8x128xf32>
    %687 = arith.addf %685, %686 : vector<8x128xf32>
    %688 = arith.negf %687 : vector<8x128xf32>
    %689 = math.exp %688 : vector<8x128xf32>
    %cst_198 = arith.constant 1.000000e+00 : f32
    %690 = vector.broadcast %cst_198 : f32 to vector<8x128xf32>
    %691 = arith.addf %690, %689 : vector<8x128xf32>
    %692 = arith.divf %690, %691 : vector<8x128xf32>
    %693 = vector.extract_strided_slice %692 {offsets = [0, 0], sizes = [8, 64], strides = [1, 1]} : vector<8x128xf32> to vector<8x64xf32>
    %694 = vector.extract_strided_slice %692 {offsets = [0, 64], sizes = [8, 64], strides = [1, 1]} : vector<8x128xf32> to vector<8x64xf32>
    %695 = vector.extract_strided_slice %683 {offsets = [0, 128], sizes = [8, 64], strides = [1, 1]} : vector<8x192xf32> to vector<8x64xf32>
    %696 = vector.extract_strided_slice %684 {offsets = [0, 128], sizes = [8, 64], strides = [1, 1]} : vector<8x192xf32> to vector<8x64xf32>
    %697 = arith.addf %696, %482 : vector<8x64xf32>
    %698 = arith.mulf %693, %697 : vector<8x64xf32>
    %699 = arith.addf %695, %698 : vector<8x64xf32>
    %700 = math.tanh %699 : vector<8x64xf32>
    %cst_199 = arith.constant 1.000000e+00 : f32
    %701 = vector.broadcast %cst_199 : f32 to vector<8x64xf32>
    %702 = arith.subf %701, %694 : vector<8x64xf32>
    %703 = arith.mulf %702, %700 : vector<8x64xf32>
    %704 = arith.mulf %694, %677 : vector<8x64xf32>
    %705 = arith.addf %703, %704 : vector<8x64xf32>
    %706 = arith.index_cast %681 : i32 to index
    %c0_200 = arith.constant 0 : index
    %707 = vector.load %arg22[%706, %c0_200] : memref<64x64xf32, #tpu.memory_space<vmem>>, vector<8x64xf32>
    tpu.vector_store %arg22[%706, %c0_200], %705 {strides = array<i32>} : memref<64x64xf32, #tpu.memory_space<vmem>>, vector<8x64xf32>,
    %c8_i32_201 = arith.constant 8 : i32
    %c0_202 = arith.constant 0 : index
    %c0_203 = arith.constant 0 : index
    %708 = vector.load %arg22[%c0_202, %c0_203] : memref<64x64xf32, #tpu.memory_space<vmem>>, vector<64x64xf32>
    %c0_204 = arith.constant 0 : index
    %c0_205 = arith.constant 0 : index
    %709 = vector.load %arg13[%c0_204, %c0_205] : memref<64x192xf32, #tpu.memory_space<vmem>>, vector<64x192xf32>
    %cst_206 = arith.constant dense<0.000000e+00> : vector<64x192xf32>
    %710 = tpu.matmul %708, %709, %cst_206 {dimension_numbers = #tpu.dot_dimension_numbers<[1], [0], [0], [1], [0, 0, 1, 1], [], []>} : vector<64x64xf32>, vector<64x192xf32>, vector<64x192xf32> -> vector<64x192xf32>
    %c0_207 = arith.constant 0 : index
    %c0_208 = arith.constant 0 : index
    %711 = vector.load %arg14[%c0_207, %c0_208] : memref<1x192xf32, #tpu.memory_space<vmem>>, vector<1x192xf32>
    %712 = vector.broadcast %711 : vector<1x192xf32> to vector<64x192xf32>
    %713 = arith.addf %710, %712 : vector<64x192xf32>
    %c0_209 = arith.constant 0 : index
    %c0_210 = arith.constant 0 : index
    %714 = vector.load %arg24[%c0_209, %c0_210] : memref<64x192xf32, #tpu.memory_space<vmem>>, vector<64x192xf32>
    tpu.vector_store %arg24[%c0_209, %c0_210], %713 {strides = array<i32>} : memref<64x192xf32, #tpu.memory_space<vmem>>, vector<64x192xf32>,
    %c0_211 = arith.constant 0 : index
    %c0_212 = arith.constant 0 : index
    %715 = vector.load %arg15[%c0_211, %c0_212] : memref<64x192xf32, #tpu.memory_space<vmem>>, vector<64x192xf32>
    %c0_213 = arith.constant 0 : index
    %c0_214 = arith.constant 0 : index
    %716 = vector.load %arg16[%c0_213, %c0_214] : memref<1x64xf32, #tpu.memory_space<vmem>>, vector<1x64xf32>
    %717 = vector.shape_cast %716 : vector<1x64xf32> to vector<1x64xf32>
    %718 = vector.broadcast %717 : vector<1x64xf32> to vector<8x64xf32>
    %cst_215 = arith.constant 0.000000e+00 : f32
    %719 = vector.broadcast %cst_215 : f32 to vector<8x64xf32>
    %c0_i32_216 = arith.constant 0 : i32
    %c8_i32_217 = arith.constant 8 : i32
    %720 = arith.muli %c0_i32_216, %c8_i32_217 : i32
    %721 = tpu.assume_multiple %720, 8 : i32
    %722 = arith.index_cast %721 : i32 to index
    %c0_218 = arith.constant 0 : index
    %723 = vector.load %arg24[%722, %c0_218] : memref<64x192xf32, #tpu.memory_space<vmem>>, vector<8x192xf32>
    %cst_219 = arith.constant dense<0.000000e+00> : vector<8x192xf32>
    %724 = tpu.matmul %719, %715, %cst_219 {dimension_numbers = #tpu.dot_dimension_numbers<[1], [0], [0], [1], [0, 0, 1, 1], [], []>} : vector<8x64xf32>, vector<64x192xf32>, vector<8x192xf32> -> vector<8x192xf32>
    %725 = vector.extract_strided_slice %723 {offsets = [0, 0], sizes = [8, 128], strides = [1, 1]} : vector<8x192xf32> to vector<8x128xf32>
    %726 = vector.extract_strided_slice %724 {offsets = [0, 0], sizes = [8, 128], strides = [1, 1]} : vector<8x192xf32> to vector<8x128xf32>
    %727 = arith.addf %725, %726 : vector<8x128xf32>
    %728 = arith.negf %727 : vector<8x128xf32>
    %729 = math.exp %728 : vector<8x128xf32>
    %cst_220 = arith.constant 1.000000e+00 : f32
    %730 = vector.broadcast %cst_220 : f32 to vector<8x128xf32>
    %731 = arith.addf %730, %729 : vector<8x128xf32>
    %732 = arith.divf %730, %731 : vector<8x128xf32>
    %733 = vector.extract_strided_slice %732 {offsets = [0, 0], sizes = [8, 64], strides = [1, 1]} : vector<8x128xf32> to vector<8x64xf32>
    %734 = vector.extract_strided_slice %732 {offsets = [0, 64], sizes = [8, 64], strides = [1, 1]} : vector<8x128xf32> to vector<8x64xf32>
    %735 = vector.extract_strided_slice %723 {offsets = [0, 128], sizes = [8, 64], strides = [1, 1]} : vector<8x192xf32> to vector<8x64xf32>
    %736 = vector.extract_strided_slice %724 {offsets = [0, 128], sizes = [8, 64], strides = [1, 1]} : vector<8x192xf32> to vector<8x64xf32>
    %737 = arith.addf %736, %718 : vector<8x64xf32>
    %738 = arith.mulf %733, %737 : vector<8x64xf32>
    %739 = arith.addf %735, %738 : vector<8x64xf32>
    %740 = math.tanh %739 : vector<8x64xf32>
    %cst_221 = arith.constant 1.000000e+00 : f32
    %741 = vector.broadcast %cst_221 : f32 to vector<8x64xf32>
    %742 = arith.subf %741, %734 : vector<8x64xf32>
    %743 = arith.mulf %742, %740 : vector<8x64xf32>
    %744 = arith.mulf %734, %719 : vector<8x64xf32>
    %745 = arith.addf %743, %744 : vector<8x64xf32>
    %c1_i32_222 = arith.constant 1 : i32
    %c8_i32_223 = arith.constant 8 : i32
    %746 = arith.muli %c1_i32_222, %c8_i32_223 : i32
    %747 = tpu.assume_multiple %746, 8 : i32
    %748 = arith.index_cast %747 : i32 to index
    %c0_224 = arith.constant 0 : index
    %749 = vector.load %arg24[%748, %c0_224] : memref<64x192xf32, #tpu.memory_space<vmem>>, vector<8x192xf32>
    %cst_225 = arith.constant dense<0.000000e+00> : vector<8x192xf32>
    %750 = tpu.matmul %745, %715, %cst_225 {dimension_numbers = #tpu.dot_dimension_numbers<[1], [0], [0], [1], [0, 0, 1, 1], [], []>} : vector<8x64xf32>, vector<64x192xf32>, vector<8x192xf32> -> vector<8x192xf32>
    %751 = vector.extract_strided_slice %749 {offsets = [0, 0], sizes = [8, 128], strides = [1, 1]} : vector<8x192xf32> to vector<8x128xf32>
    %752 = vector.extract_strided_slice %750 {offsets = [0, 0], sizes = [8, 128], strides = [1, 1]} : vector<8x192xf32> to vector<8x128xf32>
    %753 = arith.addf %751, %752 : vector<8x128xf32>
    %754 = arith.negf %753 : vector<8x128xf32>
    %755 = math.exp %754 : vector<8x128xf32>
    %cst_226 = arith.constant 1.000000e+00 : f32
    %756 = vector.broadcast %cst_226 : f32 to vector<8x128xf32>
    %757 = arith.addf %756, %755 : vector<8x128xf32>
    %758 = arith.divf %756, %757 : vector<8x128xf32>
    %759 = vector.extract_strided_slice %758 {offsets = [0, 0], sizes = [8, 64], strides = [1, 1]} : vector<8x128xf32> to vector<8x64xf32>
    %760 = vector.extract_strided_slice %758 {offsets = [0, 64], sizes = [8, 64], strides = [1, 1]} : vector<8x128xf32> to vector<8x64xf32>
    %761 = vector.extract_strided_slice %749 {offsets = [0, 128], sizes = [8, 64], strides = [1, 1]} : vector<8x192xf32> to vector<8x64xf32>
    %762 = vector.extract_strided_slice %750 {offsets = [0, 128], sizes = [8, 64], strides = [1, 1]} : vector<8x192xf32> to vector<8x64xf32>
    %763 = arith.addf %762, %718 : vector<8x64xf32>
    %764 = arith.mulf %759, %763 : vector<8x64xf32>
    %765 = arith.addf %761, %764 : vector<8x64xf32>
    %766 = math.tanh %765 : vector<8x64xf32>
    %cst_227 = arith.constant 1.000000e+00 : f32
    %767 = vector.broadcast %cst_227 : f32 to vector<8x64xf32>
    %768 = arith.subf %767, %760 : vector<8x64xf32>
    %769 = arith.mulf %768, %766 : vector<8x64xf32>
    %770 = arith.mulf %760, %745 : vector<8x64xf32>
    %771 = arith.addf %769, %770 : vector<8x64xf32>
    %c2_i32_228 = arith.constant 2 : i32
    %c8_i32_229 = arith.constant 8 : i32
    %772 = arith.muli %c2_i32_228, %c8_i32_229 : i32
    %773 = tpu.assume_multiple %772, 8 : i32
    %774 = arith.index_cast %773 : i32 to index
    %c0_230 = arith.constant 0 : index
    %775 = vector.load %arg24[%774, %c0_230] : memref<64x192xf32, #tpu.memory_space<vmem>>, vector<8x192xf32>
    %cst_231 = arith.constant dense<0.000000e+00> : vector<8x192xf32>
    %776 = tpu.matmul %771, %715, %cst_231 {dimension_numbers = #tpu.dot_dimension_numbers<[1], [0], [0], [1], [0, 0, 1, 1], [], []>} : vector<8x64xf32>, vector<64x192xf32>, vector<8x192xf32> -> vector<8x192xf32>
    %777 = vector.extract_strided_slice %775 {offsets = [0, 0], sizes = [8, 128], strides = [1, 1]} : vector<8x192xf32> to vector<8x128xf32>
    %778 = vector.extract_strided_slice %776 {offsets = [0, 0], sizes = [8, 128], strides = [1, 1]} : vector<8x192xf32> to vector<8x128xf32>
    %779 = arith.addf %777, %778 : vector<8x128xf32>
    %780 = arith.negf %779 : vector<8x128xf32>
    %781 = math.exp %780 : vector<8x128xf32>
    %cst_232 = arith.constant 1.000000e+00 : f32
    %782 = vector.broadcast %cst_232 : f32 to vector<8x128xf32>
    %783 = arith.addf %782, %781 : vector<8x128xf32>
    %784 = arith.divf %782, %783 : vector<8x128xf32>
    %785 = vector.extract_strided_slice %784 {offsets = [0, 0], sizes = [8, 64], strides = [1, 1]} : vector<8x128xf32> to vector<8x64xf32>
    %786 = vector.extract_strided_slice %784 {offsets = [0, 64], sizes = [8, 64], strides = [1, 1]} : vector<8x128xf32> to vector<8x64xf32>
    %787 = vector.extract_strided_slice %775 {offsets = [0, 128], sizes = [8, 64], strides = [1, 1]} : vector<8x192xf32> to vector<8x64xf32>
    %788 = vector.extract_strided_slice %776 {offsets = [0, 128], sizes = [8, 64], strides = [1, 1]} : vector<8x192xf32> to vector<8x64xf32>
    %789 = arith.addf %788, %718 : vector<8x64xf32>
    %790 = arith.mulf %785, %789 : vector<8x64xf32>
    %791 = arith.addf %787, %790 : vector<8x64xf32>
    %792 = math.tanh %791 : vector<8x64xf32>
    %cst_233 = arith.constant 1.000000e+00 : f32
    %793 = vector.broadcast %cst_233 : f32 to vector<8x64xf32>
    %794 = arith.subf %793, %786 : vector<8x64xf32>
    %795 = arith.mulf %794, %792 : vector<8x64xf32>
    %796 = arith.mulf %786, %771 : vector<8x64xf32>
    %797 = arith.addf %795, %796 : vector<8x64xf32>
    %c3_i32_234 = arith.constant 3 : i32
    %c8_i32_235 = arith.constant 8 : i32
    %798 = arith.muli %c3_i32_234, %c8_i32_235 : i32
    %799 = tpu.assume_multiple %798, 8 : i32
    %800 = arith.index_cast %799 : i32 to index
    %c0_236 = arith.constant 0 : index
    %801 = vector.load %arg24[%800, %c0_236] : memref<64x192xf32, #tpu.memory_space<vmem>>, vector<8x192xf32>
    %cst_237 = arith.constant dense<0.000000e+00> : vector<8x192xf32>
    %802 = tpu.matmul %797, %715, %cst_237 {dimension_numbers = #tpu.dot_dimension_numbers<[1], [0], [0], [1], [0, 0, 1, 1], [], []>} : vector<8x64xf32>, vector<64x192xf32>, vector<8x192xf32> -> vector<8x192xf32>
    %803 = vector.extract_strided_slice %801 {offsets = [0, 0], sizes = [8, 128], strides = [1, 1]} : vector<8x192xf32> to vector<8x128xf32>
    %804 = vector.extract_strided_slice %802 {offsets = [0, 0], sizes = [8, 128], strides = [1, 1]} : vector<8x192xf32> to vector<8x128xf32>
    %805 = arith.addf %803, %804 : vector<8x128xf32>
    %806 = arith.negf %805 : vector<8x128xf32>
    %807 = math.exp %806 : vector<8x128xf32>
    %cst_238 = arith.constant 1.000000e+00 : f32
    %808 = vector.broadcast %cst_238 : f32 to vector<8x128xf32>
    %809 = arith.addf %808, %807 : vector<8x128xf32>
    %810 = arith.divf %808, %809 : vector<8x128xf32>
    %811 = vector.extract_strided_slice %810 {offsets = [0, 0], sizes = [8, 64], strides = [1, 1]} : vector<8x128xf32> to vector<8x64xf32>
    %812 = vector.extract_strided_slice %810 {offsets = [0, 64], sizes = [8, 64], strides = [1, 1]} : vector<8x128xf32> to vector<8x64xf32>
    %813 = vector.extract_strided_slice %801 {offsets = [0, 128], sizes = [8, 64], strides = [1, 1]} : vector<8x192xf32> to vector<8x64xf32>
    %814 = vector.extract_strided_slice %802 {offsets = [0, 128], sizes = [8, 64], strides = [1, 1]} : vector<8x192xf32> to vector<8x64xf32>
    %815 = arith.addf %814, %718 : vector<8x64xf32>
    %816 = arith.mulf %811, %815 : vector<8x64xf32>
    %817 = arith.addf %813, %816 : vector<8x64xf32>
    %818 = math.tanh %817 : vector<8x64xf32>
    %cst_239 = arith.constant 1.000000e+00 : f32
    %819 = vector.broadcast %cst_239 : f32 to vector<8x64xf32>
    %820 = arith.subf %819, %812 : vector<8x64xf32>
    %821 = arith.mulf %820, %818 : vector<8x64xf32>
    %822 = arith.mulf %812, %797 : vector<8x64xf32>
    %823 = arith.addf %821, %822 : vector<8x64xf32>
    %c4_i32_240 = arith.constant 4 : i32
    %c8_i32_241 = arith.constant 8 : i32
    %824 = arith.muli %c4_i32_240, %c8_i32_241 : i32
    %825 = tpu.assume_multiple %824, 8 : i32
    %826 = arith.index_cast %825 : i32 to index
    %c0_242 = arith.constant 0 : index
    %827 = vector.load %arg24[%826, %c0_242] : memref<64x192xf32, #tpu.memory_space<vmem>>, vector<8x192xf32>
    %cst_243 = arith.constant dense<0.000000e+00> : vector<8x192xf32>
    %828 = tpu.matmul %823, %715, %cst_243 {dimension_numbers = #tpu.dot_dimension_numbers<[1], [0], [0], [1], [0, 0, 1, 1], [], []>} : vector<8x64xf32>, vector<64x192xf32>, vector<8x192xf32> -> vector<8x192xf32>
    %829 = vector.extract_strided_slice %827 {offsets = [0, 0], sizes = [8, 128], strides = [1, 1]} : vector<8x192xf32> to vector<8x128xf32>
    %830 = vector.extract_strided_slice %828 {offsets = [0, 0], sizes = [8, 128], strides = [1, 1]} : vector<8x192xf32> to vector<8x128xf32>
    %831 = arith.addf %829, %830 : vector<8x128xf32>
    %832 = arith.negf %831 : vector<8x128xf32>
    %833 = math.exp %832 : vector<8x128xf32>
    %cst_244 = arith.constant 1.000000e+00 : f32
    %834 = vector.broadcast %cst_244 : f32 to vector<8x128xf32>
    %835 = arith.addf %834, %833 : vector<8x128xf32>
    %836 = arith.divf %834, %835 : vector<8x128xf32>
    %837 = vector.extract_strided_slice %836 {offsets = [0, 0], sizes = [8, 64], strides = [1, 1]} : vector<8x128xf32> to vector<8x64xf32>
    %838 = vector.extract_strided_slice %836 {offsets = [0, 64], sizes = [8, 64], strides = [1, 1]} : vector<8x128xf32> to vector<8x64xf32>
    %839 = vector.extract_strided_slice %827 {offsets = [0, 128], sizes = [8, 64], strides = [1, 1]} : vector<8x192xf32> to vector<8x64xf32>
    %840 = vector.extract_strided_slice %828 {offsets = [0, 128], sizes = [8, 64], strides = [1, 1]} : vector<8x192xf32> to vector<8x64xf32>
    %841 = arith.addf %840, %718 : vector<8x64xf32>
    %842 = arith.mulf %837, %841 : vector<8x64xf32>
    %843 = arith.addf %839, %842 : vector<8x64xf32>
    %844 = math.tanh %843 : vector<8x64xf32>
    %cst_245 = arith.constant 1.000000e+00 : f32
    %845 = vector.broadcast %cst_245 : f32 to vector<8x64xf32>
    %846 = arith.subf %845, %838 : vector<8x64xf32>
    %847 = arith.mulf %846, %844 : vector<8x64xf32>
    %848 = arith.mulf %838, %823 : vector<8x64xf32>
    %849 = arith.addf %847, %848 : vector<8x64xf32>
    %c5_i32_246 = arith.constant 5 : i32
    %c8_i32_247 = arith.constant 8 : i32
    %850 = arith.muli %c5_i32_246, %c8_i32_247 : i32
    %851 = tpu.assume_multiple %850, 8 : i32
    %852 = arith.index_cast %851 : i32 to index
    %c0_248 = arith.constant 0 : index
    %853 = vector.load %arg24[%852, %c0_248] : memref<64x192xf32, #tpu.memory_space<vmem>>, vector<8x192xf32>
    %cst_249 = arith.constant dense<0.000000e+00> : vector<8x192xf32>
    %854 = tpu.matmul %849, %715, %cst_249 {dimension_numbers = #tpu.dot_dimension_numbers<[1], [0], [0], [1], [0, 0, 1, 1], [], []>} : vector<8x64xf32>, vector<64x192xf32>, vector<8x192xf32> -> vector<8x192xf32>
    %855 = vector.extract_strided_slice %853 {offsets = [0, 0], sizes = [8, 128], strides = [1, 1]} : vector<8x192xf32> to vector<8x128xf32>
    %856 = vector.extract_strided_slice %854 {offsets = [0, 0], sizes = [8, 128], strides = [1, 1]} : vector<8x192xf32> to vector<8x128xf32>
    %857 = arith.addf %855, %856 : vector<8x128xf32>
    %858 = arith.negf %857 : vector<8x128xf32>
    %859 = math.exp %858 : vector<8x128xf32>
    %cst_250 = arith.constant 1.000000e+00 : f32
    %860 = vector.broadcast %cst_250 : f32 to vector<8x128xf32>
    %861 = arith.addf %860, %859 : vector<8x128xf32>
    %862 = arith.divf %860, %861 : vector<8x128xf32>
    %863 = vector.extract_strided_slice %862 {offsets = [0, 0], sizes = [8, 64], strides = [1, 1]} : vector<8x128xf32> to vector<8x64xf32>
    %864 = vector.extract_strided_slice %862 {offsets = [0, 64], sizes = [8, 64], strides = [1, 1]} : vector<8x128xf32> to vector<8x64xf32>
    %865 = vector.extract_strided_slice %853 {offsets = [0, 128], sizes = [8, 64], strides = [1, 1]} : vector<8x192xf32> to vector<8x64xf32>
    %866 = vector.extract_strided_slice %854 {offsets = [0, 128], sizes = [8, 64], strides = [1, 1]} : vector<8x192xf32> to vector<8x64xf32>
    %867 = arith.addf %866, %718 : vector<8x64xf32>
    %868 = arith.mulf %863, %867 : vector<8x64xf32>
    %869 = arith.addf %865, %868 : vector<8x64xf32>
    %870 = math.tanh %869 : vector<8x64xf32>
    %cst_251 = arith.constant 1.000000e+00 : f32
    %871 = vector.broadcast %cst_251 : f32 to vector<8x64xf32>
    %872 = arith.subf %871, %864 : vector<8x64xf32>
    %873 = arith.mulf %872, %870 : vector<8x64xf32>
    %874 = arith.mulf %864, %849 : vector<8x64xf32>
    %875 = arith.addf %873, %874 : vector<8x64xf32>
    %c6_i32_252 = arith.constant 6 : i32
    %c8_i32_253 = arith.constant 8 : i32
    %876 = arith.muli %c6_i32_252, %c8_i32_253 : i32
    %877 = tpu.assume_multiple %876, 8 : i32
    %878 = arith.index_cast %877 : i32 to index
    %c0_254 = arith.constant 0 : index
    %879 = vector.load %arg24[%878, %c0_254] : memref<64x192xf32, #tpu.memory_space<vmem>>, vector<8x192xf32>
    %cst_255 = arith.constant dense<0.000000e+00> : vector<8x192xf32>
    %880 = tpu.matmul %875, %715, %cst_255 {dimension_numbers = #tpu.dot_dimension_numbers<[1], [0], [0], [1], [0, 0, 1, 1], [], []>} : vector<8x64xf32>, vector<64x192xf32>, vector<8x192xf32> -> vector<8x192xf32>
    %881 = vector.extract_strided_slice %879 {offsets = [0, 0], sizes = [8, 128], strides = [1, 1]} : vector<8x192xf32> to vector<8x128xf32>
    %882 = vector.extract_strided_slice %880 {offsets = [0, 0], sizes = [8, 128], strides = [1, 1]} : vector<8x192xf32> to vector<8x128xf32>
    %883 = arith.addf %881, %882 : vector<8x128xf32>
    %884 = arith.negf %883 : vector<8x128xf32>
    %885 = math.exp %884 : vector<8x128xf32>
    %cst_256 = arith.constant 1.000000e+00 : f32
    %886 = vector.broadcast %cst_256 : f32 to vector<8x128xf32>
    %887 = arith.addf %886, %885 : vector<8x128xf32>
    %888 = arith.divf %886, %887 : vector<8x128xf32>
    %889 = vector.extract_strided_slice %888 {offsets = [0, 0], sizes = [8, 64], strides = [1, 1]} : vector<8x128xf32> to vector<8x64xf32>
    %890 = vector.extract_strided_slice %888 {offsets = [0, 64], sizes = [8, 64], strides = [1, 1]} : vector<8x128xf32> to vector<8x64xf32>
    %891 = vector.extract_strided_slice %879 {offsets = [0, 128], sizes = [8, 64], strides = [1, 1]} : vector<8x192xf32> to vector<8x64xf32>
    %892 = vector.extract_strided_slice %880 {offsets = [0, 128], sizes = [8, 64], strides = [1, 1]} : vector<8x192xf32> to vector<8x64xf32>
    %893 = arith.addf %892, %718 : vector<8x64xf32>
    %894 = arith.mulf %889, %893 : vector<8x64xf32>
    %895 = arith.addf %891, %894 : vector<8x64xf32>
    %896 = math.tanh %895 : vector<8x64xf32>
    %cst_257 = arith.constant 1.000000e+00 : f32
    %897 = vector.broadcast %cst_257 : f32 to vector<8x64xf32>
    %898 = arith.subf %897, %890 : vector<8x64xf32>
    %899 = arith.mulf %898, %896 : vector<8x64xf32>
    %900 = arith.mulf %890, %875 : vector<8x64xf32>
    %901 = arith.addf %899, %900 : vector<8x64xf32>
    %c7_i32_258 = arith.constant 7 : i32
    %c8_i32_259 = arith.constant 8 : i32
    %902 = arith.muli %c7_i32_258, %c8_i32_259 : i32
    %903 = tpu.assume_multiple %902, 8 : i32
    %904 = arith.index_cast %903 : i32 to index
    %c0_260 = arith.constant 0 : index
    %905 = vector.load %arg24[%904, %c0_260] : memref<64x192xf32, #tpu.memory_space<vmem>>, vector<8x192xf32>
    %cst_261 = arith.constant dense<0.000000e+00> : vector<8x192xf32>
    %906 = tpu.matmul %901, %715, %cst_261 {dimension_numbers = #tpu.dot_dimension_numbers<[1], [0], [0], [1], [0, 0, 1, 1], [], []>} : vector<8x64xf32>, vector<64x192xf32>, vector<8x192xf32> -> vector<8x192xf32>
    %907 = vector.extract_strided_slice %905 {offsets = [0, 0], sizes = [8, 128], strides = [1, 1]} : vector<8x192xf32> to vector<8x128xf32>
    %908 = vector.extract_strided_slice %906 {offsets = [0, 0], sizes = [8, 128], strides = [1, 1]} : vector<8x192xf32> to vector<8x128xf32>
    %909 = arith.addf %907, %908 : vector<8x128xf32>
    %910 = arith.negf %909 : vector<8x128xf32>
    %911 = math.exp %910 : vector<8x128xf32>
    %cst_262 = arith.constant 1.000000e+00 : f32
    %912 = vector.broadcast %cst_262 : f32 to vector<8x128xf32>
    %913 = arith.addf %912, %911 : vector<8x128xf32>
    %914 = arith.divf %912, %913 : vector<8x128xf32>
    %915 = vector.extract_strided_slice %914 {offsets = [0, 0], sizes = [8, 64], strides = [1, 1]} : vector<8x128xf32> to vector<8x64xf32>
    %916 = vector.extract_strided_slice %914 {offsets = [0, 64], sizes = [8, 64], strides = [1, 1]} : vector<8x128xf32> to vector<8x64xf32>
    %917 = vector.extract_strided_slice %905 {offsets = [0, 128], sizes = [8, 64], strides = [1, 1]} : vector<8x192xf32> to vector<8x64xf32>
    %918 = vector.extract_strided_slice %906 {offsets = [0, 128], sizes = [8, 64], strides = [1, 1]} : vector<8x192xf32> to vector<8x64xf32>
    %919 = arith.addf %918, %718 : vector<8x64xf32>
    %920 = arith.mulf %915, %919 : vector<8x64xf32>
    %921 = arith.addf %917, %920 : vector<8x64xf32>
    %922 = math.tanh %921 : vector<8x64xf32>
    %cst_263 = arith.constant 1.000000e+00 : f32
    %923 = vector.broadcast %cst_263 : f32 to vector<8x64xf32>
    %924 = arith.subf %923, %916 : vector<8x64xf32>
    %925 = arith.mulf %924, %922 : vector<8x64xf32>
    %926 = arith.mulf %916, %901 : vector<8x64xf32>
    %927 = arith.addf %925, %926 : vector<8x64xf32>
    %c8_i32_264 = arith.constant 8 : i32
    %c0_265 = arith.constant 0 : index
    %c0_266 = arith.constant 0 : index
    %928 = vector.load %arg17[%c0_265, %c0_266] : memref<64x32xf32, #tpu.memory_space<vmem>>, vector<64x32xf32>
    %cst_267 = arith.constant dense<0.000000e+00> : vector<8x32xf32>
    %929 = tpu.matmul %927, %928, %cst_267 {dimension_numbers = #tpu.dot_dimension_numbers<[1], [0], [0], [1], [0, 0, 1, 1], [], []>} : vector<8x64xf32>, vector<64x32xf32>, vector<8x32xf32> -> vector<8x32xf32>
    %c0_268 = arith.constant 0 : index
    %c0_269 = arith.constant 0 : index
    %930 = vector.load %arg18[%c0_268, %c0_269] : memref<1x32xf32, #tpu.memory_space<vmem>>, vector<1x32xf32>
    %931 = vector.broadcast %930 : vector<1x32xf32> to vector<8x32xf32>
    %932 = arith.addf %929, %931 : vector<8x32xf32>
    %cst_270 = arith.constant 0.000000e+00 : f32
    %933 = vector.broadcast %cst_270 : f32 to vector<8x32xf32>
    %934 = arith.maximumf %932, %933 : vector<8x32xf32>
    %c0_271 = arith.constant 0 : index
    %c0_272 = arith.constant 0 : index
    %935 = vector.load %arg19[%c0_271, %c0_272] : memref<32x128xf32, #tpu.memory_space<vmem>>, vector<32x128xf32>
    %cst_273 = arith.constant dense<0.000000e+00> : vector<8x128xf32>
    %936 = tpu.matmul %934, %935, %cst_273 {dimension_numbers = #tpu.dot_dimension_numbers<[1], [0], [0], [1], [0, 0, 1, 1], [], []>} : vector<8x32xf32>, vector<32x128xf32>, vector<8x128xf32> -> vector<8x128xf32>
    %c0_274 = arith.constant 0 : index
    %c0_275 = arith.constant 0 : index
    %937 = vector.load %arg20[%c0_274, %c0_275] : memref<1x128xf32, #tpu.memory_space<vmem>>, vector<1x128xf32>
    %938 = vector.broadcast %937 : vector<1x128xf32> to vector<8x128xf32>
    %939 = arith.addf %936, %938 : vector<8x128xf32>
    %c0_276 = arith.constant 0 : index
    %c0_277 = arith.constant 0 : index
    %940 = vector.load %arg21[%c0_276, %c0_277] : memref<8x128xf32, #tpu.memory_space<vmem>>, vector<8x128xf32>
    tpu.vector_store %arg21[%c0_276, %c0_277], %939 {strides = array<i32>} : memref<8x128xf32, #tpu.memory_space<vmem>>, vector<8x128xf32>,
    return
  }
}

</mosaic_0001>

<bundles_post_ra>
// kernel: gru_gru_forward.1
= control target key start
LH: loop header
LB: loop body
LE: loop exit
PB: predicated region body
PF: predicated region fallthrough
CT: control target
= control target key end

     0   :  { %v5198_v3 = vmov 0.0   ;;  %vm92_vm0 = vcmask 130048   ;;  %v82_v32 = vlaneseq  ;;  %vm231_vm1 = vcmask 523264   ;;  %s5199_s22 = smov 64   ;;  %s6575_s3 = inlined_call_operand.vmem [shape: f32[64,192], index: 3, kind: input, shape index: {}]   ;;  %s6576_s1 = inlined_call_operand.vmem [shape: f32[16,192], index: 1, kind: input, shape index: {}]   ;;  %s6577_s0 = inlined_call_operand.vmem [shape: f32[64,16], index: 0, kind: input, shape index: {}]   ;;  %s6578_s2 = inlined_call_operand.vmem [shape: f32[1,192], index: 2, kind: input, shape index: {}]   ;;  %s6579_s4 = inlined_call_operand.vmem [shape: f32[1,64], index: 4, kind: input, shape index: {}]   ;;  %s6580_s5 = inlined_call_operand.vmem [shape: f32[64,192], index: 5, kind: input, shape index: {}]   ;;  %s6581_s6 = inlined_call_operand.vmem [shape: f32[1,192], index: 6, kind: input, shape index: {}]   ;;  %s6582_s7 = inlined_call_operand.vmem [shape: f32[64,192], index: 7, kind: input, shape index: {}]   ;;  %s6583_s8 = inlined_call_operand.vmem [shape: f32[1,64], index: 8, kind: input, shape index: {}]   ;;  %s6584_s9 = inlined_call_operand.vmem [shape: f32[64,192], index: 9, kind: input, shape index: {}]   ;;  %s6585_s10 = inlined_call_operand.vmem [shape: f32[1,192], index: 10, kind: input, shape index: {}]   ;;  %s6586_s11 = inlined_call_operand.vmem [shape: f32[64,192], index: 11, kind: input, shape index: {}]   ;;  %s6587_s12 = inlined_call_operand.vmem [shape: f32[1,64], index: 12, kind: input, shape index: {}]   ;;  %s6588_s13 = inlined_call_operand.vmem [shape: f32[64,192], index: 13, kind: input, shape index: {}]   ;;  %s6589_s14 = inlined_call_operand.vmem [shape: f32[1,192], index: 14, kind: input, shape index: {}]   ;;  %s6590_s15 = inlined_call_operand.vmem [shape: f32[64,192], index: 15, kind: input, shape index: {}]   ;;  %s6591_s16 = inlined_call_operand.vmem [shape: f32[1,64], index: 16, kind: input, shape index: {}]   ;;  %s6592_s17 = inlined_call_operand.vmem [shape: f32[64,32], index: 17, kind: input, shape index: {}]   ;;  %s6593_s19 = inlined_call_operand.vmem [shape: f32[32,128], index: 19, kind: input, shape index: {}]   ;;  %s6594_s18 = inlined_call_operand.vmem [shape: f32[1,32], index: 18, kind: input, shape index: {}]   ;;  %s6595_s20 = inlined_call_operand.vmem [shape: f32[1,128], index: 20, kind: input, shape index: {}]   ;;  %s6596_s21 = inlined_call_operand.vmem [shape: f32[8,128], index: 21, kind: output, shape index: {}]  }
   0x1   :  { %6601 = sst [smem:[#allocation5_spill]] %s6575_s3  ;;  %181 = vmatprep.mubr.f32.mxu0 %v5198_v3  ;;  %342 = vmatprep.mubr.f32.mxu1 %v5198_v3  ;;  %vm5201_vm2 = vmmov 0   ;;  %vm4190_vm3 = vcmask 261120  }
   0x2   :  { %6602 = sst [smem:[#allocation6_spill]] %s6576_s1  ;;  %s6607_s26 = sld [smem:[#allocation5_spill]]  ;;  %v83_v33 = vshrl.u32 %v82_v32, 7 }
   0x3   :  { %6603 = sst [smem:[#allocation7_spill]] %s6577_s0  ;;  %s6608_s3 = sld [smem:[#allocation6_spill]] }
   0x4   :  { %6604 = sst [smem:[#allocation8_spill]] %s6578_s2  ;;  %s6609_s2 = sld [smem:[#allocation7_spill]]  ;;  %v5423_v34 = vsub.s32 1, %v83_v33  ;;  %v5431_v37 = vsub.s32 0, %v83_v33 }
   0x5   :  { %6605 = sst [smem:[#allocation9_spill]] %s6579_s4  ;;  %s6610_s28 = sld [smem:[#allocation8_spill]] }
   0x6   :  { %6606 = sst [smem:[#allocation10_spill]] %s6580_s5  ;;  %s6611_s30 = sld [smem:[#allocation9_spill]] }
   0x7   :  { %s6612_s23 = sld [smem:[#allocation10_spill]] }
   0x8   :  { %v248_v0 = vld [vmem:[%s6607_s26 + $0x8] sm:$0xff]  ;;  %v250_v1 = vld [vmem:[%s6607_s26 + $0x18] sm:$0xff]  ;;  %v247_v6 = vld [vmem:[%s6607_s26] sm:$0xff] }
   0x9   :  { %v77_v2 = vld [vmem:[%s6608_s3 + $0x8] sm:$0xff]  ;;  %v5323_v4 = vpack.c.bf16 %v250_v1, %v248_v0  ;;  %v79_v5 = vld [vmem:[%s6608_s3 + $0x18] sm:$0xff]  ;;  %v249_v7 = vld [vmem:[%s6607_s26 + $0x10] sm:$0xff] }
   0xa   :  { %v4420_v8 = vpack.c.bf16 %v79_v5, %v77_v2  ;;  %v5334_v9 = vpack.c.bf16 %v249_v7, %v247_v6  ;;  %v76_v10 = vld [vmem:[%s6608_s3] sm:$0xff]  ;;  %v78_v11 = vld [vmem:[%s6608_s3 + $0x10] sm:$0xff]  ;;  %v252_v12 = vld [vmem:[%s6607_s26 + $0x28] sm:$0xff] }
   0xb   :  { %4425 = vmatprep.subr.bf16.mxu1 %v5323_v4  ;;  %v4422_v13 = vpack.c.bf16 %v78_v11, %v76_v10  ;;  %v254_v14 = vld [vmem:[%s6607_s26 + $0x38] sm:$0xff]  ;;  %v251_v15 = vld [vmem:[%s6607_s26 + $0x20] sm:$0xff]  ;;  %v253_v17 = vld [vmem:[%s6607_s26 + $0x30] sm:$0xff] }
   0xc   :  { %4421 = vmatprep.subr.bf16.mxu0 %v4420_v8  ;;  %4427 = vmatpush1.bf16.msra.mxu1 %v5334_v9  ;;  %v5353_v16 = vpack.c.bf16 %v254_v14, %v252_v12  ;;  %v256_v18 = vld [vmem:[%s6607_s26 + $0x48] sm:$0xff]  ;;  %v258_v19 = vld [vmem:[%s6607_s26 + $0x58] sm:$0xff]  ;;  %v68_v20 = vld [vmem:[%s6609_s2] sm:$0xff]  ;;  %v5367_v21 = vpack.c.bf16 %v253_v17, %v251_v15 }
   0xd   :  { %4423 = vmatpush1.bf16.msra.mxu0 %v4422_v13  ;;  %v5369_v22 = vpack.c.bf16 %v258_v19, %v256_v18  ;;  %v255_v23 = vld [vmem:[%s6607_s26 + $0x40] sm:$0xff]  ;;  %v257_v24 = vld [vmem:[%s6607_s26 + $0x50] sm:$0xff]  ;;  %v260_v25 = vld [vmem:[%s6607_s26 + $0x68] sm:$0xff] }
   0xe   :  { %4429 = vmatprep.subr.bf16.mxu1 %v5353_v16  ;;  %v262_v26 = vld [vmem:[%s6607_s26 + $0x78] sm:$0xff]  ;;  %4457 = vmatprep.subr.bf16.mxu0 %v5323_v4  ;;  %v5387_v27 = vpack.c.bf16 %v257_v24, %v255_v23  ;;  %v259_v29 = vld [vmem:[%s6607_s26 + $0x60] sm:$0xff]  ;;  %v261_v30 = vld [vmem:[%s6607_s26 + $0x70] sm:$0xff] }
   0xf   :  { %v5390_v28 = vpack.c.bf16 %v262_v26, %v260_v25  ;;  %v5402_v31 = vpack.c.bf16 %v261_v30, %v259_v29  ;;  %v80_v35 = vld [vmem:[%s6610_s28] sm:$0x3]  ;;  %v69_v55 = vld [vmem:[%s6609_s2 + $0x8] sm:$0xff]  ;;  %v70_v18 = vld [vmem:[%s6609_s2 + $0x10] sm:$0xff] }
  0x10   :  { %4276 = vmatmul.mubr.msk.f32.vlgmr.msra.gmra.mrb[0].mxu0 %vm92_vm0, %v68_v20  ;;  %4431 = vmatpush1.bf16.msra.mxu1 %v5367_v21  ;;  %v5429_v36 = vrot.slane %v80_v35, %v5423_v34  ;;  %v5435_v41 = vrot.slane %v80_v35, %v5431_v37  ;;  %v5442_v49 = vld [vmem:[%s6611_s30] ss:$0 sm:$0xff]  ;;  %v71_v19 = vld [vmem:[%s6609_s2 + $0x18] sm:$0xff]  ;;  %v73_v24 = vld [vmem:[%s6609_s2 + $0x28] sm:$0xff] }
  0x11   :  { %4433 = vmatprep.subr.bf16.mxu1 %v5369_v22  ;;  %187 = vmatprep.mubr.f32.mxu0 %v5198_v3  ;;  %v72_v20 = vld [vmem:[%s6609_s2 + $0x20] sm:$0xff]  ;;  %v74_v25 = vld [vmem:[%s6609_s2 + $0x30] sm:$0xff]  ;;  %v75_v26 = vld [vmem:[%s6609_s2 + $0x38] sm:$0xff] }
  0x12   :  { %4459 = vmatpush1.bf16.msra.mxu0 %v5334_v9 }
  0x13   :  { %4461 = vmatprep.subr.bf16.mxu0 %v5353_v16 }
  0x14   :  { %4435 = vmatpush1.bf16.msra.mxu1 %v5387_v27  ;;  %4277 = vmatmul.mubr.msk.f32.gmra.mrb[2].mxu0 %vm92_vm0, %v69_v55 }
  0x15   :  { %4437 = vmatprep.subr.bf16.mxu1 %v5390_v28  ;;  %193 = vmatprep.mubr.f32.mxu0 %v5198_v3 }
  0x16   :  { %4463 = vmatpush1.bf16.msra.mxu0 %v5367_v21 }
  0x17   :  { %4465 = vmatprep.subr.bf16.mxu0 %v5369_v22 }
  0x18   :  { %4439 = vmatpush1.bf16.msra.mxu1 %v5402_v31  ;;  %4278 = vmatmul.mubr.msk.f32.gmra.mrb[4].mxu0 %vm92_vm0, %v70_v18 }
  0x19   :  { %4441 = vmatprep.subr.bf16.mxu1 %v5323_v4  ;;  %199 = vmatprep.mubr.f32.mxu0 %v5198_v3 }
  0x1a   :  { %4467 = vmatpush1.bf16.msra.mxu0 %v5387_v27 }
  0x1b   :  { %343 = vmatmul.mubr.f32.vlgmr.msra.gmra.mrb[0].mxu1 %v5198_v3  ;;  %4469 = vmatprep.subr.bf16.mxu0 %v5390_v28 }
  0x1c   :  { %4443 = vmatpush1.bf16.msra.mxu1 %v5334_v9  ;;  %444 = vmatprep.mubr.f32.mxu1 %v5198_v3 }
  0x1d   :  { %4445 = vmatprep.subr.bf16.mxu1 %v5353_v16  ;;  %4279 = vmatmul.mubr.msk.f32.gmra.mrb[6].mxu0 %vm92_vm0, %v71_v19 }
  0x1e   :  { %4471 = vmatpush1.bf16.msra.mxu0 %v5402_v31  ;;  %205 = vmatprep.mubr.f32.mxu0 %v5198_v3 }
  0x1f   :  { %4489 = vmatprep.subr.bf16.mxu0 %v5323_v4 }
  0x20   :  { %4447 = vmatpush1.bf16.msra.mxu1 %v5367_v21 }
  0x21   :  { %4449 = vmatprep.subr.bf16.mxu1 %v5369_v22  ;;  %4280 = vmatmul.mubr.msk.f32.gmra.mrb[8].mxu0 %vm92_vm0, %v72_v20 }
  0x22   :  { %211 = vmatprep.mubr.f32.mxu0 %v5198_v3 }
  0x24   :  { %4451 = vmatpush1.bf16.msra.mxu1 %v5387_v27 }
  0x25   :  { %4453 = vmatprep.subr.bf16.mxu1 %v5390_v28  ;;  %4281 = vmatmul.mubr.msk.f32.gmra.mrb[10].mxu0 %vm92_vm0, %v73_v24 }
  0x26   :  { %217 = vmatprep.mubr.f32.mxu0 %v5198_v3 }
  0x28   :  { %4455 = vmatpush1.bf16.msra.mxu1 %v5402_v31 }
  0x29   :  { %4473 = vmatprep.subr.bf16.mxu1 %v5323_v4  ;;  %4282 = vmatmul.mubr.msk.f32.gmra.mrb[12].mxu0 %vm92_vm0, %v74_v25 }
  0x2a   :  { %223 = vmatprep.mubr.f32.mxu0 %v5198_v3 }
  0x2d   :  { %4283 = vmatmul.mubr.msk.f32.gmra.mrb[14].mxu0 %vm92_vm0, %v75_v26 }
  0x2e   :  { %547 = vmatprep.mubr.f32.mxu0 %v5198_v3 }
  0xe3   :  { %v183_v38 = vpop.f32.mrb[0].mxu0 }
  0xe4   :  { %v185_v39 = vpop.f32.mrb[1].mxu0  ;;  %v184_v42 = vadd.f32 %v183_v38, %v5435_v41 }
  0xe5   :  { %v186_v40 = vadd.f32 %v185_v39, %v5429_v36 }
  0xe7   :  { %232 = vst.msk [vmem:[#allocation4 + $0x8] sm:$0xff] %vm231_vm1, %v186_v40  ;;  %v189_v62 = vpop.f32.mrb[2].mxu0 }
  0xe8   :  { %v191_v63 = vpop.f32.mrb[3].mxu0  ;;  %v190_v2 = vadd.f32 %v189_v62, %v5435_v41 }
  0xe9   :  { %v192_v0 = vadd.f32 %v191_v63, %v5429_v36 }
  0xeb   :  { %234 = vst.msk [vmem:[#allocation4 + $0x18] sm:$0xff] %vm231_vm1, %v192_v0  ;;  %v195_v38 = vpop.f32.mrb[4].mxu0 }
  0xec   :  { %v197_v39 = vpop.f32.mrb[5].mxu0 }
  0xed   :  { %v198_v40 = vadd.f32 %v197_v39, %v5429_v36 }
  0xee   :  { %v344_v43 = vpop.f32.mrb[0].mxu1  ;;  %v274_v53 = vld [vmem:[#allocation4 + $0x8] sm:$0xff] }
  0xef   :  { %v349_v44 = vadd.f32 %v344_v43, %v184_v42  ;;  %v346_v45 = vpop.f32.mrb[1].mxu1  ;;  %236 = vst.msk [vmem:[#allocation4 + $0x28] sm:$0xff] %vm231_vm1, %v198_v40 }
  0xf0   :  { %v356_v50 = vadd.f32 %v5442_v49, %v346_v45  ;;  %v5501_v42 = vpop.f32.mrb[6].mxu0 }
  0xf1   :  { %v4285_v46 = vmul.f32 -1.442695, %v349_v44  ;;  %v203_v43 = vpop.f32.mrb[7].mxu0 }
  0xf2   :  { %v377_v15 = vld [vmem:[#allocation4 + $0x18] sm:$0xff]  ;;  %v204_v44 = vadd.f32 %v203_v43, %v5429_v36 }
  0xf3   :  { %5006 = vpow2.f32 %v4285_v46 }
  0xf4   :  { %238 = vst.msk [vmem:[#allocation4 + $0x38] sm:$0xff] %vm231_vm1, %v204_v44  ;;  %v5505_v45 = vpop.f32.mrb[8].mxu0 }
  0xf5   :  { %v209_v46 = vpop.f32.mrb[9].mxu0  ;;  %v208_v44 = vadd.f32 %v5505_v45, %v5435_v41 }
  0xfd   :  { %v5007_v47 = vpop.eup %5006 }
  0xfe   :  { %v353_v48 = vadd.f32 1.0, %v5007_v47  ;;  %v210_v47 = vadd.f32 %v209_v46, %v5429_v36 }
 0x100   :  { %5008 = vrcp.f32 %v353_v48  ;;  %240 = vst.msk [vmem:[#allocation4 + $0x48] sm:$0xff] %vm231_vm1, %v210_v47  ;;  %v5509_v48 = vpop.f32.mrb[10].mxu0 }
 0x10a   :  { %v5009_v51 = vpop.eup %5008 }
 0x10b   :  { %v357_v52 = vmul.f32 %v5009_v51, %v356_v50  ;;  %v360_v57 = vsub.f32 1.0, %v5009_v51  ;;  %v366_v59 = vmul.f32 0.0, %v5009_v51  ;;  %v215_v50 = vpop.f32.mrb[11].mxu0 }
 0x10c   :  { %v216_v51 = vadd.f32 %v215_v50, %v5429_v36 }
 0x10d   :  { %v358_v54 = vadd.f32 %v357_v52, %v274_v53  ;;  %v5513_v52 = vpop.f32.mrb[12].mxu0 }
 0x10e   :  { %242 = vst.msk [vmem:[#allocation4 + $0x58] sm:$0xff] %vm231_vm1, %v216_v51  ;;  %v221_v53 = vpop.f32.mrb[13].mxu0 }
 0x10f   :  { %5010 = vtanh.f32 %v358_v54  ;;  %v222_v54 = vadd.f32 %v221_v53, %v5429_v36  ;;  %v5517_v55 = vpop.f32.mrb[14].mxu0 }
 0x111   :  { %244 = vst.msk [vmem:[#allocation4 + $0x68] sm:$0xff] %vm231_vm1, %v222_v54 }
 0x119   :  { %v5011_v56 = vpop.eup %5010 }
 0x11a   :  { %362 = vrot.lane.b32.xlu0 %v5011_v56, %s5199_s22  ;;  %v227_v56 = vpop.f32.mrb[15].mxu0 }
 0x18c   :  { %v363_v58 = vpop.permute.xlu0 %362 }
 0x18d   :  { %v365_v60 = vmul.f32 %v363_v58, %v360_v57  ;;  %v228_v57 = vadd.f32 %v227_v56, %v5429_v36  ;;  %v196_v36 = vadd.f32 %v195_v38, %v5435_v41 }
 0x18f   :  { %v367_v61 = vadd.f32 %v366_v59, %v365_v60  ;;  %246 = vst.msk [vmem:[#allocation4 + $0x78] sm:$0xff] %vm231_vm1, %v228_v57 }
 0x191   :  { %369 = vrot.lane.b32.xlu0 %v367_v61, %s5199_s22 }
 0x203   :  { %v370_v1 = vpop.permute.xlu0 %369 }
 0x204   :  { %372 = vst.msk [vmem:[#allocation2] sm:$0xff] %vm231_vm1, %v370_v1  ;;  %4286 = vmatmul.mubr.msk.f32.vlgmr.msra.gmra.mrb[2].mxu1 %vm231_vm1, %v370_v1 }
 0x205   :  { %4475 = vmatpush1.bf16.msra.mxu1 %v5334_v9  ;;  %650 = vmatprep.mubr.f32.mxu1 %v5198_v3 }
 0x206   :  { %4477 = vmatprep.subr.bf16.mxu1 %v5353_v16 }
 0x209   :  { %4479 = vmatpush1.bf16.msra.mxu1 %v5367_v21 }
 0x20a   :  { %4481 = vmatprep.subr.bf16.mxu1 %v5369_v22 }
 0x20d   :  { %4483 = vmatpush1.bf16.msra.mxu1 %v5387_v27 }
 0x20e   :  { %4485 = vmatprep.subr.bf16.mxu1 %v5390_v28 }
 0x211   :  { %4487 = vmatpush1.bf16.msra.mxu1 %v5402_v31 }
 0x212   :  { %4505 = vmatprep.subr.bf16.mxu1 %v5323_v4 }
 0x2d7   :  { %v446_v5 = vpop.f32.mrb[2].mxu1 }
 0x2d8   :  { %v451_v6 = vadd.f32 %v446_v5, %v190_v2  ;;  %v448_v7 = vpop.f32.mrb[3].mxu1 }
 0x2d9   :  { %v458_v12 = vadd.f32 %v5442_v49, %v448_v7 }
 0x2da   :  { %v4287_v8 = vmul.f32 -1.442695, %v451_v6  ;;  %v480_v6 = vld [vmem:[#allocation4 + $0x28] sm:$0xff] }
 0x2dc   :  { %5012 = vpow2.f32 %v4287_v8 }
 0x2e6   :  { %v5013_v10 = vpop.eup %5012 }
 0x2e7   :  { %v455_v11 = vadd.f32 1.0, %v5013_v10 }
 0x2e9   :  { %5014 = vrcp.f32 %v455_v11 }
 0x2f3   :  { %v5015_v13 = vpop.eup %5014 }
 0x2f4   :  { %v459_v14 = vmul.f32 %v5015_v13, %v458_v12  ;;  %v462_v29 = vsub.f32 1.0, %v5015_v13  ;;  %v468_v32 = vmul.f32 %v5015_v13, %v367_v61 }
 0x2f6   :  { %v460_v17 = vadd.f32 %v459_v14, %v377_v15 }
 0x2f8   :  { %5016 = vtanh.f32 %v460_v17  ;;  %v202_v17 = vadd.f32 %v5501_v42, %v5435_v41 }
 0x302   :  { %v5017_v23 = vpop.eup %5016 }
 0x303   :  { %464 = vrot.lane.b32.xlu1 %v5017_v23, %s5199_s22 }
 0x375   :  { %v465_v30 = vpop.permute.xlu1 %464 }
 0x376   :  { %v467_v33 = vmul.f32 %v465_v30, %v462_v29 }
 0x378   :  { %v469_v35 = vadd.f32 %v468_v32, %v467_v33  ;;  %v583_v32 = vld [vmem:[#allocation4 + $0x38] sm:$0xff] }
 0x37a   :  { %471 = vrot.lane.b32.xlu1 %v469_v35, %s5199_s22 }
 0x3ec   :  { %v472_v58 = vpop.permute.xlu1 %471 }
 0x3ed   :  { %475 = vst.msk [vmem:[#allocation2 + $0x8] sm:$0xff] %vm231_vm1, %v472_v58  ;;  %4288 = vmatmul.mubr.msk.f32.vlgmr.msra.gmra.mrb[16].mxu0 %vm231_vm1, %v472_v58 }
 0x3ee   :  { %4491 = vmatpush1.bf16.msra.mxu0 %v5334_v9  ;;  %753 = vmatprep.mubr.f32.mxu0 %v5198_v3 }
 0x3ef   :  { %4493 = vmatprep.subr.bf16.mxu0 %v5353_v16 }
 0x3f2   :  { %4495 = vmatpush1.bf16.msra.mxu0 %v5367_v21 }
 0x3f3   :  { %4497 = vmatprep.subr.bf16.mxu0 %v5369_v22 }
 0x3f6   :  { %4499 = vmatpush1.bf16.msra.mxu0 %v5387_v27 }
 0x3f7   :  { %4501 = vmatprep.subr.bf16.mxu0 %v5390_v28 }
 0x3fa   :  { %4503 = vmatpush1.bf16.msra.mxu0 %v5402_v31 }
 0x3fb   :  { %4521 = vmatprep.subr.bf16.mxu0 %v5323_v4 }
 0x4c0   :  { %v549_v59 = vpop.f32.mrb[16].mxu0 }
 0x4c1   :  { %v554_v60 = vadd.f32 %v549_v59, %v196_v36  ;;  %v551_v61 = vpop.f32.mrb[17].mxu0  ;;  %v686_v36 = vld [vmem:[#allocation4 + $0x48] sm:$0xff] }
 0x4c2   :  { %v561_v1 = vadd.f32 %v5442_v49, %v551_v61 }
 0x4c3   :  { %v4289_v62 = vmul.f32 -1.442695, %v554_v60 }
 0x4c5   :  { %5018 = vpow2.f32 %v4289_v62 }
 0x4cf   :  { %v5019_v63 = vpop.eup %5018 }
 0x4d0   :  { %v558_v0 = vadd.f32 1.0, %v5019_v63 }
 0x4d2   :  { %5020 = vrcp.f32 %v558_v0 }
 0x4dc   :  { %v5021_v2 = vpop.eup %5020 }
 0x4dd   :  { %v562_v5 = vmul.f32 %v5021_v2, %v561_v1  ;;  %v565_v10 = vsub.f32 1.0, %v5021_v2  ;;  %v571_v12 = vmul.f32 %v5021_v2, %v469_v35  ;;  %v214_v2 = vadd.f32 %v5509_v48, %v5435_v41 }
 0x4df   :  { %v563_v7 = vadd.f32 %v562_v5, %v480_v6 }
 0x4e1   :  { %5022 = vtanh.f32 %v563_v7 }
 0x4eb   :  { %v5023_v8 = vpop.eup %5022 }
 0x4ec   :  { %567 = vrot.lane.b32.xlu0 %v5023_v8, %s5199_s22 }
 0x55e   :  { %v568_v11 = vpop.permute.xlu0 %567 }
 0x55f   :  { %v570_v13 = vmul.f32 %v568_v11, %v565_v10 }
 0x561   :  { %v572_v14 = vadd.f32 %v571_v12, %v570_v13 }
 0x563   :  { %574 = vrot.lane.b32.xlu1 %v572_v14, %s5199_s22 }
 0x5d5   :  { %v575_v15 = vpop.permute.xlu1 %574 }
 0x5d6   :  { %578 = vst.msk [vmem:[#allocation2 + $0x10] sm:$0xff] %vm231_vm1, %v575_v15  ;;  %4290 = vmatmul.mubr.msk.f32.vlgmr.msra.gmra.mrb[4].mxu1 %vm231_vm1, %v575_v15 }
 0x5d7   :  { %4507 = vmatpush1.bf16.msra.mxu1 %v5334_v9  ;;  %856 = vmatprep.mubr.f32.mxu1 %v5198_v3 }
 0x5d8   :  { %4509 = vmatprep.subr.bf16.mxu1 %v5353_v16 }
 0x5db   :  { %4511 = vmatpush1.bf16.msra.mxu1 %v5367_v21 }
 0x5dc   :  { %4513 = vmatprep.subr.bf16.mxu1 %v5369_v22 }
 0x5df   :  { %4515 = vmatpush1.bf16.msra.mxu1 %v5387_v27 }
 0x5e0   :  { %4517 = vmatprep.subr.bf16.mxu1 %v5390_v28 }
 0x5e3   :  { %4519 = vmatpush1.bf16.msra.mxu1 %v5402_v31 }
 0x5e4   :  { %4537 = vmatprep.subr.bf16.mxu1 %v5323_v4 }
 0x6a9   :  { %v652_v18 = vpop.f32.mrb[4].mxu1 }
 0x6aa   :  { %v657_v19 = vadd.f32 %v652_v18, %v202_v17  ;;  %v654_v20 = vpop.f32.mrb[5].mxu1 }
 0x6ab   :  { %v664_v26 = vadd.f32 %v5442_v49, %v654_v20  ;;  %v1104_v20 = vld [vmem:[%s6612_s23 + $0x10] sm:$0xff] }
 0x6ac   :  { %v4291_v23 = vmul.f32 -1.442695, %v657_v19  ;;  %v1102_v19 = vld [vmem:[%s6612_s23] sm:$0xff] }
 0x6ae   :  { %5024 = vpow2.f32 %v4291_v23  ;;  %v1107_v23 = vld [vmem:[%s6612_s23 + $0x28] sm:$0xff] }
 0x6b8   :  { %v5025_v24 = vpop.eup %5024 }
 0x6b9   :  { %v661_v25 = vadd.f32 1.0, %v5025_v24  ;;  %v1109_v24 = vld [vmem:[%s6612_s23 + $0x38] sm:$0xff] }
 0x6bb   :  { %5026 = vrcp.f32 %v661_v25  ;;  %v4554_v25 = vpack.c.bf16 %v1104_v20, %v1102_v19  ;;  %v1284_v20 = vld [vmem:[%s6582_s7 + $0x8] sm:$0xff] }
 0x6c5   :  { %v5027_v29 = vpop.eup %5026 }
 0x6c6   :  { %v665_v30 = vmul.f32 %v5027_v29, %v664_v26  ;;  %v668_v4 = vsub.f32 1.0, %v5027_v29  ;;  %v674_v39 = vmul.f32 %v5027_v29, %v572_v14  ;;  %v4556_v26 = vpack.c.bf16 %v1109_v24, %v1107_v23  ;;  %v1106_v29 = vld [vmem:[%s6612_s23 + $0x20] sm:$0xff]  ;;  %v1286_v23 = vld [vmem:[%s6582_s7 + $0x18] sm:$0xff] }
 0x6c8   :  { %v666_v33 = vadd.f32 %v665_v30, %v583_v32  ;;  %v1108_v30 = vld [vmem:[%s6612_s23 + $0x30] sm:$0xff] }
 0x6ca   :  { %5028 = vtanh.f32 %v666_v33  ;;  %v1111_v33 = vld [vmem:[%s6612_s23 + $0x48] sm:$0xff] }
 0x6d4   :  { %v5029_v35 = vpop.eup %5028 }
 0x6d5   :  { %670 = vrot.lane.b32.xlu0 %v5029_v35, %s5199_s22  ;;  %v1113_v35 = vld [vmem:[%s6612_s23 + $0x58] sm:$0xff] }
 0x747   :  { %v671_v38 = vpop.permute.xlu0 %670 }
 0x748   :  { %v673_v40 = vmul.f32 %v671_v38, %v668_v4  ;;  %v4558_v4 = vpack.c.bf16 %v1108_v30, %v1106_v29  ;;  %v4560_v38 = vpack.c.bf16 %v1113_v35, %v1111_v33  ;;  %v1283_v30 = vld [vmem:[%s6582_s7] sm:$0xff]  ;;  %v1288_v35 = vld [vmem:[%s6582_s7 + $0x28] sm:$0xff] }
 0x74a   :  { %v675_v42 = vadd.f32 %v674_v39, %v673_v40  ;;  %v1110_v39 = vld [vmem:[%s6612_s23 + $0x40] sm:$0xff]  ;;  %v1112_v40 = vld [vmem:[%s6612_s23 + $0x50] sm:$0xff] }
 0x74c   :  { %677 = vrot.lane.b32.xlu1 %v675_v42, %s5199_s22 }
 0x7be   :  { %v678_v43 = vpop.permute.xlu1 %677 }
 0x7bf   :  { %681 = vst.msk [vmem:[#allocation2 + $0x18] sm:$0xff] %vm231_vm1, %v678_v43  ;;  %4292 = vmatmul.mubr.msk.f32.vlgmr.msra.gmra.mrb[18].mxu0 %vm231_vm1, %v678_v43  ;;  %v1117_v43 = vld [vmem:[%s6612_s23 + $0x78] sm:$0xff] }
 0x7c0   :  { %4523 = vmatpush1.bf16.msra.mxu0 %v5334_v9  ;;  %959 = vmatprep.mubr.f32.mxu0 %v5198_v3 }
 0x7c1   :  { %4525 = vmatprep.subr.bf16.mxu0 %v5353_v16 }
 0x7c4   :  { %4527 = vmatpush1.bf16.msra.mxu0 %v5367_v21 }
 0x7c5   :  { %4529 = vmatprep.subr.bf16.mxu0 %v5369_v22 }
 0x7c8   :  { %4531 = vmatpush1.bf16.msra.mxu0 %v5387_v27 }
 0x7c9   :  { %4533 = vmatprep.subr.bf16.mxu0 %v5390_v28 }
 0x7cc   :  { %4535 = vmatpush1.bf16.msra.mxu0 %v5402_v31 }
 0x892   :  { %v755_v46 = vpop.f32.mrb[18].mxu0 }
 0x893   :  { %v760_v47 = vadd.f32 %v755_v46, %v208_v44  ;;  %v757_v50 = vpop.f32.mrb[19].mxu0  ;;  %v4562_v44 = vpack.c.bf16 %v1112_v40, %v1110_v39  ;;  %v1287_v39 = vld [vmem:[%s6582_s7 + $0x20] sm:$0xff]  ;;  %v1289_v40 = vld [vmem:[%s6582_s7 + $0x30] sm:$0xff] }
 0x894   :  { %v767_v56 = vadd.f32 %v5442_v49, %v757_v50  ;;  %v1116_v50 = vld [vmem:[%s6612_s23 + $0x70] sm:$0xff] }
 0x895   :  { %v4293_v51 = vmul.f32 -1.442695, %v760_v47  ;;  %v1114_v47 = vld [vmem:[%s6612_s23 + $0x60] sm:$0xff] }
 0x897   :  { %5030 = vpow2.f32 %v4293_v51  ;;  %v4566_v51 = vpack.c.bf16 %v1116_v50, %v1114_v47  ;;  %v1291_v47 = vld [vmem:[%s6582_s7 + $0x40] sm:$0xff]  ;;  %v1293_v50 = vld [vmem:[%s6582_s7 + $0x50] sm:$0xff] }
 0x8a1   :  { %v5031_v53 = vpop.eup %5030 }
 0x8a2   :  { %v764_v54 = vadd.f32 1.0, %v5031_v53  ;;  %v1094_v53 = vld [vmem:[#allocation2] sm:$0xff] }
 0x8a4   :  { %5032 = vrcp.f32 %v764_v54  ;;  %v1095_v54 = vld [vmem:[#allocation2 + $0x8] sm:$0xff] }
 0x8ae   :  { %v5033_v57 = vpop.eup %5032 }
 0x8af   :  { %v768_v58 = vmul.f32 %v5033_v57, %v767_v56  ;;  %v771_v61 = vsub.f32 1.0, %v5033_v57  ;;  %v777_v62 = vmul.f32 %v5033_v57, %v675_v42  ;;  %v1115_v42 = vld [vmem:[%s6612_s23 + $0x68] sm:$0xff]  ;;  %v1096_v56 = vld [vmem:[#allocation2 + $0x10] sm:$0xff]  ;;  %v1097_v57 = vld [vmem:[#allocation2 + $0x18] sm:$0xff] }
 0x8b0   :  { %v4564_v46 = vpack.c.bf16 %v1117_v43, %v1115_v42  ;;  %v5718_v42 = vpack.c.bf16 %v1289_v40, %v1287_v39  ;;  %v1292_v43 = vld [vmem:[%s6582_s7 + $0x48] sm:$0xff] }
 0x8b1   :  { %v769_v59 = vadd.f32 %v768_v58, %v686_v36 }
 0x8b3   :  { %5034 = vtanh.f32 %v769_v59  ;;  %v220_v59 = vadd.f32 %v5513_v52, %v5435_v41 }
 0x8bd   :  { %v5035_v60 = vpop.eup %5034 }
 0x8be   :  { %773 = vrot.lane.b32.xlu0 %v5035_v60, %s5199_s22 }
 0x930   :  { %v774_v45 = vpop.permute.xlu0 %773 }
 0x931   :  { %v776_v63 = vmul.f32 %v774_v45, %v771_v61 }
 0x933   :  { %v778_v0 = vadd.f32 %v777_v62, %v776_v63  ;;  %v5653_v63 = vld [vmem:[%s6581_s6] sm:$0x3] }
 0x935   :  { %780 = vrot.lane.b32.xlu1 %v778_v0, %s5199_s22 }
 0x9a7   :  { %v781_v1 = vpop.permute.xlu1 %780 }
 0x9a8   :  { %784 = vst.msk [vmem:[#allocation2 + $0x20] sm:$0xff] %vm231_vm1, %v781_v1  ;;  %4294 = vmatmul.mubr.msk.f32.vlgmr.msra.gmra.mrb[6].mxu1 %vm231_vm1, %v781_v1 }
 0x9a9   :  { %4539 = vmatpush1.bf16.msra.mxu1 %v5334_v9  ;;  %1062 = vmatprep.mubr.f32.mxu1 %v5198_v3 }
 0x9aa   :  { %4541 = vmatprep.subr.bf16.mxu1 %v5353_v16 }
 0x9ad   :  { %4543 = vmatpush1.bf16.msra.mxu1 %v5367_v21 }
 0x9ae   :  { %4545 = vmatprep.subr.bf16.mxu1 %v5369_v22 }
 0x9af   :  { %v1098_v58 = vld [vmem:[#allocation2 + $0x20] sm:$0xff] }
 0x9b1   :  { %4547 = vmatpush1.bf16.msra.mxu1 %v5387_v27  ;;  %v789_v27 = vld [vmem:[#allocation4 + $0x58] sm:$0xff] }
 0x9b2   :  { %4549 = vmatprep.subr.bf16.mxu1 %v5390_v28  ;;  %v1103_v28 = vld [vmem:[%s6612_s23 + $0x8] sm:$0xff] }
 0x9b5   :  { %4551 = vmatpush1.bf16.msra.mxu1 %v5402_v31  ;;  %v1105_v31 = vld [vmem:[%s6612_s23 + $0x18] sm:$0xff] }
 0x9b6   :  { %v4552_v48 = vpack.c.bf16 %v1105_v31, %v1103_v28 }
 0x9b8   :  { %4553 = vmatprep.subr.bf16.mxu0 %v4552_v48  ;;  %v892_v48 = vld [vmem:[#allocation4 + $0x68] sm:$0xff] }
 0xa7b   :  { %v858_v5 = vpop.f32.mrb[6].mxu1 }
 0xa7c   :  { %v863_v6 = vadd.f32 %v858_v5, %v214_v2  ;;  %v860_v9 = vpop.f32.mrb[7].mxu1 }
 0xa7d   :  { %v870_v21 = vadd.f32 %v5442_v49, %v860_v9 }
 0xa7e   :  { %v4295_v7 = vmul.f32 -1.442695, %v863_v6 }
 0xa80   :  { %5036 = vpow2.f32 %v4295_v7 }
 0xa8a   :  { %v5037_v8 = vpop.eup %5036 }
 0xa8b   :  { %v867_v16 = vadd.f32 1.0, %v5037_v8 }
 0xa8d   :  { %5038 = vrcp.f32 %v867_v16 }
 0xa97   :  { %v5039_v22 = vpop.eup %5038 }
 0xa98   :  { %v871_v10 = vmul.f32 %v5039_v22, %v870_v21  ;;  %v874_v13 = vsub.f32 1.0, %v5039_v22  ;;  %v880_v15 = vmul.f32 %v5039_v22, %v778_v0  ;;  %v5657_v0 = vrot.slane %v5653_v63, %v5423_v34 }
 0xa9a   :  { %v872_v11 = vadd.f32 %v871_v10, %v789_v27 }
 0xa9c   :  { %5040 = vtanh.f32 %v872_v11 }
 0xaa6   :  { %v5041_v12 = vpop.eup %5040 }
 0xaa7   :  { %876 = vrot.lane.b32.xlu0 %v5041_v12, %s5199_s22 }
 0xb19   :  { %v877_v14 = vpop.permute.xlu0 %876 }
 0xb1a   :  { %v879_v17 = vmul.f32 %v877_v14, %v874_v13 }
 0xb1c   :  { %v5587_v18 = vadd.f32 %v880_v15, %v879_v17 }
 0xb1e   :  { %883 = vrot.lane.b32.xlu1 %v5587_v18, %s5199_s22 }
 0xb90   :  { %v884_v32 = vpop.permute.xlu1 %883 }
 0xb91   :  { %887 = vst.msk [vmem:[#allocation2 + $0x28] sm:$0xff] %vm231_vm1, %v884_v32  ;;  %4296 = vmatmul.mubr.msk.f32.vlgmr.msra.gmra.mrb[20].mxu0 %vm231_vm1, %v884_v32  ;;  %v1285_v32 = vld [vmem:[%s6582_s7 + $0x10] sm:$0xff] }
 0xb92   :  { %4555 = vmatpush1.bf16.msra.mxu0 %v4554_v25  ;;  %1218 = vmatprep.mubr.f32.mxu0 %v5198_v3  ;;  %v5688_v25 = vpack.c.bf16 %v1286_v23, %v1284_v20  ;;  %v5701_v33 = vpack.c.bf16 %v1285_v32, %v1283_v30 }
 0xb93   :  { %4557 = vmatprep.subr.bf16.mxu0 %v4556_v26 }
 0xb94   :  { %4569 = vmatprep.subr.bf16.mxu1 %v5688_v25 }
 0xb96   :  { %4559 = vmatpush1.bf16.msra.mxu0 %v4558_v4  ;;  %v1290_v4 = vld [vmem:[%s6582_s7 + $0x38] sm:$0xff] }
 0xb97   :  { %4561 = vmatprep.subr.bf16.mxu0 %v4560_v38  ;;  %v5710_v38 = vpack.c.bf16 %v1290_v4, %v1288_v35  ;;  %v995_v35 = vld [vmem:[#allocation4 + $0x78] sm:$0xff] }
 0xb98   :  { %v1099_v36 = vld [vmem:[#allocation2 + $0x28] sm:$0xff] }
 0xb9a   :  { %4563 = vmatpush1.bf16.msra.mxu0 %v4562_v44  ;;  %v1294_v44 = vld [vmem:[%s6582_s7 + $0x58] sm:$0xff] }
 0xb9b   :  { %4565 = vmatprep.subr.bf16.mxu0 %v4564_v46  ;;  %v5728_v46 = vpack.c.bf16 %v1294_v44, %v1292_v43 }
 0xb9e   :  { %4567 = vmatpush1.bf16.msra.mxu0 %v4566_v51 }
 0xb9f   :  { %4601 = vmatprep.subr.bf16.mxu0 %v5688_v25 }
 0xba1   :  { %4300 = vmatmul.mubr.msk.f32.vlgmr.msra.gmra.mrb[22].mxu0 %vm231_vm1, %v1094_v53  ;;  %v5736_v53 = vpack.c.bf16 %v1293_v50, %v1291_v47 }
 0xba2   :  { %1224 = vmatprep.mubr.f32.mxu0 %v5198_v3  ;;  %4603 = vmatpush1.bf16.msra.mxu0 %v5701_v33 }
 0xba3   :  { %4605 = vmatprep.subr.bf16.mxu0 %v5710_v38 }
 0xba5   :  { %4301 = vmatmul.mubr.msk.f32.gmra.mrb[24].mxu0 %vm231_vm1, %v1095_v54 }
 0xba6   :  { %1230 = vmatprep.mubr.f32.mxu0 %v5198_v3  ;;  %4607 = vmatpush1.bf16.msra.mxu0 %v5718_v42 }
 0xba7   :  { %4609 = vmatprep.subr.bf16.mxu0 %v5728_v46 }
 0xba9   :  { %4302 = vmatmul.mubr.msk.f32.gmra.mrb[26].mxu0 %vm231_vm1, %v1096_v56 }
 0xbaa   :  { %1236 = vmatprep.mubr.f32.mxu0 %v5198_v3  ;;  %4611 = vmatpush1.bf16.msra.mxu0 %v5736_v53 }
 0xbad   :  { %4303 = vmatmul.mubr.msk.f32.gmra.mrb[28].mxu0 %vm231_vm1, %v1097_v57 }
 0xbae   :  { %1242 = vmatprep.mubr.f32.mxu0 %v5198_v3 }
 0xbb1   :  { %4304 = vmatmul.mubr.msk.f32.gmra.mrb[30].mxu0 %vm231_vm1, %v1098_v58  ;;  %v1296_v58 = vld [vmem:[%s6582_s7 + $0x68] sm:$0xff] }
 0xbb2   :  { %1248 = vmatprep.mubr.f32.mxu0 %v5198_v3 }
 0xbb5   :  { %4305 = vmatmul.mubr.msk.f32.gmra.mrb[32].mxu0 %vm231_vm1, %v1099_v36  ;;  %v1298_v36 = vld [vmem:[%s6582_s7 + $0x78] sm:$0xff] }
 0xbb6   :  { %1254 = vmatprep.mubr.f32.mxu0 %v5198_v3 }
 0xc64   :  { %v961_v60 = vpop.f32.mrb[20].mxu0 }
 0xc65   :  { %v966_v61 = vadd.f32 %v961_v60, %v220_v59  ;;  %v963_v45 = vpop.f32.mrb[21].mxu0  ;;  %v5747_v59 = vpack.c.bf16 %v1298_v36, %v1296_v58  ;;  %v1295_v60 = vld [vmem:[%s6582_s7 + $0x60] sm:$0xff] }
 0xc66   :  { %v973_v10 = vadd.f32 %v5442_v49, %v963_v45 }
 0xc67   :  { %v4297_v62 = vmul.f32 -1.442695, %v966_v61  ;;  %4613 = vmatprep.subr.bf16.mxu0 %v5747_v59 }
 0xc69   :  { %5042 = vpow2.f32 %v4297_v62 }
 0xc73   :  { %v5043_v1 = vpop.eup %5042 }
 0xc74   :  { %v970_v2 = vadd.f32 1.0, %v5043_v1  ;;  %v5659_v5 = vpop.f32.mrb[22].mxu0 }
 0xc75   :  { %v1222_v6 = vpop.f32.mrb[23].mxu0 }
 0xc76   :  { %5044 = vrcp.f32 %v970_v2  ;;  %v1223_v52 = vadd.f32 %v1222_v6, %v5657_v0  ;;  %v226_v2 = vadd.f32 %v5517_v55, %v5435_v41 }
 0xc78   :  { %1268 = vst.msk [vmem:[#allocation4 + $0x8] sm:$0xff] %vm231_vm1, %v1223_v52  ;;  %v5663_v9 = vpop.f32.mrb[24].mxu0 }
 0xc79   :  { %v1228_v7 = vpop.f32.mrb[25].mxu0 }
 0xc7a   :  { %v1229_v8 = vadd.f32 %v1228_v7, %v5657_v0 }
 0xc7c   :  { %1270 = vst.msk [vmem:[#allocation4 + $0x18] sm:$0xff] %vm231_vm1, %v1229_v8  ;;  %v5667_v16 = vpop.f32.mrb[26].mxu0 }
 0xc7d   :  { %v1234_v21 = vpop.f32.mrb[27].mxu0 }
 0xc7e   :  { %v1235_v22 = vadd.f32 %v1234_v21, %v5657_v0 }
 0xc7f   :  { %v1307_v30 = vld [vmem:[#allocation4 + $0x8] sm:$0xff] }
 0xc80   :  { %v5045_v27 = vpop.eup %5044  ;;  %1272 = vst.msk [vmem:[#allocation4 + $0x28] sm:$0xff] %vm231_vm1, %v1235_v22  ;;  %v5672_v11 = vpop.f32.mrb[28].mxu0 }
 0xc81   :  { %v974_v28 = vmul.f32 %v5045_v27, %v973_v10  ;;  %v1240_v31 = vpop.f32.mrb[29].mxu0  ;;  %v977_v51 = vsub.f32 1.0, %v5045_v27  ;;  %v983_v56 = vmul.f32 %v5045_v27, %v5587_v18  ;;  %v1297_v18 = vld [vmem:[%s6582_s7 + $0x70] sm:$0xff]  ;;  %v5794_v27 = vrot.slane %v5653_v63, %v5431_v37 }
 0xc82   :  { %v1241_v12 = vadd.f32 %v1240_v31, %v5657_v0  ;;  %v5757_v45 = vpack.c.bf16 %v1297_v18, %v1295_v60 }
 0xc83   :  { %v975_v13 = vadd.f32 %v974_v28, %v892_v48  ;;  %v1221_v41 = vadd.f32 %v5659_v5, %v5794_v27 }
 0xc84   :  { %1274 = vst.msk [vmem:[#allocation4 + $0x38] sm:$0xff] %vm231_vm1, %v1241_v12  ;;  %v5676_v14 = vpop.f32.mrb[30].mxu0  ;;  %4615 = vmatpush1.bf16.msra.mxu0 %v5757_v45 }
 0xc85   :  { %5046 = vtanh.f32 %v975_v13  ;;  %v1246_v15 = vpop.f32.mrb[31].mxu0  ;;  %4633 = vmatprep.subr.bf16.mxu0 %v5688_v25 }
 0xc86   :  { %v1247_v17 = vadd.f32 %v1246_v15, %v5657_v0 }
 0xc88   :  { %1276 = vst.msk [vmem:[#allocation4 + $0x48] sm:$0xff] %vm231_vm1, %v1247_v17  ;;  %v5680_v19 = vpop.f32.mrb[32].mxu0 }
 0xc89   :  { %v1252_v24 = vpop.f32.mrb[33].mxu0 }
 0xc8a   :  { %v1253_v26 = vadd.f32 %v1252_v24, %v5657_v0  ;;  %v5803_v24 = vld [vmem:[%s6583_s8] ss:$0 sm:$0xff] }
 0xc8c   :  { %1278 = vst.msk [vmem:[#allocation4 + $0x58] sm:$0xff] %vm231_vm1, %v1253_v26 }
 0xc8f   :  { %v5047_v29 = vpop.eup %5046 }
 0xc90   :  { %979 = vrot.lane.b32.xlu0 %v5047_v29, %s5199_s22 }
 0xd02   :  { %v980_v54 = vpop.permute.xlu0 %979 }
 0xd03   :  { %v982_v57 = vmul.f32 %v980_v54, %v977_v51 }
 0xd05   :  { %v5755_v61 = vadd.f32 %v983_v56, %v982_v57 }
 0xd07   :  { %986 = vrot.lane.b32.xlu1 %v5755_v61, %s5199_s22 }
 0xd79   :  { %v987_v62 = vpop.permute.xlu1 %986 }
 0xd7a   :  { %990 = vst.msk [vmem:[#allocation2 + $0x30] sm:$0xff] %vm231_vm1, %v987_v62  ;;  %4298 = vmatmul.mubr.msk.f32.vlgmr.msra.gmra.mrb[8].mxu1 %vm231_vm1, %v987_v62 }
 0xd7b   :  { %4571 = vmatpush1.bf16.msra.mxu1 %v5701_v33  ;;  %1372 = vmatprep.mubr.f32.mxu1 %v5198_v3 }
 0xd7c   :  { %4573 = vmatprep.subr.bf16.mxu1 %v5710_v38 }
 0xd7f   :  { %4575 = vmatpush1.bf16.msra.mxu1 %v5718_v42 }
 0xd80   :  { %4577 = vmatprep.subr.bf16.mxu1 %v5728_v46 }
 0xd81   :  { %v1100_v1 = vld [vmem:[#allocation2 + $0x30] sm:$0xff] }
 0xd82   :  { %4306 = vmatmul.mubr.msk.f32.gmra.mrb[34].mxu0 %vm231_vm1, %v1100_v1 }
 0xd83   :  { %4579 = vmatpush1.bf16.msra.mxu1 %v5736_v53  ;;  %1260 = vmatprep.mubr.f32.mxu0 %v5198_v3 }
 0xd84   :  { %4581 = vmatprep.subr.bf16.mxu1 %v5747_v59 }
 0xd87   :  { %4583 = vmatpush1.bf16.msra.mxu1 %v5757_v45 }
 0xd88   :  { %4585 = vmatprep.subr.bf16.mxu1 %v5688_v25 }
 0xd8a   :  { %1373 = vmatmul.mubr.f32.vlgmr.msra.gmra.mrb[10].mxu1 %v5198_v3 }
 0xd8b   :  { %4587 = vmatpush1.bf16.msra.mxu1 %v5701_v33  ;;  %1471 = vmatprep.mubr.f32.mxu1 %v5198_v3 }
 0xd8c   :  { %4589 = vmatprep.subr.bf16.mxu1 %v5710_v38 }
 0xd8f   :  { %4591 = vmatpush1.bf16.msra.mxu1 %v5718_v42 }
 0xd90   :  { %4593 = vmatprep.subr.bf16.mxu1 %v5728_v46 }
 0xd93   :  { %4595 = vmatpush1.bf16.msra.mxu1 %v5736_v53 }
 0xd94   :  { %4597 = vmatprep.subr.bf16.mxu1 %v5747_v59 }
 0xd97   :  { %4599 = vmatpush1.bf16.msra.mxu1 %v5757_v45 }
 0xd98   :  { %4617 = vmatprep.subr.bf16.mxu1 %v5688_v25 }
 0xe4d   :  { %v1064_v6 = vpop.f32.mrb[8].mxu1 }
 0xe4e   :  { %v1069_v52 = vadd.f32 %v1064_v6, %v226_v2  ;;  %v1066_v7 = vpop.f32.mrb[9].mxu1 }
 0xe4f   :  { %v1076_v15 = vadd.f32 %v5442_v49, %v1066_v7 }
 0xe50   :  { %v4299_v8 = vmul.f32 -1.442695, %v1069_v52 }
 0xe52   :  { %5048 = vpow2.f32 %v4299_v8 }
 0xe55   :  { %v5789_v21 = vpop.f32.mrb[34].mxu0 }
 0xe56   :  { %v1258_v22 = vpop.f32.mrb[35].mxu0 }
 0xe57   :  { %v1259_v10 = vadd.f32 %v1258_v22, %v5657_v0 }
 0xe59   :  { %1280 = vst.msk [vmem:[#allocation4 + $0x68] sm:$0xff] %vm231_vm1, %v1259_v10 }
 0xe5c   :  { %v5049_v28 = vpop.eup %5048 }
 0xe5d   :  { %v1073_v55 = vadd.f32 1.0, %v5049_v28  ;;  %v1374_v31 = vpop.f32.mrb[10].mxu1 }
 0xe5e   :  { %v1379_v48 = vadd.f32 %v1374_v31, %v1221_v41  ;;  %v1376_v12 = vpop.f32.mrb[11].mxu1 }
 0xe5f   :  { %5050 = vrcp.f32 %v1073_v55  ;;  %v1386_v5 = vadd.f32 %v5803_v24, %v1376_v12 }
 0xe60   :  { %v4309_v13 = vmul.f32 -1.442695, %v1379_v48 }
 0xe62   :  { %5052 = vpow2.f32 %v4309_v13 }
 0xe69   :  { %v5051_v17 = vpop.eup %5050 }
 0xe6a   :  { %v1077_v20 = vmul.f32 %v5051_v17, %v1076_v15  ;;  %v1080_v51 = vsub.f32 1.0, %v5051_v17  ;;  %v1086_v56 = vmul.f32 %v5051_v17, %v5755_v61  ;;  %v1227_v61 = vadd.f32 %v5663_v9, %v5794_v27  ;;  %v1404_v9 = vld [vmem:[#allocation4 + $0x18] sm:$0xff] }
 0xe6c   :  { %v5053_v23 = vpop.eup %5052  ;;  %v1078_v4 = vadd.f32 %v1077_v20, %v995_v35 }
 0xe6d   :  { %v1383_v63 = vadd.f32 1.0, %v5053_v23  ;;  %v1233_v23 = vadd.f32 %v5667_v16, %v5794_v27 }
 0xe6f   :  { %5054 = vrcp.f32 %v1383_v63 }
 0xe79   :  { %v5055_v26 = vpop.eup %5054 }
 0xe7a   :  { %v1387_v29 = vmul.f32 %v5055_v26, %v1386_v5  ;;  %v1390_v40 = vsub.f32 1.0, %v5055_v26  ;;  %v1396_v44 = vmul.f32 0.0, %v5055_v26 }
 0xe7c   :  { %v1388_v32 = vadd.f32 %v1387_v29, %v1307_v30 }
 0xe7e   :  { %5056 = vtanh.f32 %v1388_v32 }
 0xe7f   :  { %5058 = vtanh.f32 %v1078_v4 }
 0xe88   :  { %v5057_v49 = vpop.eup %5056 }
 0xe89   :  { %1392 = vrot.lane.b32.xlu0 %v5057_v49, %s5199_s22  ;;  %v5059_v39 = vpop.eup %5058 }
 0xe8d   :  { %1082 = vrot.lane.b32.xlu0 %v5059_v39, %s5199_s22  ;;  %v1504_v39 = vld [vmem:[#allocation4 + $0x28] sm:$0xff] }
 0xefb   :  { %v1393_v43 = vpop.permute.xlu0 %1392 }
 0xefc   :  { %v1395_v47 = vmul.f32 %v1393_v43, %v1390_v40 }
 0xefe   :  { %v1397_v50 = vadd.f32 %v1396_v44, %v1395_v47 }
 0xeff   :  { %v1083_v54 = vpop.permute.xlu0 %1082 }
 0xf00   :  { %v1085_v57 = vmul.f32 %v1083_v54, %v1080_v51  ;;  %1399 = vrot.lane.b32.xlu1 %v1397_v50, %s5199_s22 }
 0xf02   :  { %v1087_v58 = vadd.f32 %v1086_v56, %v1085_v57  ;;  %v1239_v56 = vadd.f32 %v5672_v11, %v5794_v27 }
 0xf04   :  { %1089 = vrot.lane.b32.xlu0 %v1087_v58, %s5199_s22 }
 0xf72   :  { %v1400_v36 = vpop.permute.xlu1 %1399 }
 0xf73   :  { %1402 = vst.msk [vmem:[#allocation3] sm:$0xff] %vm231_vm1, %v1400_v36  ;;  %4310 = vmatmul.mubr.msk.f32.vlgmr.msra.gmra.mrb[12].mxu1 %vm231_vm1, %v1400_v36 }
 0xf74   :  { %4619 = vmatpush1.bf16.msra.mxu1 %v5701_v33  ;;  %1671 = vmatprep.mubr.f32.mxu1 %v5198_v3 }
 0xf75   :  { %4621 = vmatprep.subr.bf16.mxu1 %v5710_v38 }
 0xf76   :  { %v1090_v60 = vpop.permute.xlu0 %1089 }
 0xf77   :  { %1093 = vst.msk [vmem:[#allocation2 + $0x38] sm:$0xff] %vm231_vm1, %v1090_v60 }
 0xf78   :  { %4623 = vmatpush1.bf16.msra.mxu1 %v5718_v42 }
 0xf79   :  { %4625 = vmatprep.subr.bf16.mxu1 %v5728_v46 }
 0xf7c   :  { %4627 = vmatpush1.bf16.msra.mxu1 %v5736_v53 }
 0xf7d   :  { %4629 = vmatprep.subr.bf16.mxu1 %v5747_v59 }
 0xf7e   :  { %v1101_v18 = vld [vmem:[#allocation2 + $0x38] sm:$0xff] }
 0xf7f   :  { %4307 = vmatmul.mubr.msk.f32.gmra.mrb[36].mxu0 %vm231_vm1, %v1101_v18 }
 0xf80   :  { %1571 = vmatprep.mubr.f32.mxu0 %v5198_v3  ;;  %4631 = vmatpush1.bf16.msra.mxu1 %v5757_v45 }
 0xf81   :  { %4649 = vmatprep.subr.bf16.mxu1 %v5688_v25 }
0x1046   :  { %v1473_v62 = vpop.f32.mrb[12].mxu1 }
0x1047   :  { %v1478_v1 = vadd.f32 %v1473_v62, %v1227_v61  ;;  %v1475_v2 = vpop.f32.mrb[13].mxu1 }
0x1048   :  { %v1485_v28 = vadd.f32 %v5803_v24, %v1475_v2 }
0x1049   :  { %v4311_v6 = vmul.f32 -1.442695, %v1478_v1 }
0x104b   :  { %5060 = vpow2.f32 %v4311_v6  ;;  %v1604_v6 = vld [vmem:[#allocation4 + $0x38] sm:$0xff] }
0x1052   :  { %v5827_v52 = vpop.f32.mrb[36].mxu0 }
0x1053   :  { %v1264_v7 = vpop.f32.mrb[37].mxu0 }
0x1054   :  { %v1265_v8 = vadd.f32 %v1264_v7, %v5657_v0 }
0x1055   :  { %v5061_v22 = vpop.eup %5060 }
0x1056   :  { %v1482_v10 = vadd.f32 1.0, %v5061_v22  ;;  %1282 = vst.msk [vmem:[#allocation4 + $0x78] sm:$0xff] %vm231_vm1, %v1265_v8 }
0x1058   :  { %5062 = vrcp.f32 %v1482_v10 }
0x1062   :  { %v5063_v41 = vpop.eup %5062 }
0x1063   :  { %v1486_v55 = vmul.f32 %v5063_v41, %v1485_v28  ;;  %v1489_v12 = vsub.f32 1.0, %v5063_v41  ;;  %v1495_v15 = vmul.f32 %v5063_v41, %v1397_v50 }
0x1065   :  { %v1487_v31 = vadd.f32 %v1486_v55, %v1404_v9  ;;  %v1245_v55 = vadd.f32 %v5676_v14, %v5794_v27 }
0x1067   :  { %5064 = vtanh.f32 %v1487_v31 }
0x1071   :  { %v5065_v48 = vpop.eup %5064 }
0x1072   :  { %1491 = vrot.lane.b32.xlu1 %v5065_v48, %s5199_s22 }
0x10e4   :  { %v1492_v13 = vpop.permute.xlu1 %1491 }
0x10e5   :  { %v1494_v17 = vmul.f32 %v1492_v13, %v1489_v12 }
0x10e7   :  { %v1496_v0 = vadd.f32 %v1495_v15, %v1494_v17 }
0x10e9   :  { %1498 = vrot.lane.b32.xlu1 %v1496_v0, %s5199_s22 }
0x115b   :  { %v1499_v20 = vpop.permute.xlu1 %1498 }
0x115c   :  { %1502 = vst.msk [vmem:[#allocation3 + $0x8] sm:$0xff] %vm231_vm1, %v1499_v20  ;;  %4312 = vmatmul.mubr.msk.f32.vlgmr.msra.gmra.mrb[38].mxu0 %vm231_vm1, %v1499_v20 }
0x115d   :  { %4635 = vmatpush1.bf16.msra.mxu0 %v5701_v33  ;;  %1771 = vmatprep.mubr.f32.mxu0 %v5198_v3 }
0x115e   :  { %4637 = vmatprep.subr.bf16.mxu0 %v5710_v38 }
0x1161   :  { %4639 = vmatpush1.bf16.msra.mxu0 %v5718_v42 }
0x1162   :  { %4641 = vmatprep.subr.bf16.mxu0 %v5728_v46 }
0x1165   :  { %4643 = vmatpush1.bf16.msra.mxu0 %v5736_v53 }
0x1166   :  { %4645 = vmatprep.subr.bf16.mxu0 %v5747_v59 }
0x1169   :  { %4647 = vmatpush1.bf16.msra.mxu0 %v5757_v45 }
0x116a   :  { %4665 = vmatprep.subr.bf16.mxu0 %v5688_v25 }
0x122f   :  { %v1573_v63 = vpop.f32.mrb[38].mxu0 }
0x1230   :  { %v1578_v5 = vadd.f32 %v1573_v63, %v1233_v23  ;;  %v1575_v26 = vpop.f32.mrb[39].mxu0  ;;  %v1704_v23 = vld [vmem:[#allocation4 + $0x48] sm:$0xff] }
0x1231   :  { %v1585_v35 = vadd.f32 %v5803_v24, %v1575_v26 }
0x1232   :  { %v4313_v29 = vmul.f32 -1.442695, %v1578_v5 }
0x1234   :  { %5066 = vpow2.f32 %v4313_v29 }
0x123e   :  { %v5067_v30 = vpop.eup %5066 }
0x123f   :  { %v1582_v32 = vadd.f32 1.0, %v5067_v30 }
0x1241   :  { %5068 = vrcp.f32 %v1582_v32 }
0x124b   :  { %v5069_v4 = vpop.eup %5068 }
0x124c   :  { %v1586_v49 = vmul.f32 %v5069_v4, %v1585_v35  ;;  %v1589_v44 = vsub.f32 1.0, %v5069_v4  ;;  %v1595_v47 = vmul.f32 %v5069_v4, %v1496_v0  ;;  %v1251_v4 = vadd.f32 %v5680_v19, %v5794_v27  ;;  %v2114_v19 = vld [vmem:[%s6584_s9 + $0x18] sm:$0xff] }
0x124e   :  { %v1587_v40 = vadd.f32 %v1586_v49, %v1504_v39 }
0x1250   :  { %5070 = vtanh.f32 %v1587_v40 }
0x125a   :  { %v5071_v43 = vpop.eup %5070 }
0x125b   :  { %1591 = vrot.lane.b32.xlu0 %v5071_v43, %s5199_s22 }
0x12cd   :  { %v1592_v16 = vpop.permute.xlu0 %1591 }
0x12ce   :  { %v1594_v50 = vmul.f32 %v1592_v16, %v1589_v44 }
0x12d0   :  { %v1596_v51 = vadd.f32 %v1595_v47, %v1594_v50 }
0x12d2   :  { %1598 = vrot.lane.b32.xlu1 %v1596_v51, %s5199_s22 }
0x1344   :  { %v1599_v54 = vpop.permute.xlu1 %1598 }
0x1345   :  { %1602 = vst.msk [vmem:[#allocation3 + $0x10] sm:$0xff] %vm231_vm1, %v1599_v54  ;;  %4314 = vmatmul.mubr.msk.f32.vlgmr.msra.gmra.mrb[14].mxu1 %vm231_vm1, %v1599_v54 }
0x1346   :  { %4651 = vmatpush1.bf16.msra.mxu1 %v5701_v33  ;;  %1871 = vmatprep.mubr.f32.mxu1 %v5198_v3 }
0x1347   :  { %4653 = vmatprep.subr.bf16.mxu1 %v5710_v38 }
0x134a   :  { %4655 = vmatpush1.bf16.msra.mxu1 %v5718_v42 }
0x134b   :  { %4657 = vmatprep.subr.bf16.mxu1 %v5728_v46 }
0x134e   :  { %4659 = vmatpush1.bf16.msra.mxu1 %v5736_v53 }
0x134f   :  { %4661 = vmatprep.subr.bf16.mxu1 %v5747_v59 }
0x1352   :  { %4663 = vmatpush1.bf16.msra.mxu1 %v5757_v45 }
0x1353   :  { %4681 = vmatprep.subr.bf16.mxu1 %v5688_v25 }
0x1418   :  { %v1673_v57 = vpop.f32.mrb[14].mxu1 }
0x1419   :  { %v1678_v58 = vadd.f32 %v1673_v57, %v1239_v56  ;;  %v1675_v36 = vpop.f32.mrb[15].mxu1 }
0x141a   :  { %v1685_v62 = vadd.f32 %v5803_v24, %v1675_v36  ;;  %v2113_v36 = vld [vmem:[%s6584_s9 + $0x10] sm:$0xff] }
0x141b   :  { %v4315_v60 = vmul.f32 -1.442695, %v1678_v58  ;;  %v2111_v58 = vld [vmem:[%s6584_s9] sm:$0xff] }
0x141d   :  { %5072 = vpow2.f32 %v4315_v60  ;;  %v2116_v60 = vld [vmem:[%s6584_s9 + $0x28] sm:$0xff] }
0x1427   :  { %v5073_v18 = vpop.eup %5072 }
0x1428   :  { %v1682_v61 = vadd.f32 1.0, %v5073_v18  ;;  %v2118_v18 = vld [vmem:[%s6584_s9 + $0x38] sm:$0xff] }
0x142a   :  { %5074 = vrcp.f32 %v1682_v61  ;;  %v4698_v61 = vpack.c.bf16 %v2113_v36, %v2111_v58  ;;  %v2293_v36 = vld [vmem:[%s6586_s11 + $0x8] sm:$0xff] }
0x1434   :  { %v5075_v1 = vpop.eup %5074 }
0x1435   :  { %v1686_v2 = vmul.f32 %v5075_v1, %v1685_v62  ;;  %v1689_v25 = vsub.f32 1.0, %v5075_v1  ;;  %v1695_v22 = vmul.f32 %v5075_v1, %v1596_v51  ;;  %v4700_v62 = vpack.c.bf16 %v2118_v18, %v2116_v60  ;;  %v2115_v1 = vld [vmem:[%s6584_s9 + $0x20] sm:$0xff]  ;;  %v2295_v60 = vld [vmem:[%s6586_s11 + $0x18] sm:$0xff] }
0x1437   :  { %v1687_v7 = vadd.f32 %v1686_v2, %v1604_v6  ;;  %v2117_v2 = vld [vmem:[%s6584_s9 + $0x30] sm:$0xff] }
0x1439   :  { %5076 = vtanh.f32 %v1687_v7  ;;  %v2120_v7 = vld [vmem:[%s6584_s9 + $0x48] sm:$0xff] }
0x1443   :  { %v5077_v8 = vpop.eup %5076 }
0x1444   :  { %1691 = vrot.lane.b32.xlu0 %v5077_v8, %s5199_s22  ;;  %v2122_v8 = vld [vmem:[%s6584_s9 + $0x58] sm:$0xff] }
0x14b6   :  { %v1692_v11 = vpop.permute.xlu0 %1691 }
0x14b7   :  { %v1694_v10 = vmul.f32 %v1692_v11, %v1689_v25  ;;  %v4702_v25 = vpack.c.bf16 %v2117_v2, %v2115_v1  ;;  %v4704_v11 = vpack.c.bf16 %v2122_v8, %v2120_v7  ;;  %v2292_v2 = vld [vmem:[%s6586_s11] sm:$0xff]  ;;  %v2297_v8 = vld [vmem:[%s6586_s11 + $0x28] sm:$0xff] }
0x14b9   :  { %v1696_v28 = vadd.f32 %v1695_v22, %v1694_v10  ;;  %v2119_v22 = vld [vmem:[%s6584_s9 + $0x40] sm:$0xff]  ;;  %v2121_v10 = vld [vmem:[%s6584_s9 + $0x50] sm:$0xff] }
0x14bb   :  { %1698 = vrot.lane.b32.xlu1 %v1696_v28, %s5199_s22 }
0x152d   :  { %v1699_v41 = vpop.permute.xlu1 %1698 }
0x152e   :  { %1702 = vst.msk [vmem:[#allocation3 + $0x18] sm:$0xff] %vm231_vm1, %v1699_v41  ;;  %4316 = vmatmul.mubr.msk.f32.vlgmr.msra.gmra.mrb[40].mxu0 %vm231_vm1, %v1699_v41  ;;  %v2126_v41 = vld [vmem:[%s6584_s9 + $0x78] sm:$0xff] }
0x152f   :  { %4667 = vmatpush1.bf16.msra.mxu0 %v5701_v33  ;;  %1971 = vmatprep.mubr.f32.mxu0 %v5198_v3 }
0x1530   :  { %4669 = vmatprep.subr.bf16.mxu0 %v5710_v38 }
0x1533   :  { %4671 = vmatpush1.bf16.msra.mxu0 %v5718_v42 }
0x1534   :  { %4673 = vmatprep.subr.bf16.mxu0 %v5728_v46 }
0x1537   :  { %4675 = vmatpush1.bf16.msra.mxu0 %v5736_v53 }
0x1538   :  { %4677 = vmatprep.subr.bf16.mxu0 %v5747_v59 }
0x153b   :  { %4679 = vmatpush1.bf16.msra.mxu0 %v5757_v45 }
0x1601   :  { %v1773_v9 = vpop.f32.mrb[40].mxu0 }
0x1602   :  { %v1778_v31 = vadd.f32 %v1773_v9, %v1245_v55  ;;  %v1775_v48 = vpop.f32.mrb[41].mxu0  ;;  %v4706_v55 = vpack.c.bf16 %v2121_v10, %v2119_v22  ;;  %v2296_v22 = vld [vmem:[%s6586_s11 + $0x20] sm:$0xff]  ;;  %v2298_v10 = vld [vmem:[%s6586_s11 + $0x30] sm:$0xff] }
0x1603   :  { %v1785_v17 = vadd.f32 %v5803_v24, %v1775_v48  ;;  %v2125_v48 = vld [vmem:[%s6584_s9 + $0x70] sm:$0xff] }
0x1604   :  { %v4317_v12 = vmul.f32 -1.442695, %v1778_v31  ;;  %v2123_v31 = vld [vmem:[%s6584_s9 + $0x60] sm:$0xff] }
0x1606   :  { %5078 = vpow2.f32 %v4317_v12  ;;  %v4710_v12 = vpack.c.bf16 %v2125_v48, %v2123_v31  ;;  %v2300_v31 = vld [vmem:[%s6586_s11 + $0x40] sm:$0xff]  ;;  %v2302_v48 = vld [vmem:[%s6586_s11 + $0x50] sm:$0xff] }
0x1610   :  { %v5079_v13 = vpop.eup %5078 }
0x1611   :  { %v1782_v15 = vadd.f32 1.0, %v5079_v13  ;;  %v2103_v13 = vld [vmem:[#allocation3] sm:$0xff] }
0x1613   :  { %5080 = vrcp.f32 %v1782_v15  ;;  %v2104_v15 = vld [vmem:[#allocation3 + $0x8] sm:$0xff] }
0x161d   :  { %v5081_v0 = vpop.eup %5080 }
0x161e   :  { %v1786_v20 = vmul.f32 %v5081_v0, %v1785_v17  ;;  %v1789_v26 = vsub.f32 1.0, %v5081_v0  ;;  %v1795_v29 = vmul.f32 %v5081_v0, %v1696_v28  ;;  %v2124_v28 = vld [vmem:[%s6584_s9 + $0x68] sm:$0xff]  ;;  %v2105_v17 = vld [vmem:[#allocation3 + $0x10] sm:$0xff]  ;;  %v2106_v0 = vld [vmem:[#allocation3 + $0x18] sm:$0xff] }
0x161f   :  { %v4708_v9 = vpack.c.bf16 %v2126_v41, %v2124_v28  ;;  %v6032_v28 = vpack.c.bf16 %v2298_v10, %v2296_v22  ;;  %v2301_v41 = vld [vmem:[%s6586_s11 + $0x48] sm:$0xff] }
0x1620   :  { %v1787_v63 = vadd.f32 %v1786_v20, %v1704_v23 }
0x1622   :  { %5082 = vtanh.f32 %v1787_v63  ;;  %v1257_v63 = vadd.f32 %v5789_v21, %v5794_v27 }
0x162c   :  { %v5083_v5 = vpop.eup %5082 }
0x162d   :  { %1791 = vrot.lane.b32.xlu0 %v5083_v5, %s5199_s22 }
0x169f   :  { %v1792_v14 = vpop.permute.xlu0 %1791 }
0x16a0   :  { %v1794_v30 = vmul.f32 %v1792_v14, %v1789_v26 }
0x16a2   :  { %v1796_v32 = vadd.f32 %v1795_v29, %v1794_v30  ;;  %v5967_v30 = vld [vmem:[%s6585_s10] sm:$0x3] }
0x16a4   :  { %1798 = vrot.lane.b32.xlu1 %v1796_v32, %s5199_s22 }
0x1716   :  { %v1799_v35 = vpop.permute.xlu1 %1798 }
0x1717   :  { %1802 = vst.msk [vmem:[#allocation3 + $0x20] sm:$0xff] %vm231_vm1, %v1799_v35  ;;  %4318 = vmatmul.mubr.msk.f32.vlgmr.msra.gmra.mrb[16].mxu1 %vm231_vm1, %v1799_v35 }
0x1718   :  { %4683 = vmatpush1.bf16.msra.mxu1 %v5701_v33  ;;  %2071 = vmatprep.mubr.f32.mxu1 %v5198_v3 }
0x1719   :  { %4685 = vmatprep.subr.bf16.mxu1 %v5710_v38 }
0x171c   :  { %4687 = vmatpush1.bf16.msra.mxu1 %v5718_v42 }
0x171d   :  { %4689 = vmatprep.subr.bf16.mxu1 %v5728_v46 }
0x171e   :  { %v2107_v20 = vld [vmem:[#allocation3 + $0x20] sm:$0xff] }
0x1720   :  { %4691 = vmatpush1.bf16.msra.mxu1 %v5736_v53  ;;  %v1804_v53 = vld [vmem:[#allocation4 + $0x58] sm:$0xff] }
0x1721   :  { %4693 = vmatprep.subr.bf16.mxu1 %v5747_v59  ;;  %v2112_v59 = vld [vmem:[%s6584_s9 + $0x8] sm:$0xff] }
0x1724   :  { %4695 = vmatpush1.bf16.msra.mxu1 %v5757_v45  ;;  %v4696_v45 = vpack.c.bf16 %v2114_v19, %v2112_v59 }
0x1726   :  { %4697 = vmatprep.subr.bf16.mxu0 %v4696_v45  ;;  %v1904_v45 = vld [vmem:[#allocation4 + $0x68] sm:$0xff] }
0x17ea   :  { %v1873_v49 = vpop.f32.mrb[16].mxu1 }
0x17eb   :  { %v1878_v39 = vadd.f32 %v1873_v49, %v1251_v4  ;;  %v1875_v33 = vpop.f32.mrb[17].mxu1 }
0x17ec   :  { %v1885_v42 = vadd.f32 %v5803_v24, %v1875_v33 }
0x17ed   :  { %v4319_v40 = vmul.f32 -1.442695, %v1878_v39 }
0x17ef   :  { %5084 = vpow2.f32 %v4319_v40 }
0x17f9   :  { %v5085_v43 = vpop.eup %5084 }
0x17fa   :  { %v1882_v38 = vadd.f32 1.0, %v5085_v43 }
0x17fc   :  { %5086 = vrcp.f32 %v1882_v38 }
0x1806   :  { %v5087_v46 = vpop.eup %5086 }
0x1807   :  { %v1886_v44 = vmul.f32 %v5087_v46, %v1885_v42  ;;  %v1889_v50 = vsub.f32 1.0, %v5087_v46  ;;  %v1895_v54 = vmul.f32 %v5087_v46, %v1796_v32  ;;  %v5971_v32 = vrot.slane %v5967_v30, %v5423_v34 }
0x1809   :  { %v1887_v16 = vadd.f32 %v1886_v44, %v1804_v53 }
0x180b   :  { %5088 = vtanh.f32 %v1887_v16 }
0x1815   :  { %v5089_v47 = vpop.eup %5088 }
0x1816   :  { %1891 = vrot.lane.b32.xlu0 %v5089_v47, %s5199_s22 }
0x1888   :  { %v1892_v51 = vpop.permute.xlu0 %1891 }
0x1889   :  { %v1894_v56 = vmul.f32 %v1892_v51, %v1889_v50 }
0x188b   :  { %v5901_v57 = vadd.f32 %v1895_v54, %v1894_v56 }
0x188d   :  { %1898 = vrot.lane.b32.xlu1 %v5901_v57, %s5199_s22 }
0x18ff   :  { %v1899_v6 = vpop.permute.xlu1 %1898 }
0x1900   :  { %1902 = vst.msk [vmem:[#allocation3 + $0x28] sm:$0xff] %vm231_vm1, %v1899_v6  ;;  %4320 = vmatmul.mubr.msk.f32.vlgmr.msra.gmra.mrb[42].mxu0 %vm231_vm1, %v1899_v6  ;;  %v2294_v6 = vld [vmem:[%s6586_s11 + $0x10] sm:$0xff] }
0x1901   :  { %4699 = vmatpush1.bf16.msra.mxu0 %v4698_v61  ;;  %2227 = vmatprep.mubr.f32.mxu0 %v5198_v3  ;;  %v6002_v61 = vpack.c.bf16 %v2295_v60, %v2293_v36  ;;  %v6015_v7 = vpack.c.bf16 %v2294_v6, %v2292_v2 }
0x1902   :  { %4701 = vmatprep.subr.bf16.mxu0 %v4700_v62 }
0x1903   :  { %4713 = vmatprep.subr.bf16.mxu1 %v6002_v61 }
0x1905   :  { %4703 = vmatpush1.bf16.msra.mxu0 %v4702_v25  ;;  %v2299_v25 = vld [vmem:[%s6586_s11 + $0x38] sm:$0xff] }
0x1906   :  { %4705 = vmatprep.subr.bf16.mxu0 %v4704_v11  ;;  %v6024_v11 = vpack.c.bf16 %v2299_v25, %v2297_v8  ;;  %v2004_v8 = vld [vmem:[#allocation4 + $0x78] sm:$0xff] }
0x1907   :  { %v2108_v23 = vld [vmem:[#allocation3 + $0x28] sm:$0xff] }
0x1909   :  { %4707 = vmatpush1.bf16.msra.mxu0 %v4706_v55  ;;  %v2303_v55 = vld [vmem:[%s6586_s11 + $0x58] sm:$0xff] }
0x190a   :  { %4709 = vmatprep.subr.bf16.mxu0 %v4708_v9  ;;  %v6042_v9 = vpack.c.bf16 %v2303_v55, %v2301_v41 }
0x190d   :  { %4711 = vmatpush1.bf16.msra.mxu0 %v4710_v12 }
0x190e   :  { %4745 = vmatprep.subr.bf16.mxu0 %v6002_v61 }
0x1910   :  { %4324 = vmatmul.mubr.msk.f32.vlgmr.msra.gmra.mrb[44].mxu0 %vm231_vm1, %v2103_v13  ;;  %v6050_v13 = vpack.c.bf16 %v2302_v48, %v2300_v31 }
0x1911   :  { %2233 = vmatprep.mubr.f32.mxu0 %v5198_v3  ;;  %4747 = vmatpush1.bf16.msra.mxu0 %v6015_v7 }
0x1912   :  { %4749 = vmatprep.subr.bf16.mxu0 %v6024_v11 }
0x1914   :  { %4325 = vmatmul.mubr.msk.f32.gmra.mrb[46].mxu0 %vm231_vm1, %v2104_v15 }
0x1915   :  { %2239 = vmatprep.mubr.f32.mxu0 %v5198_v3  ;;  %4751 = vmatpush1.bf16.msra.mxu0 %v6032_v28 }
0x1916   :  { %4753 = vmatprep.subr.bf16.mxu0 %v6042_v9 }
0x1918   :  { %4326 = vmatmul.mubr.msk.f32.gmra.mrb[48].mxu0 %vm231_vm1, %v2105_v17 }
0x1919   :  { %2245 = vmatprep.mubr.f32.mxu0 %v5198_v3  ;;  %4755 = vmatpush1.bf16.msra.mxu0 %v6050_v13 }
0x191c   :  { %4327 = vmatmul.mubr.msk.f32.gmra.mrb[50].mxu0 %vm231_vm1, %v2106_v0 }
0x191d   :  { %2251 = vmatprep.mubr.f32.mxu0 %v5198_v3 }
0x1920   :  { %4328 = vmatmul.mubr.msk.f32.gmra.mrb[52].mxu0 %vm231_vm1, %v2107_v20  ;;  %v2305_v20 = vld [vmem:[%s6586_s11 + $0x68] sm:$0xff] }
0x1921   :  { %2257 = vmatprep.mubr.f32.mxu0 %v5198_v3 }
0x1924   :  { %4329 = vmatmul.mubr.msk.f32.gmra.mrb[54].mxu0 %vm231_vm1, %v2108_v23  ;;  %v2307_v23 = vld [vmem:[%s6586_s11 + $0x78] sm:$0xff] }
0x1925   :  { %2263 = vmatprep.mubr.f32.mxu0 %v5198_v3 }
0x19d3   :  { %v1973_v5 = vpop.f32.mrb[42].mxu0 }
0x19d4   :  { %v1978_v26 = vadd.f32 %v1973_v5, %v1257_v63  ;;  %v1975_v14 = vpop.f32.mrb[43].mxu0  ;;  %v6061_v63 = vpack.c.bf16 %v2307_v23, %v2305_v20  ;;  %v2304_v5 = vld [vmem:[%s6586_s11 + $0x60] sm:$0xff] }
0x19d5   :  { %v1985_v44 = vadd.f32 %v5803_v24, %v1975_v14 }
0x19d6   :  { %v4321_v29 = vmul.f32 -1.442695, %v1978_v26  ;;  %4757 = vmatprep.subr.bf16.mxu0 %v6061_v63 }
0x19d8   :  { %5090 = vpow2.f32 %v4321_v29 }
0x19e2   :  { %v5091_v35 = vpop.eup %5090 }
0x19e3   :  { %v1982_v4 = vadd.f32 1.0, %v5091_v35  ;;  %v5973_v49 = vpop.f32.mrb[44].mxu0 }
0x19e4   :  { %v2231_v39 = vpop.f32.mrb[45].mxu0 }
0x19e5   :  { %5092 = vrcp.f32 %v1982_v4  ;;  %v2232_v21 = vadd.f32 %v2231_v39, %v5971_v32  ;;  %v1263_v4 = vadd.f32 %v5827_v52, %v5794_v27 }
0x19e7   :  { %2277 = vst.msk [vmem:[#allocation4 + $0x8] sm:$0xff] %vm231_vm1, %v2232_v21  ;;  %v5977_v33 = vpop.f32.mrb[46].mxu0 }
0x19e8   :  { %v2237_v40 = vpop.f32.mrb[47].mxu0 }
0x19e9   :  { %v2238_v43 = vadd.f32 %v2237_v40, %v5971_v32 }
0x19eb   :  { %2279 = vst.msk [vmem:[#allocation4 + $0x18] sm:$0xff] %vm231_vm1, %v2238_v43  ;;  %v5981_v38 = vpop.f32.mrb[48].mxu0 }
0x19ec   :  { %v2243_v42 = vpop.f32.mrb[49].mxu0 }
0x19ed   :  { %v2244_v46 = vadd.f32 %v2243_v42, %v5971_v32 }
0x19ee   :  { %v2316_v2 = vld [vmem:[#allocation4 + $0x8] sm:$0xff] }
0x19ef   :  { %v5093_v53 = vpop.eup %5092  ;;  %2281 = vst.msk [vmem:[#allocation4 + $0x28] sm:$0xff] %vm231_vm1, %v2244_v46  ;;  %v5986_v16 = vpop.f32.mrb[50].mxu0 }
0x19f0   :  { %v1986_v59 = vmul.f32 %v5093_v53, %v1985_v44  ;;  %v2249_v19 = vpop.f32.mrb[51].mxu0  ;;  %v1989_v12 = vsub.f32 1.0, %v5093_v53  ;;  %v1995_v17 = vmul.f32 %v5093_v53, %v5901_v57  ;;  %v2306_v57 = vld [vmem:[%s6586_s11 + $0x70] sm:$0xff]  ;;  %v6108_v53 = vrot.slane %v5967_v30, %v5431_v37 }
0x19f1   :  { %v2250_v47 = vadd.f32 %v2249_v19, %v5971_v32  ;;  %v6071_v14 = vpack.c.bf16 %v2306_v57, %v2304_v5 }
0x19f2   :  { %v1987_v50 = vadd.f32 %v1986_v59, %v1904_v45  ;;  %v2230_v27 = vadd.f32 %v5973_v49, %v6108_v53 }
0x19f3   :  { %2283 = vst.msk [vmem:[#allocation4 + $0x38] sm:$0xff] %vm231_vm1, %v2250_v47  ;;  %v5990_v51 = vpop.f32.mrb[52].mxu0  ;;  %4759 = vmatpush1.bf16.msra.mxu0 %v6071_v14 }
0x19f4   :  { %5094 = vtanh.f32 %v1987_v50  ;;  %v2255_v54 = vpop.f32.mrb[53].mxu0  ;;  %4777 = vmatprep.subr.bf16.mxu0 %v6002_v61 }
0x19f5   :  { %v2256_v56 = vadd.f32 %v2255_v54, %v5971_v32 }
0x19f7   :  { %2285 = vst.msk [vmem:[#allocation4 + $0x48] sm:$0xff] %vm231_vm1, %v2256_v56  ;;  %v5994_v58 = vpop.f32.mrb[54].mxu0 }
0x19f8   :  { %v2261_v18 = vpop.f32.mrb[55].mxu0 }
0x19f9   :  { %v2262_v62 = vadd.f32 %v2261_v18, %v5971_v32  ;;  %v6117_v18 = vld [vmem:[%s6587_s12] ss:$0 sm:$0xff] }
0x19fb   :  { %2287 = vst.msk [vmem:[#allocation4 + $0x58] sm:$0xff] %vm231_vm1, %v2262_v62 }
0x19fe   :  { %v5095_v1 = vpop.eup %5094 }
0x19ff   :  { %1991 = vrot.lane.b32.xlu0 %v5095_v1, %s5199_s22 }
0x1a71   :  { %v1992_v15 = vpop.permute.xlu0 %1991 }
0x1a72   :  { %v1994_v0 = vmul.f32 %v1992_v15, %v1989_v12 }
0x1a74   :  { %v6069_v26 = vadd.f32 %v1995_v17, %v1994_v0 }
0x1a76   :  { %1998 = vrot.lane.b32.xlu1 %v6069_v26, %s5199_s22 }
0x1ae8   :  { %v1999_v29 = vpop.permute.xlu1 %1998 }
0x1ae9   :  { %2002 = vst.msk [vmem:[#allocation3 + $0x30] sm:$0xff] %vm231_vm1, %v1999_v29  ;;  %4322 = vmatmul.mubr.msk.f32.vlgmr.msra.gmra.mrb[18].mxu1 %vm231_vm1, %v1999_v29 }
0x1aea   :  { %4715 = vmatpush1.bf16.msra.mxu1 %v6015_v7  ;;  %2381 = vmatprep.mubr.f32.mxu1 %v5198_v3 }
0x1aeb   :  { %4717 = vmatprep.subr.bf16.mxu1 %v6024_v11 }
0x1aee   :  { %4719 = vmatpush1.bf16.msra.mxu1 %v6032_v28 }
0x1aef   :  { %4721 = vmatprep.subr.bf16.mxu1 %v6042_v9 }
0x1af0   :  { %v2109_v35 = vld [vmem:[#allocation3 + $0x30] sm:$0xff] }
0x1af1   :  { %4330 = vmatmul.mubr.msk.f32.gmra.mrb[56].mxu0 %vm231_vm1, %v2109_v35 }
0x1af2   :  { %4723 = vmatpush1.bf16.msra.mxu1 %v6050_v13  ;;  %2269 = vmatprep.mubr.f32.mxu0 %v5198_v3 }
0x1af3   :  { %4725 = vmatprep.subr.bf16.mxu1 %v6061_v63 }
0x1af6   :  { %4727 = vmatpush1.bf16.msra.mxu1 %v6071_v14 }
0x1af7   :  { %4729 = vmatprep.subr.bf16.mxu1 %v6002_v61 }
0x1af9   :  { %2382 = vmatmul.mubr.f32.vlgmr.msra.gmra.mrb[20].mxu1 %v5198_v3 }
0x1afa   :  { %4731 = vmatpush1.bf16.msra.mxu1 %v6015_v7  ;;  %2480 = vmatprep.mubr.f32.mxu1 %v5198_v3 }
0x1afb   :  { %4733 = vmatprep.subr.bf16.mxu1 %v6024_v11 }
0x1afe   :  { %4735 = vmatpush1.bf16.msra.mxu1 %v6032_v28 }
0x1aff   :  { %4737 = vmatprep.subr.bf16.mxu1 %v6042_v9 }
0x1b02   :  { %4739 = vmatpush1.bf16.msra.mxu1 %v6050_v13 }
0x1b03   :  { %4741 = vmatprep.subr.bf16.mxu1 %v6061_v63 }
0x1b06   :  { %4743 = vmatpush1.bf16.msra.mxu1 %v6071_v14 }
0x1b07   :  { %4761 = vmatprep.subr.bf16.mxu1 %v6002_v61 }
0x1bbc   :  { %v2073_v39 = vpop.f32.mrb[18].mxu1 }
0x1bbd   :  { %v2078_v21 = vadd.f32 %v2073_v39, %v1263_v4  ;;  %v2075_v40 = vpop.f32.mrb[19].mxu1 }
0x1bbe   :  { %v2085_v54 = vadd.f32 %v5803_v24, %v2075_v40 }
0x1bbf   :  { %v4323_v43 = vmul.f32 -1.442695, %v2078_v21 }
0x1bc1   :  { %5096 = vpow2.f32 %v4323_v43 }
0x1bc4   :  { %v6103_v42 = vpop.f32.mrb[56].mxu0 }
0x1bc5   :  { %v2267_v46 = vpop.f32.mrb[57].mxu0 }
0x1bc6   :  { %v2268_v44 = vadd.f32 %v2267_v46, %v5971_v32 }
0x1bc8   :  { %2289 = vst.msk [vmem:[#allocation4 + $0x68] sm:$0xff] %vm231_vm1, %v2268_v44 }
0x1bcb   :  { %v5097_v59 = vpop.eup %5096 }
0x1bcc   :  { %v2082_v52 = vadd.f32 1.0, %v5097_v59  ;;  %v2383_v19 = vpop.f32.mrb[20].mxu1 }
0x1bcd   :  { %v2388_v45 = vadd.f32 %v2383_v19, %v2230_v27  ;;  %v2385_v47 = vpop.f32.mrb[21].mxu1 }
0x1bce   :  { %5098 = vrcp.f32 %v2082_v52  ;;  %v2395_v49 = vadd.f32 %v6117_v18, %v2385_v47 }
0x1bcf   :  { %v4333_v50 = vmul.f32 -1.442695, %v2388_v45 }
0x1bd1   :  { %5100 = vpow2.f32 %v4333_v50 }
0x1bd8   :  { %v5099_v56 = vpop.eup %5098 }
0x1bd9   :  { %v2086_v36 = vmul.f32 %v5099_v56, %v2085_v54  ;;  %v2089_v12 = vsub.f32 1.0, %v5099_v56  ;;  %v2095_v17 = vmul.f32 %v5099_v56, %v6069_v26  ;;  %v2236_v26 = vadd.f32 %v5977_v33, %v6108_v53  ;;  %v2413_v33 = vld [vmem:[#allocation4 + $0x18] sm:$0xff] }
0x1bdb   :  { %v5101_v60 = vpop.eup %5100  ;;  %v2087_v25 = vadd.f32 %v2086_v36, %v2004_v8 }
0x1bdc   :  { %v2392_v30 = vadd.f32 1.0, %v5101_v60  ;;  %v2242_v60 = vadd.f32 %v5981_v38, %v6108_v53 }
0x1bde   :  { %5102 = vrcp.f32 %v2392_v30 }
0x1be8   :  { %v5103_v62 = vpop.eup %5102 }
0x1be9   :  { %v2396_v1 = vmul.f32 %v5103_v62, %v2395_v49  ;;  %v2399_v10 = vsub.f32 1.0, %v5103_v62  ;;  %v2405_v55 = vmul.f32 0.0, %v5103_v62 }
0x1beb   :  { %v2397_v6 = vadd.f32 %v2396_v1, %v2316_v2 }
0x1bed   :  { %5104 = vtanh.f32 %v2397_v6 }
0x1bee   :  { %5106 = vtanh.f32 %v2087_v25 }
0x1bf7   :  { %v5105_v24 = vpop.eup %5104 }
0x1bf8   :  { %2401 = vrot.lane.b32.xlu0 %v5105_v24, %s5199_s22  ;;  %v5107_v22 = vpop.eup %5106 }
0x1bfc   :  { %2091 = vrot.lane.b32.xlu0 %v5107_v22, %s5199_s22  ;;  %v2512_v22 = vld [vmem:[#allocation4 + $0x28] sm:$0xff] }
0x1c6a   :  { %v2402_v41 = vpop.permute.xlu0 %2401 }
0x1c6b   :  { %v2404_v31 = vmul.f32 %v2402_v41, %v2399_v10 }
0x1c6d   :  { %v2406_v48 = vadd.f32 %v2405_v55, %v2404_v31 }
0x1c6e   :  { %v2092_v15 = vpop.permute.xlu0 %2091 }
0x1c6f   :  { %v2094_v0 = vmul.f32 %v2092_v15, %v2089_v12  ;;  %2408 = vrot.lane.b32.xlu1 %v2406_v48, %s5199_s22 }
0x1c71   :  { %v2096_v20 = vadd.f32 %v2095_v17, %v2094_v0  ;;  %v2248_v17 = vadd.f32 %v5986_v16, %v6108_v53 }
0x1c73   :  { %2098 = vrot.lane.b32.xlu0 %v2096_v20, %s5199_s22 }
0x1ce1   :  { %v2409_v23 = vpop.permute.xlu1 %2408 }
0x1ce2   :  { %2411 = vst.msk [vmem:[#allocation2] sm:$0xff] %vm231_vm1, %v2409_v23  ;;  %4334 = vmatmul.mubr.msk.f32.vlgmr.msra.gmra.mrb[22].mxu1 %vm231_vm1, %v2409_v23 }
0x1ce3   :  { %4763 = vmatpush1.bf16.msra.mxu1 %v6015_v7  ;;  %2678 = vmatprep.mubr.f32.mxu1 %v5198_v3 }
0x1ce4   :  { %4765 = vmatprep.subr.bf16.mxu1 %v6024_v11 }
0x1ce5   :  { %v2099_v5 = vpop.permute.xlu0 %2098 }
0x1ce6   :  { %2102 = vst.msk [vmem:[#allocation3 + $0x38] sm:$0xff] %vm231_vm1, %v2099_v5 }
0x1ce7   :  { %4767 = vmatpush1.bf16.msra.mxu1 %v6032_v28 }
0x1ce8   :  { %4769 = vmatprep.subr.bf16.mxu1 %v6042_v9 }
0x1ceb   :  { %4771 = vmatpush1.bf16.msra.mxu1 %v6050_v13 }
0x1cec   :  { %4773 = vmatprep.subr.bf16.mxu1 %v6061_v63 }
0x1ced   :  { %v2110_v57 = vld [vmem:[#allocation3 + $0x38] sm:$0xff] }
0x1cee   :  { %4331 = vmatmul.mubr.msk.f32.gmra.mrb[58].mxu0 %vm231_vm1, %v2110_v57 }
0x1cef   :  { %2579 = vmatprep.mubr.f32.mxu0 %v5198_v3  ;;  %4775 = vmatpush1.bf16.msra.mxu1 %v6071_v14 }
0x1cf0   :  { %4793 = vmatprep.subr.bf16.mxu1 %v6002_v61 }
0x1db5   :  { %v2482_v29 = vpop.f32.mrb[22].mxu1 }
0x1db6   :  { %v2487_v35 = vadd.f32 %v2482_v29, %v2236_v26  ;;  %v2484_v4 = vpop.f32.mrb[23].mxu1 }
0x1db7   :  { %v2494_v59 = vadd.f32 %v6117_v18, %v2484_v4 }
0x1db8   :  { %v4335_v39 = vmul.f32 -1.442695, %v2487_v35 }
0x1dba   :  { %5108 = vpow2.f32 %v4335_v39  ;;  %v2611_v39 = vld [vmem:[#allocation4 + $0x38] sm:$0xff] }
0x1dc1   :  { %v6141_v21 = vpop.f32.mrb[58].mxu0 }
0x1dc2   :  { %v2273_v40 = vpop.f32.mrb[59].mxu0 }
0x1dc3   :  { %v2274_v43 = vadd.f32 %v2273_v40, %v5971_v32 }
0x1dc4   :  { %v5109_v46 = vpop.eup %5108 }
0x1dc5   :  { %v2491_v44 = vadd.f32 1.0, %v5109_v46  ;;  %2291 = vst.msk [vmem:[#allocation4 + $0x78] sm:$0xff] %vm231_vm1, %v2274_v43 }
0x1dc7   :  { %5110 = vrcp.f32 %v2491_v44 }
0x1dd1   :  { %v5111_v27 = vpop.eup %5110 }
0x1dd2   :  { %v2495_v52 = vmul.f32 %v5111_v27, %v2494_v59  ;;  %v2498_v47 = vsub.f32 1.0, %v5111_v27  ;;  %v2504_v54 = vmul.f32 %v5111_v27, %v2406_v48 }
0x1dd4   :  { %v2496_v19 = vadd.f32 %v2495_v52, %v2413_v33  ;;  %v2254_v52 = vadd.f32 %v5990_v51, %v6108_v53 }
0x1dd6   :  { %5112 = vtanh.f32 %v2496_v19 }
0x1de0   :  { %v5113_v45 = vpop.eup %5112 }
0x1de1   :  { %2500 = vrot.lane.b32.xlu1 %v5113_v45, %s5199_s22 }
0x1e53   :  { %v2501_v50 = vpop.permute.xlu1 %2500 }
0x1e54   :  { %v2503_v56 = vmul.f32 %v2501_v50, %v2498_v47 }
0x1e56   :  { %v2505_v32 = vadd.f32 %v2504_v54, %v2503_v56 }
0x1e58   :  { %2507 = vrot.lane.b32.xlu1 %v2505_v32, %s5199_s22 }
0x1eca   :  { %v2508_v36 = vpop.permute.xlu1 %2507 }
0x1ecb   :  { %2510 = vst.msk [vmem:[#allocation2 + $0x8] sm:$0xff] %vm231_vm1, %v2508_v36  ;;  %4336 = vmatmul.mubr.msk.f32.vlgmr.msra.gmra.mrb[60].mxu0 %vm231_vm1, %v2508_v36 }
0x1ecc   :  { %4779 = vmatpush1.bf16.msra.mxu0 %v6015_v7  ;;  %2777 = vmatprep.mubr.f32.mxu0 %v5198_v3 }
0x1ecd   :  { %4781 = vmatprep.subr.bf16.mxu0 %v6024_v11 }
0x1ed0   :  { %4783 = vmatpush1.bf16.msra.mxu0 %v6032_v28 }
0x1ed1   :  { %4785 = vmatprep.subr.bf16.mxu0 %v6042_v9 }
0x1ed4   :  { %4787 = vmatpush1.bf16.msra.mxu0 %v6050_v13 }
0x1ed5   :  { %4789 = vmatprep.subr.bf16.mxu0 %v6061_v63 }
0x1ed8   :  { %4791 = vmatpush1.bf16.msra.mxu0 %v6071_v14 }
0x1ed9   :  { %4809 = vmatprep.subr.bf16.mxu0 %v6002_v61 }
0x1f9e   :  { %v2581_v30 = vpop.f32.mrb[60].mxu0 }
0x1f9f   :  { %v2586_v49 = vadd.f32 %v2581_v30, %v2242_v60  ;;  %v2583_v62 = vpop.f32.mrb[61].mxu0  ;;  %v2710_v60 = vld [vmem:[#allocation4 + $0x48] sm:$0xff] }
0x1fa0   :  { %v2593_v8 = vadd.f32 %v6117_v18, %v2583_v62 }
0x1fa1   :  { %v4337_v1 = vmul.f32 -1.442695, %v2586_v49 }
0x1fa3   :  { %5114 = vpow2.f32 %v4337_v1 }
0x1fad   :  { %v5115_v2 = vpop.eup %5114 }
0x1fae   :  { %v2590_v6 = vadd.f32 1.0, %v5115_v2 }
0x1fb0   :  { %5116 = vrcp.f32 %v2590_v6 }
0x1fba   :  { %v5117_v25 = vpop.eup %5116 }
0x1fbb   :  { %v2594_v24 = vmul.f32 %v5117_v25, %v2593_v8  ;;  %v2597_v55 = vsub.f32 1.0, %v5117_v25  ;;  %v2603_v31 = vmul.f32 %v5117_v25, %v2505_v32  ;;  %v2260_v25 = vadd.f32 %v5994_v58, %v6108_v53  ;;  %v3116_v58 = vld [vmem:[%s6588_s13 + $0x18] sm:$0xff] }
0x1fbd   :  { %v2595_v10 = vadd.f32 %v2594_v24, %v2512_v22 }
0x1fbf   :  { %5118 = vtanh.f32 %v2595_v10 }
0x1fc9   :  { %v5119_v41 = vpop.eup %5118 }
0x1fca   :  { %2599 = vrot.lane.b32.xlu0 %v5119_v41, %s5199_s22 }
0x203c   :  { %v2600_v38 = vpop.permute.xlu0 %2599 }
0x203d   :  { %v2602_v48 = vmul.f32 %v2600_v38, %v2597_v55 }
0x203f   :  { %v2604_v12 = vadd.f32 %v2603_v31, %v2602_v48 }
0x2041   :  { %2606 = vrot.lane.b32.xlu1 %v2604_v12, %s5199_s22 }
0x20b3   :  { %v2607_v15 = vpop.permute.xlu1 %2606 }
0x20b4   :  { %2609 = vst.msk [vmem:[#allocation2 + $0x10] sm:$0xff] %vm231_vm1, %v2607_v15  ;;  %4338 = vmatmul.mubr.msk.f32.vlgmr.msra.gmra.mrb[24].mxu1 %vm231_vm1, %v2607_v15 }
0x20b5   :  { %4795 = vmatpush1.bf16.msra.mxu1 %v6015_v7  ;;  %2876 = vmatprep.mubr.f32.mxu1 %v5198_v3 }
0x20b6   :  { %4797 = vmatprep.subr.bf16.mxu1 %v6024_v11 }
0x20b9   :  { %4799 = vmatpush1.bf16.msra.mxu1 %v6032_v28 }
0x20ba   :  { %4801 = vmatprep.subr.bf16.mxu1 %v6042_v9 }
0x20bd   :  { %4803 = vmatpush1.bf16.msra.mxu1 %v6050_v13 }
0x20be   :  { %4805 = vmatprep.subr.bf16.mxu1 %v6061_v63 }
0x20c1   :  { %4807 = vmatpush1.bf16.msra.mxu1 %v6071_v14 }
0x20c2   :  { %4825 = vmatprep.subr.bf16.mxu1 %v6002_v61 }
0x2187   :  { %v2680_v0 = vpop.f32.mrb[24].mxu1 }
0x2188   :  { %v2685_v20 = vadd.f32 %v2680_v0, %v2248_v17  ;;  %v2682_v23 = vpop.f32.mrb[25].mxu1 }
0x2189   :  { %v2692_v29 = vadd.f32 %v6117_v18, %v2682_v23  ;;  %v3115_v23 = vld [vmem:[%s6588_s13 + $0x10] sm:$0xff] }
0x218a   :  { %v4339_v5 = vmul.f32 -1.442695, %v2685_v20  ;;  %v3113_v20 = vld [vmem:[%s6588_s13] sm:$0xff] }
0x218c   :  { %5120 = vpow2.f32 %v4339_v5  ;;  %v3118_v5 = vld [vmem:[%s6588_s13 + $0x28] sm:$0xff] }
0x2196   :  { %v5121_v57 = vpop.eup %5120 }
0x2197   :  { %v2689_v26 = vadd.f32 1.0, %v5121_v57  ;;  %v3120_v57 = vld [vmem:[%s6588_s13 + $0x38] sm:$0xff] }
0x2199   :  { %5122 = vrcp.f32 %v2689_v26  ;;  %v4842_v26 = vpack.c.bf16 %v3115_v23, %v3113_v20 }
0x21a3   :  { %v5123_v35 = vpop.eup %5122 }
0x21a4   :  { %v2693_v4 = vmul.f32 %v5123_v35, %v2692_v29  ;;  %v2696_v61 = vsub.f32 1.0, %v5123_v35  ;;  %v2702_v46 = vmul.f32 %v5123_v35, %v2604_v12  ;;  %v4844_v29 = vpack.c.bf16 %v3120_v57, %v3118_v5  ;;  %v3117_v35 = vld [vmem:[%s6588_s13 + $0x20] sm:$0xff] }
0x21a6   :  { %v2694_v40 = vadd.f32 %v2693_v4, %v2611_v39  ;;  %v3119_v4 = vld [vmem:[%s6588_s13 + $0x30] sm:$0xff] }
0x21a8   :  { %5124 = vtanh.f32 %v2694_v40  ;;  %v3122_v40 = vld [vmem:[%s6588_s13 + $0x48] sm:$0xff] }
0x21b2   :  { %v5125_v43 = vpop.eup %5124 }
0x21b3   :  { %2698 = vrot.lane.b32.xlu0 %v5125_v43, %s5199_s22  ;;  %v3124_v43 = vld [vmem:[%s6588_s13 + $0x58] sm:$0xff] }
0x2225   :  { %v2699_v16 = vpop.permute.xlu0 %2698 }
0x2226   :  { %v2701_v44 = vmul.f32 %v2699_v16, %v2696_v61  ;;  %v4846_v61 = vpack.c.bf16 %v3119_v4, %v3117_v35  ;;  %v4848_v16 = vpack.c.bf16 %v3124_v43, %v3122_v40  ;;  %v3297_v35 = vld [vmem:[%s6590_s15 + $0x18] sm:$0xff] }
0x2228   :  { %v2703_v59 = vadd.f32 %v2702_v46, %v2701_v44  ;;  %v3121_v46 = vld [vmem:[%s6588_s13 + $0x40] sm:$0xff]  ;;  %v3123_v44 = vld [vmem:[%s6588_s13 + $0x50] sm:$0xff] }
0x222a   :  { %2705 = vrot.lane.b32.xlu1 %v2703_v59, %s5199_s22 }
0x229c   :  { %v2706_v27 = vpop.permute.xlu1 %2705 }
0x229d   :  { %2708 = vst.msk [vmem:[#allocation2 + $0x18] sm:$0xff] %vm231_vm1, %v2706_v27  ;;  %4340 = vmatmul.mubr.msk.f32.vlgmr.msra.gmra.mrb[62].mxu0 %vm231_vm1, %v2706_v27  ;;  %v3128_v27 = vld [vmem:[%s6588_s13 + $0x78] sm:$0xff] }
0x229e   :  { %4811 = vmatpush1.bf16.msra.mxu0 %v6015_v7  ;;  %2975 = vmatprep.mubr.f32.mxu0 %v5198_v3 }
0x229f   :  { %4813 = vmatprep.subr.bf16.mxu0 %v6024_v11 }
0x22a2   :  { %4815 = vmatpush1.bf16.msra.mxu0 %v6032_v28 }
0x22a3   :  { %4817 = vmatprep.subr.bf16.mxu0 %v6042_v9 }
0x22a6   :  { %4819 = vmatpush1.bf16.msra.mxu0 %v6050_v13 }
0x22a7   :  { %4821 = vmatprep.subr.bf16.mxu0 %v6061_v63 }
0x22aa   :  { %4823 = vmatpush1.bf16.msra.mxu0 %v6071_v14 }
0x2370   :  { %v2779_v33 = vpop.f32.mrb[62].mxu0 }
0x2371   :  { %v2784_v19 = vadd.f32 %v2779_v33, %v2254_v52  ;;  %v2781_v45 = vpop.f32.mrb[63].mxu0  ;;  %v4850_v52 = vpack.c.bf16 %v3123_v44, %v3121_v46  ;;  %v3296_v46 = vld [vmem:[%s6590_s15 + $0x10] sm:$0xff] }
0x2372   :  { %v2791_v56 = vadd.f32 %v6117_v18, %v2781_v45  ;;  %v3127_v45 = vld [vmem:[%s6588_s13 + $0x70] sm:$0xff] }
0x2373   :  { %v4341_v47 = vmul.f32 -1.442695, %v2784_v19  ;;  %v3125_v19 = vld [vmem:[%s6588_s13 + $0x60] sm:$0xff] }
0x2375   :  { %5126 = vpow2.f32 %v4341_v47  ;;  %v4854_v47 = vpack.c.bf16 %v3127_v45, %v3125_v19  ;;  %v3300_v19 = vld [vmem:[%s6590_s15 + $0x30] sm:$0xff] }
0x237f   :  { %v5127_v50 = vpop.eup %5126 }
0x2380   :  { %v2788_v54 = vadd.f32 1.0, %v5127_v50  ;;  %v3105_v50 = vld [vmem:[#allocation2] sm:$0xff] }
0x2382   :  { %5128 = vrcp.f32 %v2788_v54  ;;  %v3106_v54 = vld [vmem:[#allocation2 + $0x8] sm:$0xff] }
0x238c   :  { %v5129_v32 = vpop.eup %5128 }
0x238d   :  { %v2792_v36 = vmul.f32 %v5129_v32, %v2791_v56  ;;  %v2795_v62 = vsub.f32 1.0, %v5129_v32  ;;  %v2801_v1 = vmul.f32 %v5129_v32, %v2703_v59  ;;  %v3126_v59 = vld [vmem:[%s6588_s13 + $0x68] sm:$0xff]  ;;  %v3107_v56 = vld [vmem:[#allocation2 + $0x10] sm:$0xff]  ;;  %v3108_v32 = vld [vmem:[#allocation2 + $0x18] sm:$0xff] }
0x238e   :  { %v4852_v33 = vpack.c.bf16 %v3128_v27, %v3126_v59  ;;  %v3299_v59 = vld [vmem:[%s6590_s15 + $0x28] sm:$0xff]  ;;  %v3301_v27 = vld [vmem:[%s6590_s15 + $0x38] sm:$0xff] }
0x238f   :  { %v2793_v30 = vadd.f32 %v2792_v36, %v2710_v60 }
0x2391   :  { %5130 = vtanh.f32 %v2793_v30  ;;  %v2266_v30 = vadd.f32 %v6103_v42, %v6108_v53 }
0x239b   :  { %v5131_v49 = vpop.eup %5130 }
0x239c   :  { %2797 = vrot.lane.b32.xlu0 %v5131_v49, %s5199_s22 }
0x240e   :  { %v2798_v51 = vpop.permute.xlu0 %2797 }
0x240f   :  { %v2800_v2 = vmul.f32 %v2798_v51, %v2795_v62 }
0x2411   :  { %v2802_v6 = vadd.f32 %v2801_v1, %v2800_v2  ;;  %v3129_v2 = vld [vmem:[%s6589_s14] sm:$0x3] }
0x2413   :  { %2804 = vrot.lane.b32.xlu1 %v2802_v6, %s5199_s22 }
0x2485   :  { %v2805_v8 = vpop.permute.xlu1 %2804 }
0x2486   :  { %2807 = vst.msk [vmem:[#allocation2 + $0x20] sm:$0xff] %vm231_vm1, %v2805_v8  ;;  %4342 = vmatmul.mubr.msk.f32.vlgmr.msra.gmra.mrb[26].mxu1 %vm231_vm1, %v2805_v8  ;;  %v6285_v8 = vrot.slane %v3129_v2, %v5423_v34 }
0x2487   :  { %4827 = vmatpush1.bf16.msra.mxu1 %v6015_v7  ;;  %3074 = vmatprep.mubr.f32.mxu1 %v5198_v3 }
0x2488   :  { %4829 = vmatprep.subr.bf16.mxu1 %v6024_v11 }
0x248b   :  { %4831 = vmatpush1.bf16.msra.mxu1 %v6032_v28 }
0x248c   :  { %4833 = vmatprep.subr.bf16.mxu1 %v6042_v9 }
0x248d   :  { %v3109_v36 = vld [vmem:[#allocation2 + $0x20] sm:$0xff] }
0x248f   :  { %4835 = vmatpush1.bf16.msra.mxu1 %v6050_v13  ;;  %v2809_v13 = vld [vmem:[#allocation4 + $0x58] sm:$0xff] }
0x2490   :  { %4837 = vmatprep.subr.bf16.mxu1 %v6061_v63  ;;  %v3114_v63 = vld [vmem:[%s6588_s13 + $0x8] sm:$0xff] }
0x2493   :  { %4839 = vmatpush1.bf16.msra.mxu1 %v6071_v14  ;;  %v4840_v14 = vpack.c.bf16 %v3116_v58, %v3114_v63 }
0x2495   :  { %4841 = vmatprep.subr.bf16.mxu0 %v4840_v14 }
0x2559   :  { %v2878_v24 = vpop.f32.mrb[26].mxu1 }
0x255a   :  { %v2883_v22 = vadd.f32 %v2878_v24, %v2260_v25  ;;  %v2880_v7 = vpop.f32.mrb[27].mxu1 }
0x255b   :  { %v2890_v28 = vadd.f32 %v6117_v18, %v2880_v7 }
0x255c   :  { %v4343_v10 = vmul.f32 -1.442695, %v2883_v22 }
0x255e   :  { %5132 = vpow2.f32 %v4343_v10 }
0x2568   :  { %v5133_v41 = vpop.eup %5132 }
0x2569   :  { %v2887_v11 = vadd.f32 1.0, %v5133_v41 }
0x256b   :  { %5134 = vrcp.f32 %v2887_v11 }
0x2575   :  { %v5135_v9 = vpop.eup %5134 }
0x2576   :  { %v2891_v55 = vmul.f32 %v5135_v9, %v2890_v28  ;;  %v2894_v48 = vsub.f32 1.0, %v5135_v9  ;;  %v2900_v15 = vmul.f32 %v5135_v9, %v2802_v6  ;;  %v6282_v6 = vrot.slane %v3129_v2, %v5431_v37 }
0x2578   :  { %v2892_v38 = vadd.f32 %v2891_v55, %v2809_v13 }
0x257a   :  { %5136 = vtanh.f32 %v2892_v38 }
0x2584   :  { %v5137_v31 = vpop.eup %5136 }
0x2585   :  { %2896 = vrot.lane.b32.xlu0 %v5137_v31, %s5199_s22 }
0x25f7   :  { %v2897_v12 = vpop.permute.xlu0 %2896 }
0x25f8   :  { %v2899_v17 = vmul.f32 %v2897_v12, %v2894_v48  ;;  %v2908_v12 = vld [vmem:[#allocation4 + $0x68] sm:$0xff] }
0x25fa   :  { %v6215_v0 = vadd.f32 %v2900_v15, %v2899_v17 }
0x25fc   :  { %2903 = vrot.lane.b32.xlu1 %v6215_v0, %s5199_s22 }
0x266e   :  { %v2904_v39 = vpop.permute.xlu1 %2903 }
0x266f   :  { %2906 = vst.msk [vmem:[#allocation2 + $0x28] sm:$0xff] %vm231_vm1, %v2904_v39  ;;  %4344 = vmatmul.mubr.msk.f32.vlgmr.msra.gmra.mrb[64].mxu0 %vm231_vm1, %v2904_v39 }
0x2670   :  { %4843 = vmatpush1.bf16.msra.mxu0 %v4842_v26  ;;  %3229 = vmatprep.mubr.f32.mxu0 %v5198_v3 }
0x2671   :  { %4845 = vmatprep.subr.bf16.mxu0 %v4844_v29  ;;  %v3295_v29 = vld [vmem:[%s6590_s15 + $0x8] sm:$0xff] }
0x2672   :  { %v6322_v40 = vpack.c.bf16 %v3297_v35, %v3295_v29  ;;  %v6433_v29 = vld [vmem:[%s6591_s16] ss:$0 sm:$0xff] }
0x2674   :  { %4847 = vmatpush1.bf16.msra.mxu0 %v4846_v61  ;;  %4857 = vmatprep.subr.bf16.mxu1 %v6322_v40 }
0x2675   :  { %4849 = vmatprep.subr.bf16.mxu0 %v4848_v16  ;;  %v3294_v16 = vld [vmem:[%s6590_s15] sm:$0xff] }
0x2676   :  { %v3110_v60 = vld [vmem:[#allocation2 + $0x28] sm:$0xff]  ;;  %v6335_v44 = vpack.c.bf16 %v3296_v46, %v3294_v16  ;;  %v3007_v16 = vld [vmem:[#allocation4 + $0x78] sm:$0xff] }
0x2678   :  { %4851 = vmatpush1.bf16.msra.mxu0 %v4850_v52  ;;  %v6344_v52 = vpack.c.bf16 %v3301_v27, %v3299_v59 }
0x2679   :  { %4853 = vmatprep.subr.bf16.mxu0 %v4852_v33  ;;  %v3298_v33 = vld [vmem:[%s6590_s15 + $0x20] sm:$0xff] }
0x267a   :  { %v6352_v45 = vpack.c.bf16 %v3300_v19, %v3298_v33 }
0x267c   :  { %4855 = vmatpush1.bf16.msra.mxu0 %v4854_v47  ;;  %v3303_v47 = vld [vmem:[%s6590_s15 + $0x48] sm:$0xff] }
0x267d   :  { %4889 = vmatprep.subr.bf16.mxu0 %v6322_v40 }
0x267f   :  { %4348 = vmatmul.mubr.msk.f32.vlgmr.msra.gmra.mrb[66].mxu0 %vm231_vm1, %v3105_v50  ;;  %v3305_v50 = vld [vmem:[%s6590_s15 + $0x58] sm:$0xff] }
0x2680   :  { %3235 = vmatprep.mubr.f32.mxu0 %v5198_v3  ;;  %4891 = vmatpush1.bf16.msra.mxu0 %v6335_v44 }
0x2681   :  { %4893 = vmatprep.subr.bf16.mxu0 %v6344_v52 }
0x2683   :  { %4349 = vmatmul.mubr.msk.f32.gmra.mrb[68].mxu0 %vm231_vm1, %v3106_v54  ;;  %v6362_v54 = vpack.c.bf16 %v3305_v50, %v3303_v47 }
0x2684   :  { %3241 = vmatprep.mubr.f32.mxu0 %v5198_v3  ;;  %4895 = vmatpush1.bf16.msra.mxu0 %v6352_v45 }
0x2685   :  { %4897 = vmatprep.subr.bf16.mxu0 %v6362_v54 }
0x2687   :  { %4350 = vmatmul.mubr.msk.f32.gmra.mrb[70].mxu0 %vm231_vm1, %v3107_v56  ;;  %v3302_v56 = vld [vmem:[%s6590_s15 + $0x40] sm:$0xff] }
0x2688   :  { %3247 = vmatprep.mubr.f32.mxu0 %v5198_v3 }
0x268b   :  { %4351 = vmatmul.mubr.msk.f32.gmra.mrb[72].mxu0 %vm231_vm1, %v3108_v32  ;;  %v3304_v32 = vld [vmem:[%s6590_s15 + $0x50] sm:$0xff] }
0x268c   :  { %3253 = vmatprep.mubr.f32.mxu0 %v5198_v3 }
0x268f   :  { %4352 = vmatmul.mubr.msk.f32.gmra.mrb[74].mxu0 %vm231_vm1, %v3109_v36 }
0x2690   :  { %3259 = vmatprep.mubr.f32.mxu0 %v5198_v3 }
0x2693   :  { %4353 = vmatmul.mubr.msk.f32.gmra.mrb[76].mxu0 %vm231_vm1, %v3110_v60  ;;  %v6370_v60 = vpack.c.bf16 %v3304_v32, %v3302_v56 }
0x2694   :  { %3265 = vmatprep.mubr.f32.mxu0 %v5198_v3 }
0x2695   :  { %4899 = vmatpush1.bf16.msra.mxu0 %v6370_v60 }
0x2742   :  { %v2977_v49 = vpop.f32.mrb[64].mxu0 }
0x2743   :  { %v2982_v62 = vadd.f32 %v2977_v49, %v2266_v30  ;;  %v2979_v51 = vpop.f32.mrb[65].mxu0 }
0x2744   :  { %v2989_v38 = vadd.f32 %v6117_v18, %v2979_v51  ;;  %v3307_v51 = vld [vmem:[%s6590_s15 + $0x68] sm:$0xff] }
0x2745   :  { %v4345_v1 = vmul.f32 -1.442695, %v2982_v62 }
0x2747   :  { %5138 = vpow2.f32 %v4345_v1  ;;  %v3309_v1 = vld [vmem:[%s6590_s15 + $0x78] sm:$0xff] }
0x2748   :  { %v6381_v2 = vpack.c.bf16 %v3309_v1, %v3307_v51 }
0x274a   :  { %4901 = vmatprep.subr.bf16.mxu0 %v6381_v2 }
0x2751   :  { %v5139_v25 = vpop.eup %5138 }
0x2752   :  { %v2986_v24 = vadd.f32 1.0, %v5139_v25  ;;  %v3231_v22 = vpop.f32.mrb[66].mxu0  ;;  %v3306_v25 = vld [vmem:[%s6590_s15 + $0x60] sm:$0xff] }
0x2753   :  { %v6288_v42 = vadd.f32 %v3231_v22, %v6282_v6  ;;  %v3233_v7 = vpop.f32.mrb[67].mxu0 }
0x2754   :  { %5140 = vrcp.f32 %v2986_v24  ;;  %v3234_v10 = vadd.f32 %v3233_v7, %v6285_v8 }
0x2756   :  { %3279 = vst.msk [vmem:[#allocation4 + $0x8] sm:$0xff] %vm231_vm1, %v3234_v10  ;;  %v3237_v41 = vpop.f32.mrb[68].mxu0 }
0x2757   :  { %v6293_v11 = vadd.f32 %v3237_v41, %v6282_v6  ;;  %v3239_v37 = vpop.f32.mrb[69].mxu0  ;;  %v2272_v41 = vadd.f32 %v6141_v21, %v6108_v53 }
0x2758   :  { %v3240_v34 = vadd.f32 %v3239_v37, %v6285_v8 }
0x275a   :  { %3281 = vst.msk [vmem:[#allocation4 + $0x18] sm:$0xff] %vm231_vm1, %v3240_v34  ;;  %v3243_v28 = vpop.f32.mrb[70].mxu0 }
0x275b   :  { %v6298_v9 = vadd.f32 %v3243_v28, %v6282_v6  ;;  %v3245_v55 = vpop.f32.mrb[71].mxu0 }
0x275c   :  { %v3246_v13 = vadd.f32 %v3245_v55, %v6285_v8 }
0x275e   :  { %v5141_v63 = vpop.eup %5140  ;;  %3283 = vst.msk [vmem:[#allocation4 + $0x28] sm:$0xff] %vm231_vm1, %v3246_v13  ;;  %v3249_v58 = vpop.f32.mrb[72].mxu0 }
0x275f   :  { %v2990_v14 = vmul.f32 %v5141_v63, %v2989_v38  ;;  %v6304_v31 = vadd.f32 %v3249_v58, %v6282_v6  ;;  %v3251_v48 = vpop.f32.mrb[73].mxu0  ;;  %v2993_v36 = vsub.f32 1.0, %v5141_v63  ;;  %v2999_v49 = vmul.f32 %v5141_v63, %v6215_v0  ;;  %v3308_v0 = vld [vmem:[%s6590_s15 + $0x70] sm:$0xff] }
0x2760   :  { %v3252_v15 = vadd.f32 %v3251_v48, %v6285_v8  ;;  %v6391_v22 = vpack.c.bf16 %v3308_v0, %v3306_v25 }
0x2761   :  { %v2991_v17 = vadd.f32 %v2990_v14, %v2908_v12 }
0x2762   :  { %3285 = vst.msk [vmem:[#allocation4 + $0x38] sm:$0xff] %vm231_vm1, %v3252_v15  ;;  %v3255_v20 = vpop.f32.mrb[74].mxu0  ;;  %4903 = vmatpush1.bf16.msra.mxu0 %v6391_v22 }
0x2763   :  { %5142 = vtanh.f32 %v2991_v17  ;;  %v6309_v23 = vadd.f32 %v3255_v20, %v6282_v6  ;;  %v3257_v5 = vpop.f32.mrb[75].mxu0  ;;  %4921 = vmatprep.subr.bf16.mxu0 %v6322_v40 }
0x2764   :  { %v3258_v57 = vadd.f32 %v3257_v5, %v6285_v8 }
0x2766   :  { %3287 = vst.msk [vmem:[#allocation4 + $0x48] sm:$0xff] %vm231_vm1, %v3258_v57  ;;  %v3261_v26 = vpop.f32.mrb[76].mxu0 }
0x2767   :  { %v6320_v4 = vadd.f32 %v3261_v26, %v6282_v6  ;;  %v3263_v39 = vpop.f32.mrb[77].mxu0 }
0x2768   :  { %v3264_v43 = vadd.f32 %v3263_v39, %v6285_v8 }
0x276a   :  { %3289 = vst.msk [vmem:[#allocation4 + $0x58] sm:$0xff] %vm231_vm1, %v3264_v43  ;;  %v3318_v43 = vld [vmem:[#allocation4 + $0x8] sm:$0xff] }
0x276d   :  { %v5143_v61 = vpop.eup %5142 }
0x276e   :  { %2995 = vrot.lane.b32.xlu0 %v5143_v61, %s5199_s22 }
0x27e0   :  { %v2996_v30 = vpop.permute.xlu0 %2995 }
0x27e1   :  { %v2998_v62 = vmul.f32 %v2996_v30, %v2993_v36 }
0x27e3   :  { %v6389_v24 = vadd.f32 %v2999_v49, %v2998_v62 }
0x27e5   :  { %3002 = vrot.lane.b32.xlu1 %v6389_v24, %s5199_s22 }
0x2857   :  { %v3003_v7 = vpop.permute.xlu1 %3002 }
0x2858   :  { %3005 = vst.msk [vmem:[#allocation2 + $0x30] sm:$0xff] %vm231_vm1, %v3003_v7  ;;  %4346 = vmatmul.mubr.msk.f32.vlgmr.msra.gmra.mrb[28].mxu1 %vm231_vm1, %v3003_v7 }
0x2859   :  { %4859 = vmatpush1.bf16.msra.mxu1 %v6335_v44  ;;  %3383 = vmatprep.mubr.f32.mxu1 %v5198_v3 }
0x285a   :  { %4861 = vmatprep.subr.bf16.mxu1 %v6344_v52 }
0x285d   :  { %4863 = vmatpush1.bf16.msra.mxu1 %v6352_v45 }
0x285e   :  { %4865 = vmatprep.subr.bf16.mxu1 %v6362_v54 }
0x285f   :  { %v3111_v10 = vld [vmem:[#allocation2 + $0x30] sm:$0xff] }
0x2860   :  { %4354 = vmatmul.mubr.msk.f32.gmra.mrb[78].mxu0 %vm231_vm1, %v3111_v10 }
0x2861   :  { %4867 = vmatpush1.bf16.msra.mxu1 %v6370_v60  ;;  %3271 = vmatprep.mubr.f32.mxu0 %v5198_v3 }
0x2862   :  { %4869 = vmatprep.subr.bf16.mxu1 %v6381_v2 }
0x2865   :  { %4871 = vmatpush1.bf16.msra.mxu1 %v6391_v22 }
0x2866   :  { %4873 = vmatprep.subr.bf16.mxu1 %v6322_v40 }
0x2868   :  { %3384 = vmatmul.mubr.f32.vlgmr.msra.gmra.mrb[30].mxu1 %v5198_v3 }
0x2869   :  { %4875 = vmatpush1.bf16.msra.mxu1 %v6335_v44  ;;  %3480 = vmatprep.mubr.f32.mxu1 %v5198_v3 }
0x286a   :  { %4877 = vmatprep.subr.bf16.mxu1 %v6344_v52 }
0x286d   :  { %4879 = vmatpush1.bf16.msra.mxu1 %v6352_v45 }
0x286e   :  { %4881 = vmatprep.subr.bf16.mxu1 %v6362_v54 }
0x2871   :  { %4883 = vmatpush1.bf16.msra.mxu1 %v6370_v60 }
0x2872   :  { %4885 = vmatprep.subr.bf16.mxu1 %v6381_v2 }
0x2875   :  { %4887 = vmatpush1.bf16.msra.mxu1 %v6391_v22 }
0x2876   :  { %4905 = vmatprep.subr.bf16.mxu1 %v6322_v40 }
0x292b   :  { %v3076_v37 = vpop.f32.mrb[28].mxu1 }
0x292c   :  { %v3081_v34 = vadd.f32 %v3076_v37, %v2272_v41  ;;  %v3078_v28 = vpop.f32.mrb[29].mxu1 }
0x292d   :  { %v3088_v17 = vadd.f32 %v6117_v18, %v3078_v28 }
0x292e   :  { %v4347_v55 = vmul.f32 -1.442695, %v3081_v34 }
0x2930   :  { %5144 = vpow2.f32 %v4347_v55 }
0x2933   :  { %v3267_v13 = vpop.f32.mrb[78].mxu0 }
0x2934   :  { %v6424_v38 = vadd.f32 %v3267_v13, %v6282_v6  ;;  %v3269_v63 = vpop.f32.mrb[79].mxu0 }
0x2935   :  { %v3270_v58 = vadd.f32 %v3269_v63, %v6285_v8 }
0x2937   :  { %3291 = vst.msk [vmem:[#allocation4 + $0x68] sm:$0xff] %vm231_vm1, %v3270_v58 }
0x293a   :  { %v5145_v14 = vpop.eup %5144 }
0x293b   :  { %v3085_v48 = vadd.f32 1.0, %v5145_v14  ;;  %v3385_v12 = vpop.f32.mrb[30].mxu1 }
0x293c   :  { %v3390_v15 = vadd.f32 %v3385_v12, %v6288_v42  ;;  %v3387_v53 = vpop.f32.mrb[31].mxu1 }
0x293d   :  { %5146 = vrcp.f32 %v3085_v48  ;;  %v3397_v35 = vadd.f32 %v6433_v29, %v3387_v53 }
0x293e   :  { %v4357_v21 = vmul.f32 -1.442695, %v3390_v15 }
0x2940   :  { %5148 = vpow2.f32 %v4357_v21 }
0x2947   :  { %v5147_v20 = vpop.eup %5146 }
0x2948   :  { %v3089_v5 = vmul.f32 %v5147_v20, %v3088_v17  ;;  %v3092_v56 = vsub.f32 1.0, %v5147_v20  ;;  %v3098_v36 = vmul.f32 %v5147_v20, %v6389_v24 }
0x294a   :  { %v5149_v57 = vpop.eup %5148  ;;  %v3090_v46 = vadd.f32 %v3089_v5, %v3007_v16 }
0x294b   :  { %v3394_v26 = vadd.f32 1.0, %v5149_v57 }
0x294d   :  { %5150 = vrcp.f32 %v3394_v26 }
0x2957   :  { %v5151_v39 = vpop.eup %5150 }
0x2958   :  { %v3398_v42 = vmul.f32 %v5151_v39, %v3397_v35  ;;  %v3401_v27 = vsub.f32 1.0, %v5151_v39  ;;  %v3407_v19 = vmul.f32 0.0, %v5151_v39 }
0x295a   :  { %v3399_v61 = vadd.f32 %v3398_v42, %v3318_v43 }
0x295c   :  { %5152 = vtanh.f32 %v3399_v61  ;;  %v3507_v61 = vld [vmem:[#allocation4 + $0x28] sm:$0xff] }
0x295d   :  { %5154 = vtanh.f32 %v3090_v46 }
0x2966   :  { %v5153_v18 = vpop.eup %5152 }
0x2967   :  { %3403 = vrot.lane.b32.xlu0 %v5153_v18, %s5199_s22  ;;  %v5155_v59 = vpop.eup %5154 }
0x296b   :  { %3094 = vrot.lane.b32.xlu0 %v5155_v59, %s5199_s22 }
0x29d9   :  { %v3404_v33 = vpop.permute.xlu0 %3403 }
0x29da   :  { %v3406_v47 = vmul.f32 %v3404_v33, %v3401_v27 }
0x29dc   :  { %v3408_v50 = vadd.f32 %v3407_v19, %v3406_v47 }
0x29dd   :  { %v3095_v32 = vpop.permute.xlu0 %3094 }
0x29de   :  { %v3097_v30 = vmul.f32 %v3095_v32, %v3092_v56  ;;  %3412 = vrot.lane.b32.xlu1 %v3408_v50, %s5199_s22 }
0x29e0   :  { %v3099_v49 = vadd.f32 %v3098_v36, %v3097_v30 }
0x29e2   :  { %3101 = vrot.lane.b32.xlu0 %v3099_v49, %s5199_s22 }
0x2a50   :  { %v3413_v62 = vpop.permute.xlu1 %3412 }
0x2a51   :  { %4358 = vmatmul.mubr.msk.f32.vlgmr.msra.gmra.mrb[32].mxu1 %vm231_vm1, %v3413_v62 }
0x2a52   :  { %4907 = vmatpush1.bf16.msra.mxu1 %v6335_v44  ;;  %3674 = vmatprep.mubr.f32.mxu1 %v5198_v3 }
0x2a53   :  { %4909 = vmatprep.subr.bf16.mxu1 %v6344_v52 }
0x2a54   :  { %v3102_v51 = vpop.permute.xlu0 %3101 }
0x2a55   :  { %3104 = vst.msk [vmem:[#allocation2 + $0x38] sm:$0xff] %vm231_vm1, %v3102_v51 }
0x2a56   :  { %4911 = vmatpush1.bf16.msra.mxu1 %v6352_v45 }
0x2a57   :  { %4913 = vmatprep.subr.bf16.mxu1 %v6362_v54 }
0x2a5a   :  { %4915 = vmatpush1.bf16.msra.mxu1 %v6370_v60 }
0x2a5b   :  { %4917 = vmatprep.subr.bf16.mxu1 %v6381_v2 }
0x2a5c   :  { %v3112_v1 = vld [vmem:[#allocation2 + $0x38] sm:$0xff] }
0x2a5d   :  { %4355 = vmatmul.mubr.msk.f32.gmra.mrb[80].mxu0 %vm231_vm1, %v3112_v1  ;;  %v3604_v1 = vld [vmem:[#allocation4 + $0x38] sm:$0xff] }
0x2a5e   :  { %3577 = vmatprep.mubr.f32.mxu0 %v5198_v3  ;;  %4919 = vmatpush1.bf16.msra.mxu1 %v6391_v22 }
0x2a5f   :  { %4937 = vmatprep.subr.bf16.mxu1 %v6322_v40 }
0x2b24   :  { %v3482_v25 = vpop.f32.mrb[32].mxu1 }
0x2b25   :  { %v3487_v0 = vadd.f32 %v3482_v25, %v6293_v11  ;;  %v3484_v24 = vpop.f32.mrb[33].mxu1  ;;  %v3410_v11 = vld [vmem:[#allocation4 + $0x18] sm:$0xff] }
0x2b26   :  { %v3494_v13 = vadd.f32 %v6433_v29, %v3484_v24 }
0x2b27   :  { %v4359_v7 = vmul.f32 -1.442695, %v3487_v0 }
0x2b29   :  { %5156 = vpow2.f32 %v4359_v7 }
0x2b30   :  { %v3273_v10 = vpop.f32.mrb[80].mxu0 }
0x2b31   :  { %v6456_v41 = vadd.f32 %v3273_v10, %v6282_v6  ;;  %v3275_v37 = vpop.f32.mrb[81].mxu0 }
0x2b32   :  { %v3276_v34 = vadd.f32 %v3275_v37, %v6285_v8 }
0x2b33   :  { %v5157_v28 = vpop.eup %5156 }
0x2b34   :  { %v3491_v55 = vadd.f32 1.0, %v5157_v28  ;;  %3293 = vst.msk [vmem:[#allocation4 + $0x78] sm:$0xff] %vm231_vm1, %v3276_v34 }
0x2b36   :  { %5158 = vrcp.f32 %v3491_v55 }
0x2b40   :  { %v5159_v63 = vpop.eup %5158 }
0x2b41   :  { %v3495_v58 = vmul.f32 %v5159_v63, %v3494_v13  ;;  %v3498_v6 = vsub.f32 1.0, %v5159_v63  ;;  %v3504_v15 = vmul.f32 %v5159_v63, %v3408_v50 }
0x2b43   :  { %v3496_v14 = vadd.f32 %v3495_v58, %v3410_v11 }
0x2b45   :  { %5160 = vtanh.f32 %v3496_v14 }
0x2b4f   :  { %v5161_v48 = vpop.eup %5160 }
0x2b50   :  { %3500 = vrot.lane.b32.xlu1 %v5161_v48, %s5199_s22 }
0x2bc2   :  { %v3501_v12 = vpop.permute.xlu1 %3500 }
0x2bc3   :  { %v3503_v53 = vmul.f32 %v3501_v12, %v3498_v6  ;;  %v3701_v6 = vld [vmem:[#allocation4 + $0x48] sm:$0xff] }
0x2bc5   :  { %v3505_v8 = vadd.f32 %v3504_v15, %v3503_v53 }
0x2bc7   :  { %3509 = vrot.lane.b32.xlu1 %v3505_v8, %s5199_s22 }
0x2c39   :  { %v3510_v21 = vpop.permute.xlu1 %3509 }
0x2c3a   :  { %4360 = vmatmul.mubr.msk.f32.vlgmr.msra.gmra.mrb[82].mxu0 %vm231_vm1, %v3510_v21 }
0x2c3b   :  { %4923 = vmatpush1.bf16.msra.mxu0 %v6335_v44  ;;  %3771 = vmatprep.mubr.f32.mxu0 %v5198_v3 }
0x2c3c   :  { %4925 = vmatprep.subr.bf16.mxu0 %v6344_v52 }
0x2c3f   :  { %4927 = vmatpush1.bf16.msra.mxu0 %v6352_v45 }
0x2c40   :  { %4929 = vmatprep.subr.bf16.mxu0 %v6362_v54 }
0x2c43   :  { %4931 = vmatpush1.bf16.msra.mxu0 %v6370_v60 }
0x2c44   :  { %4933 = vmatprep.subr.bf16.mxu0 %v6381_v2 }
0x2c47   :  { %4935 = vmatpush1.bf16.msra.mxu0 %v6391_v22 }
0x2c48   :  { %4953 = vmatprep.subr.bf16.mxu0 %v6322_v40 }
0x2d0d   :  { %v3579_v17 = vpop.f32.mrb[82].mxu0 }
0x2d0e   :  { %v3584_v20 = vadd.f32 %v3579_v17, %v6298_v9  ;;  %v3581_v5 = vpop.f32.mrb[83].mxu0 }
0x2d0f   :  { %v3591_v39 = vadd.f32 %v6433_v29, %v3581_v5 }
0x2d10   :  { %v4361_v57 = vmul.f32 -1.442695, %v3584_v20 }
0x2d12   :  { %5162 = vpow2.f32 %v4361_v57 }
0x2d1c   :  { %v5163_v26 = vpop.eup %5162 }
0x2d1d   :  { %v3588_v35 = vadd.f32 1.0, %v5163_v26 }
0x2d1f   :  { %5164 = vrcp.f32 %v3588_v35 }
0x2d29   :  { %v5165_v42 = vpop.eup %5164 }
0x2d2a   :  { %v3592_v43 = vmul.f32 %v5165_v42, %v3591_v39  ;;  %v3595_v18 = vsub.f32 1.0, %v5165_v42  ;;  %v3601_v27 = vmul.f32 %v5165_v42, %v3505_v8 }
0x2d2c   :  { %v3593_v16 = vadd.f32 %v3592_v43, %v3507_v61 }
0x2d2e   :  { %5166 = vtanh.f32 %v3593_v16 }
0x2d38   :  { %v5167_v46 = vpop.eup %5166 }
0x2d39   :  { %3597 = vrot.lane.b32.xlu0 %v5167_v46, %s5199_s22 }
0x2dab   :  { %v3598_v59 = vpop.permute.xlu0 %3597 }
0x2dac   :  { %v3600_v9 = vmul.f32 %v3598_v59, %v3595_v18 }
0x2dae   :  { %v3602_v33 = vadd.f32 %v3601_v27, %v3600_v9 }
0x2db0   :  { %3606 = vrot.lane.b32.xlu1 %v3602_v33, %s5199_s22 }
0x2e22   :  { %v3607_v19 = vpop.permute.xlu1 %3606 }
0x2e23   :  { %4362 = vmatmul.mubr.msk.f32.vlgmr.msra.gmra.mrb[34].mxu1 %vm231_vm1, %v3607_v19 }
0x2e24   :  { %4939 = vmatpush1.bf16.msra.mxu1 %v6335_v44  ;;  %3868 = vmatprep.mubr.f32.mxu1 %v5198_v3 }
0x2e25   :  { %4941 = vmatprep.subr.bf16.mxu1 %v6344_v52 }
0x2e28   :  { %4943 = vmatpush1.bf16.msra.mxu1 %v6352_v45 }
0x2e29   :  { %4945 = vmatprep.subr.bf16.mxu1 %v6362_v54 }
0x2e2c   :  { %4947 = vmatpush1.bf16.msra.mxu1 %v6370_v60 }
0x2e2d   :  { %4949 = vmatprep.subr.bf16.mxu1 %v6381_v2 }
0x2e30   :  { %4951 = vmatpush1.bf16.msra.mxu1 %v6391_v22 }
0x2e31   :  { %4969 = vmatprep.subr.bf16.mxu1 %v6322_v40 }
0x2ef6   :  { %v3676_v47 = vpop.f32.mrb[34].mxu1 }
0x2ef7   :  { %v3681_v50 = vadd.f32 %v3676_v47, %v6304_v31  ;;  %v3678_v56 = vpop.f32.mrb[35].mxu1 }
0x2ef8   :  { %v3688_v49 = vadd.f32 %v6433_v29, %v3678_v56 }
0x2ef9   :  { %v4363_v32 = vmul.f32 -1.442695, %v3681_v50 }
0x2efb   :  { %5168 = vpow2.f32 %v4363_v32  ;;  %v3895_v32 = vld [vmem:[#allocation4 + $0x68] sm:$0xff] }
0x2f05   :  { %v5169_v36 = vpop.eup %5168 }
0x2f06   :  { %v3685_v30 = vadd.f32 1.0, %v5169_v36 }
0x2f08   :  { %5170 = vrcp.f32 %v3685_v30 }
0x2f12   :  { %v5171_v62 = vpop.eup %5170 }
0x2f13   :  { %v3689_v51 = vmul.f32 %v5171_v62, %v3688_v49  ;;  %v3692_v40 = vsub.f32 1.0, %v5171_v62  ;;  %v3698_v7 = vmul.f32 %v5171_v62, %v3602_v33 }
0x2f15   :  { %v3690_v25 = vadd.f32 %v3689_v51, %v3604_v1 }
0x2f17   :  { %5172 = vtanh.f32 %v3690_v25 }
0x2f21   :  { %v5173_v0 = vpop.eup %5172 }
0x2f22   :  { %3694 = vrot.lane.b32.xlu0 %v5173_v0, %s5199_s22 }
0x2f94   :  { %v3695_v24 = vpop.permute.xlu0 %3694 }
0x2f95   :  { %v3697_v31 = vmul.f32 %v3695_v24, %v3692_v40 }
0x2f97   :  { %v3699_v10 = vadd.f32 %v3698_v7, %v3697_v31 }
0x2f99   :  { %3703 = vrot.lane.b32.xlu1 %v3699_v10, %s5199_s22 }
0x300b   :  { %v3704_v37 = vpop.permute.xlu1 %3703 }
0x300c   :  { %4364 = vmatmul.mubr.msk.f32.vlgmr.msra.gmra.mrb[84].mxu0 %vm231_vm1, %v3704_v37 }
0x300d   :  { %4955 = vmatpush1.bf16.msra.mxu0 %v6335_v44  ;;  %3965 = vmatprep.mubr.f32.mxu0 %v5198_v3 }
0x300e   :  { %4957 = vmatprep.subr.bf16.mxu0 %v6344_v52 }
0x3011   :  { %4959 = vmatpush1.bf16.msra.mxu0 %v6352_v45 }
0x3012   :  { %4961 = vmatprep.subr.bf16.mxu0 %v6362_v54 }
0x3015   :  { %4963 = vmatpush1.bf16.msra.mxu0 %v6370_v60 }
0x3016   :  { %4965 = vmatprep.subr.bf16.mxu0 %v6381_v2 }
0x3019   :  { %4967 = vmatpush1.bf16.msra.mxu0 %v6391_v22 }
0x30df   :  { %v3773_v34 = vpop.f32.mrb[84].mxu0 }
0x30e0   :  { %v3778_v28 = vadd.f32 %v3773_v34, %v6309_v23  ;;  %v3775_v55 = vpop.f32.mrb[85].mxu0 }
0x30e1   :  { %v3785_v11 = vadd.f32 %v6433_v29, %v3775_v55  ;;  %v3992_v55 = vld [vmem:[#allocation4 + $0x78] sm:$0xff] }
0x30e2   :  { %v4365_v13 = vmul.f32 -1.442695, %v3778_v28 }
0x30e4   :  { %5174 = vpow2.f32 %v4365_v13 }
0x30ee   :  { %v5175_v63 = vpop.eup %5174 }
0x30ef   :  { %v3782_v58 = vadd.f32 1.0, %v5175_v63  ;;  %v5200_v63 = vmov 0.0|0.0  }
0x30f0   :  { %4984 = vmatprep.subr.bf16.mxu0 %v5200_v63 }
0x30f1   :  { %5176 = vrcp.f32 %v3782_v58  ;;  %v4088_v58 = vld [vmem:[%s6592_s17] sm:$0xff] }
0x30fb   :  { %v5177_v14 = vpop.eup %5176 }
0x30fc   :  { %v3786_v48 = vmul.f32 %v5177_v14, %v3785_v11  ;;  %v3789_v53 = vsub.f32 1.0, %v5177_v14  ;;  %v3795_v21 = vmul.f32 %v5177_v14, %v3699_v10  ;;  %v4090_v11 = vld [vmem:[%s6592_s17 + $0x10] sm:$0xff]  ;;  %v4091_v14 = vld [vmem:[%s6592_s17 + $0x18] sm:$0xff] }
0x30fe   :  { %v3787_v12 = vadd.f32 %v3786_v48, %v3701_v6  ;;  %v4988_v48 = vpack.c.bf16 %v4091_v14, %v4090_v11  ;;  %v4092_v6 = vld [vmem:[%s6592_s17 + $0x20] sm:$0xff] }
0x3100   :  { %5178 = vtanh.f32 %v3787_v12  ;;  %v4093_v12 = vld [vmem:[%s6592_s17 + $0x28] sm:$0xff] }
0x310a   :  { %v5179_v15 = vpop.eup %5178 }
0x310b   :  { %3791 = vrot.lane.b32.xlu0 %v5179_v15, %s5199_s22 }
0x317d   :  { %v3792_v8 = vpop.permute.xlu0 %3791 }
0x317e   :  { %v3794_v23 = vmul.f32 %v3792_v8, %v3789_v53  ;;  %v4991_v53 = vpack.c.bf16 %v4093_v12, %v4092_v6  ;;  %v4095_v8 = vld [vmem:[%s6592_s17 + $0x38] sm:$0xff] }
0x3180   :  { %v3796_v17 = vadd.f32 %v3795_v21, %v3794_v23  ;;  %v4179_v23 = vld [vmem:[%s6593_s19] sm:$0xff] }
0x3182   :  { %3800 = vrot.lane.b32.xlu1 %v3796_v17, %s5199_s22 }
0x31f4   :  { %v3801_v20 = vpop.permute.xlu1 %3800 }
0x31f5   :  { %4366 = vmatmul.mubr.msk.f32.vlgmr.msra.gmra.mrb[36].mxu1 %vm231_vm1, %v3801_v20 }
0x31f6   :  { %4971 = vmatpush1.bf16.msra.mxu1 %v6335_v44  ;;  %4062 = vmatprep.mubr.f32.mxu1 %v5198_v3 }
0x31f7   :  { %4973 = vmatprep.subr.bf16.mxu1 %v6344_v52 }
0x31fa   :  { %4975 = vmatpush1.bf16.msra.mxu1 %v6352_v45 }
0x31fb   :  { %4977 = vmatprep.subr.bf16.mxu1 %v6362_v54  ;;  %v3798_v54 = vld [vmem:[#allocation4 + $0x58] sm:$0xff] }
0x31fe   :  { %4979 = vmatpush1.bf16.msra.mxu1 %v6370_v60 }
0x31ff   :  { %4981 = vmatprep.subr.bf16.mxu1 %v6381_v2 }
0x3202   :  { %4983 = vmatpush1.bf16.msra.mxu1 %v6391_v22 }
0x3203   :  { %4996 = vmatprep.subr.bf16.mxu1 %v5200_v63 }
0x32c8   :  { %v3870_v5 = vpop.f32.mrb[36].mxu1 }
0x32c9   :  { %v3875_v57 = vadd.f32 %v3870_v5, %v6320_v4  ;;  %v3872_v26 = vpop.f32.mrb[37].mxu1 }
0x32ca   :  { %v3882_v52 = vadd.f32 %v6433_v29, %v3872_v26 }
0x32cb   :  { %v4367_v35 = vmul.f32 -1.442695, %v3875_v57 }
0x32cd   :  { %5180 = vpow2.f32 %v4367_v35 }
0x32d7   :  { %v5181_v44 = vpop.eup %5180 }
0x32d8   :  { %v3879_v39 = vadd.f32 1.0, %v5181_v44 }
0x32da   :  { %5182 = vrcp.f32 %v3879_v39 }
0x32e4   :  { %v5183_v45 = vpop.eup %5182 }
0x32e5   :  { %v3883_v42 = vmul.f32 %v5183_v45, %v3882_v52  ;;  %v3886_v2 = vsub.f32 1.0, %v5183_v45  ;;  %v3892_v61 = vmul.f32 %v5183_v45, %v3796_v17  ;;  %v4180_v17 = vld [vmem:[%s6593_s19 + $0x8] sm:$0xff]  ;;  %v4181_v52 = vld [vmem:[%s6593_s19 + $0x10] sm:$0xff]  ;;  %v4182_v45 = vld [vmem:[%s6593_s19 + $0x18] sm:$0xff] }
0x32e6   :  { %v4997_v20 = vpack.c.bf16 %v4180_v17, %v4179_v23 }
0x32e7   :  { %v3884_v43 = vadd.f32 %v3883_v42, %v3798_v54  ;;  %v5000_v42 = vpack.c.bf16 %v4182_v45, %v4181_v52  ;;  %v4372_v54 = vld [vmem:[%s6594_s18] ss:$0 sm:$0xff] }
0x32e9   :  { %5184 = vtanh.f32 %v3884_v43 }
0x32f3   :  { %v5185_v60 = vpop.eup %5184 }
0x32f4   :  { %3888 = vrot.lane.b32.xlu0 %v5185_v60, %s5199_s22 }
0x3366   :  { %v3889_v22 = vpop.permute.xlu0 %3888 }
0x3367   :  { %v3891_v4 = vmul.f32 %v3889_v22, %v3886_v2 }
0x3369   :  { %v3893_v16 = vadd.f32 %v3892_v61, %v3891_v4  ;;  %v4374_v61 = vld [vmem:[%s6595_s20] ss:$0 sm:$0xff] }
0x336b   :  { %3897 = vrot.lane.b32.xlu1 %v3893_v16, %s5199_s22 }
0x33dd   :  { %v3898_v46 = vpop.permute.xlu1 %3897 }
0x33de   :  { %4368 = vmatmul.mubr.msk.f32.vlgmr.msra.gmra.mrb[86].mxu0 %vm231_vm1, %v3898_v46 }
0x33df   :  { %4406 = vmatprep.mubr.msk.f32.mxu0 %vm5201_vm2, %v5198_v3 }
0x34b1   :  { %v3967_v18 = vpop.f32.mrb[86].mxu0 }
0x34b2   :  { %v3972_v59 = vadd.f32 %v3967_v18, %v6424_v38  ;;  %v3969_v27 = vpop.f32.mrb[87].mxu0 }
0x34b3   :  { %v3979_v47 = vadd.f32 %v6433_v29, %v3969_v27 }
0x34b4   :  { %v4369_v9 = vmul.f32 -1.442695, %v3972_v59 }
0x34b6   :  { %5186 = vpow2.f32 %v4369_v9 }
0x34c0   :  { %v5187_v33 = vpop.eup %5186 }
0x34c1   :  { %v3976_v19 = vadd.f32 1.0, %v5187_v33 }
0x34c3   :  { %5188 = vrcp.f32 %v3976_v19 }
0x34cd   :  { %v5189_v50 = vpop.eup %5188 }
0x34ce   :  { %v3980_v56 = vmul.f32 %v5189_v50, %v3979_v47  ;;  %v3983_v49 = vsub.f32 1.0, %v5189_v50  ;;  %v3989_v51 = vmul.f32 %v5189_v50, %v3893_v16 }
0x34d0   :  { %v3981_v36 = vadd.f32 %v3980_v56, %v3895_v32 }
0x34d2   :  { %5190 = vtanh.f32 %v3981_v36 }
0x34dc   :  { %v5191_v30 = vpop.eup %5190 }
0x34dd   :  { %3985 = vrot.lane.b32.xlu0 %v5191_v30, %s5199_s22 }
0x354f   :  { %v3986_v62 = vpop.permute.xlu0 %3985 }
0x3550   :  { %v3988_v38 = vmul.f32 %v3986_v62, %v3983_v49 }
0x3552   :  { %v3990_v1 = vadd.f32 %v3989_v51, %v3988_v38 }
0x3554   :  { %3994 = vrot.lane.b32.xlu1 %v3990_v1, %s5199_s22 }
0x35c6   :  { %v3995_v25 = vpop.permute.xlu1 %3994 }
0x35c7   :  { %4370 = vmatmul.mubr.msk.f32.vlgmr.msra.gmra.mrb[38].mxu1 %vm231_vm1, %v3995_v25 }
0x35c8   :  { %4417 = vmatprep.mubr.msk.f32.mxu1 %vm5201_vm2, %v5198_v3  ;;  %v4094_v3 = vld [vmem:[%s6592_s17 + $0x30] sm:$0xff]  ;;  %4998 = vmatpush3.bf16.msra.mxu1 %v4997_v20 }
0x35c9   :  { %v4994_v21 = vpack.c.bf16 %v4095_v8, %v4094_v3  ;;  %4999 = vmatprep.subr.bf16.mxu1 %v5200_v63 }
0x35cc   :  { %5001 = vmatpush3.bf16.msra.mxu1 %v5000_v42 }
0x369a   :  { %v4064_v0 = vpop.f32.mrb[38].mxu1 }
0x369b   :  { %v4069_v40 = vadd.f32 %v4064_v0, %v6456_v41  ;;  %v4066_v24 = vpop.f32.mrb[39].mxu1  ;;  %v4089_v41 = vld [vmem:[%s6592_s17 + $0x8] sm:$0xff] }
0x369c   :  { %v4076_v37 = vadd.f32 %v6433_v29, %v4066_v24  ;;  %v4985_v29 = vpack.c.bf16 %v4089_v41, %v4088_v58 }
0x369d   :  { %v4371_v7 = vmul.f32 -1.442695, %v4069_v40 }
0x369e   :  { %4986 = vmatpush3.bf16.msra.mxu0 %v4985_v29 }
0x369f   :  { %5192 = vpow2.f32 %v4371_v7  ;;  %4987 = vmatprep.subr.bf16.mxu0 %v5200_v63 }
0x36a2   :  { %4989 = vmatpush3.bf16.msra.mxu0 %v4988_v48 }
0x36a3   :  { %4990 = vmatprep.subr.bf16.mxu0 %v5200_v63 }
0x36a6   :  { %4992 = vmatpush3.bf16.msra.mxu0 %v4991_v53 }
0x36a7   :  { %4993 = vmatprep.subr.bf16.mxu0 %v5200_v63 }
0x36a9   :  { %v5193_v31 = vpop.eup %5192 }
0x36aa   :  { %v4073_v10 = vadd.f32 1.0, %v5193_v31  ;;  %4995 = vmatpush3.bf16.msra.mxu0 %v4994_v21 }
0x36ac   :  { %5194 = vrcp.f32 %v4073_v10 }
0x36b6   :  { %v5195_v34 = vpop.eup %5194 }
0x36b7   :  { %v4077_v28 = vmul.f32 %v5195_v34, %v4076_v37  ;;  %v4080_v5 = vsub.f32 1.0, %v5195_v34  ;;  %v4086_v26 = vmul.f32 %v5195_v34, %v3990_v1 }
0x36b9   :  { %v4078_v13 = vadd.f32 %v4077_v28, %v3992_v55 }
0x36bb   :  { %5196 = vtanh.f32 %v4078_v13 }
0x36c5   :  { %v5197_v15 = vpop.eup %5196 }
0x36c6   :  { %4082 = vrot.lane.b32.xlu0 %v5197_v15, %s5199_s22 }
0x3738   :  { %v4083_v57 = vpop.permute.xlu0 %4082 }
0x3739   :  { %v4085_v35 = vmul.f32 %v4083_v57, %v4080_v5 }
0x373b   :  { %v4087_v44 = vadd.f32 %v4086_v26, %v4085_v35 }
0x373d   :  { %4104 = vrot.lane.b32.xlu1 %v4087_v44, %s5199_s22 }
0x37af   :  { %v4105_v39 = vpop.permute.xlu1 %4104 }
0x37b0   :  { %4407 = vmatmul.mubr.msk.f32.vlgmr.msra.gmra.mrb[88].mxu0 %vm231_vm1, %v4105_v39 }
0x3883   :  { %v4174_v43 = vpop.f32.mrb[88].mxu0 }
0x3884   :  { %v4175_v60 = vadd.f32 %v4372_v54, %v4174_v43  ;;  %v4408_v2 = vpop.f32.mrb[89].mxu0 }
0x3886   :  { %v4178_v22 = vmax.f32 %v4175_v60, 0.0 }
0x3888   :  { %4418 = vmatmul.mubr.msk.f32.vlgmr.msra.gmra.mrb[40].mxu1 %vm4190_vm3, %v4178_v22 }
0x395b   :  { %v4260_v4 = vpop.f32.mrb[40].mxu1 }
0x395c   :  { %v4261_v16 = vadd.f32 %v4374_v61, %v4260_v4  ;;  %v4419_v46 = vpop.f32.mrb[41].mxu1 }
0x395e   :  { %4264 = vst [vmem:[%s6596_s21] sm:$0xff] %v4261_v16 }

</bundles_post_ra>
